<compile_context>
chip_gen: v7x
topology: tpu7x:2x2x1
jax: 0.10.0
libtpu: 0.0.40
codegen_flags: <defaults>
</compile_context>

<pallas_src>
import jax
import jax.numpy as jnp
from jax.experimental import pallas as pl
from jax.experimental.pallas import tpu as pltpu

LANE = 128


def _round_up(n, m):
    return ((n + m - 1) // m) * m


def _pad2(a, rows, cols):
    r, c = a.shape
    return jnp.pad(a, ((0, rows - r), (0, cols - c)))


# ----------------------------------------------------------------------------
# One-time parameter preprocessing (hoisted out of the forward pass).
# ----------------------------------------------------------------------------
def prepare_params(stream_params, comb_params, nstreams,
                   *, compute_dtype=jnp.bfloat16):
    """Run ONCE per model, not per forward call.

    stream_params / comb_params: lists of (W, b), W:(in,out), b:(1,out), f32.
    Returns a dict consumed by mlp_forward:
      * shared stream weights folded into block-diagonal layers
        (kron(I_nstreams, W)) so the concat disappears,
      * everything zero-padded to a common 128-lane width P,
      * matmul operands cast to compute_dtype (bf16 default; f32 acc stays),
      * layers 1..L-1 stacked into one (L-1,P,P) slab, biases into (L,1,P) f32.
    """
    n_stream_lin = len(stream_params)
    layers, acts = [], []

    # Shared stream weights -> block diagonal (stream s occupies block s, which
    # matches both the x column slicing and the torch.cat order).
    for l, (w, b) in enumerate(stream_params):
        w_bd = jnp.kron(jnp.eye(nstreams, dtype=w.dtype), w)
        b_bd = jnp.tile(b, (1, nstreams))
        layers.append((w_bd, b_bd))
        # Last stream layer: Sequential already ends in Tanh and forward()
        # applies an extra F.tanh -> tanh(tanh(.)).  Do NOT simplify.
        acts.append(2 if l == n_stream_lin - 1 else 1)

    for l, (w, b) in enumerate(comb_params):
        layers.append((w, b))
        acts.append(1 if l < len(comb_params) - 1 else 0)

    feat_in = layers[0][0].shape[0]                       # nstreams * coeff_num
    P = max(_round_up(w.shape[1], LANE) for w, _ in layers)

    w0 = _pad2(layers[0][0], feat_in, P).astype(compute_dtype)
    rest = [_pad2(w, P, P).astype(compute_dtype) for (w, _) in layers[1:]]
    w_stack = (jnp.stack(rest, axis=0) if rest
               else jnp.zeros((1, P, P), compute_dtype))  # unused if L == 1
    b_stack = jnp.stack([_pad2(b, 1, P).astype(jnp.float32)
                         for (_, b) in layers], axis=0)

    return dict(w0=w0, w_stack=w_stack, b_stack=b_stack, acts=tuple(acts),
                feat_in=feat_in, width=P, compute_dtype=compute_dtype)


# ----------------------------------------------------------------------------
# Kernel: flat stack of dense layers over one batch tile.
# ----------------------------------------------------------------------------
def _apply_act(h, flag):
    if flag == 2:            # tanh(tanh(.)) - mirrors the PyTorch module
        return jnp.tanh(jnp.tanh(h))
    if flag == 1:
        return jnp.tanh(h)
    return h


def _make_kernel(n_layers, acts, compute_dtype):
    def kernel(x_ref, w0_ref, ws_ref, bs_ref, o_ref):
        # Cast x to the matmul operand dtype in-VMEM (no wrapper HBM pass).
        h = jnp.dot(x_ref[...].astype(compute_dtype), w0_ref[...],
                    preferred_element_type=jnp.float32)
        h = h + bs_ref[0]                       # f32 bias
        h = _apply_act(h, acts[0])
        for l in range(1, n_layers):
            h = jnp.dot(h.astype(compute_dtype), ws_ref[l - 1],
                        preferred_element_type=jnp.float32)
            h = h + bs_ref[l]
            h = _apply_act(h, acts[l])
        o_ref[...] = h.astype(o_ref.dtype)
    return kernel


# ----------------------------------------------------------------------------
# Forward wrapper.
# ----------------------------------------------------------------------------
def mlp_forward(x, prepared, *, num_classes, batch_tile=2048, min_grid_steps=2,
                out_dtype=jnp.float32, trim_output=True):
    """x: (B, nstreams*coeff_num) float32.  `prepared` from prepare_params().

    out_dtype=jnp.bfloat16 halves output writeback if the consumer allows it.
    trim_output=False returns the lane-padded (B, P) slab (no extra slice pass).
    """
    B, F = x.shape
    assert F == prepared["feat_in"], "x width must equal nstreams*coeff_num"

    P = prepared["width"]
    acts = prepared["acts"]
    n_layers = len(acts)
    compute_dtype = prepared["compute_dtype"]
    w0, w_stack, b_stack = prepared["w0"], prepared["w_stack"], prepared["b_stack"]

    # Batch tile: big enough to amortize ~0.35us/step grid overhead, capped so
    # (a) the grid has >= min_grid_steps steps (keeps both v7x TCs busy) and
    # (b) VMEM stays well inside the 32 MiB scoped default on every generation
    #     (2048-row f32 in/out blocks + f32 intermediates are only a few MiB).
    tile = min(batch_tile, _round_up(pl.cdiv(B, min_grid_steps), 8))
    tile = max(8, _round_up(tile, 8))
    grid = (pl.cdiv(B, tile),)

    kernel = _make_kernel(n_layers, acts, compute_dtype)

    wsize = jnp.dtype(compute_dtype).itemsize
    flops = 2 * B * (F * P + (n_layers - 1) * P * P)
    transcendentals = B * P * sum(acts)                 # double-tanh counts as 2
    bytes_accessed = (x.size * x.dtype.itemsize
                      + B * P * jnp.dtype(out_dtype).itemsize
                      + (w0.size + w_stack.size) * wsize + b_stack.size * 4)

    out = pl.pallas_call(
        kernel,
        out_shape=jax.ShapeDtypeStruct((B, P), out_dtype),
        grid=grid,
        in_specs=[
            pl.BlockSpec((tile, F), lambda i: (i, 0)),          # batch tile of x
            pl.BlockSpec(w0.shape, lambda i: (0, 0)),           # resident params
            pl.BlockSpec(w_stack.shape, lambda i: (0, 0, 0)),
            pl.BlockSpec(b_stack.shape, lambda i: (0, 0, 0)),
        ],
        out_specs=pl.BlockSpec((tile, P), lambda i: (i, 0)),
        compiler_params=pltpu.CompilerParams(
            dimension_semantics=("parallel",)),
        cost_estimate=pl.CostEstimate(
            flops=flops, transcendentals=transcendentals,
            bytes_accessed=bytes_accessed),
    )(x, w0, w_stack, b_stack)

    return out[:, :num_classes] if trim_output else out


# ----------------------------------------------------------------------------
# Deterministic parameter init (PyTorch nn.Linear default: U(-1/sqrt(fan_in),.))
# ----------------------------------------------------------------------------
def init_linear(key, fan_in, fan_out):
    kw, kb = jax.random.split(key)
    bound = 1.0 / jnp.sqrt(fan_in)
    w = jax.random.uniform(kw, (fan_in, fan_out), jnp.float32, -bound, bound)
    b = jax.random.uniform(kb, (1, fan_out), jnp.float32, -bound, bound)
    return w, b


def reference_forward(x, stream_params, comb_params, nstreams, coeff_num):
    """Pure-JAX reference of the PyTorch forward (highest-precision matmuls)."""
    outs = []
    for s in range(nstreams):
        h = x[:, s * coeff_num:(s + 1) * coeff_num]
        for w, b in stream_params:
            h = jnp.tanh(jnp.dot(h, w, precision="highest") + b)
        outs.append(jnp.tanh(h))                 # extra F.tanh in forward()
    h = jnp.concatenate(outs, axis=1)
    for l, (w, b) in enumerate(comb_params):
        h = jnp.dot(h, w, precision="highest") + b
        if l < len(comb_params) - 1:
            h = jnp.tanh(h)
    return h


if __name__ == "__main__":
    # Small, module-consistent configuration.
    nstreams, coeff_num, num_classes = 3, 16, 10
    nlayers_ms, nunits_ms = 1, 32
    nlayers_comb, nunits_comb = 2, 64
    batch = 1000          # >=2 grid steps and a partial last batch tile

    key = jax.random.PRNGKey(0)
    keys = jax.random.split(key, 16)

    # Shared stream MLP: Linear(coeff,nunits_ms) + nlayers_ms x Linear(nunits_ms,nunits_ms)
    stream_params = [init_linear(keys[0], coeff_num, nunits_ms)]
    for l in range(nlayers_ms):
        stream_params.append(init_linear(keys[1 + l], nunits_ms, nunits_ms))

    # Combiner: Linear(nunits_ms*nstreams, nunits_comb) + (nlayers_comb-1) hidden + output
    comb_params = [init_linear(keys[8], nunits_ms * nstreams, nunits_comb)]
    for l in range(nlayers_comb - 1):
        comb_params.append(init_linear(keys[9 + l], nunits_comb, nunits_comb))
    comb_params.append(init_linear(keys[14], nunits_comb, num_classes))

    x = jax.random.normal(keys[15], (batch, nstreams * coeff_num), jnp.float32)

    ref = reference_forward(x, stream_params, comb_params, nstreams, coeff_num)

    # 1) f32 matmul operands: tight check (tolerance covers possible MXU
    #    reduced-precision f32 matmul modes, not kernel semantics).
    prep_f32 = prepare_params(stream_params, comb_params, nstreams,
                              compute_dtype=jnp.float32)
    out_f32 = jax.block_until_ready(
        mlp_forward(x, prep_f32, num_classes=num_classes))
    assert out_f32.shape == (batch, num_classes)
    diff_f32 = float(jnp.max(jnp.abs(out_f32 - ref)))
    assert diff_f32 < 2e-2, f"f32 mismatch vs reference: {diff_f32}"

    # 2) Default bf16 matmul-operand path (halved weight DMA, native MXU rate);
    #    accumulation / bias / tanh stay f32 -> loose tolerance.
    prep_bf16 = prepare_params(stream_params, comb_params, nstreams)
    out_bf16 = jax.block_until_ready(
        mlp_forward(x, prep_bf16, num_classes=num_classes))
    assert out_bf16.shape == (batch, num_classes)
    diff_bf16 = float(jnp.max(jnp.abs(out_bf16 - ref)))
    assert diff_bf16 < 1.5e-1, f"bf16 mismatch vs reference: {diff_bf16}"

    print("KERNEL_OK")
</pallas_src>

<mosaic_0001>
module attributes {stable_mosaic.version = 11 : i64} {
  func.func @kernel(%arg0: i32, %arg1: memref<504x48xf32, #tpu.memory_space<vmem>>, %arg2: memref<48x128xf32, #tpu.memory_space<vmem>>, %arg3: memref<4x128x128xf32, #tpu.memory_space<vmem>>, %arg4: memref<5x1x128xf32, #tpu.memory_space<vmem>>, %arg5: memref<504x128xf32, #tpu.memory_space<vmem>>) attributes {dimension_semantics = [#tpu.dimension_semantics<parallel>], iteration_bounds = array<i64: 2>, scalar_prefetch = 0 : i64, scratch_operands = 0 : i64, tpu.core_type = #tpu.core_type<tc>, window_params = [{transform_indices = @transform_0, window_bounds = array<i64: 504, 48>}, {pipeline_mode = #tpu.pipeline_mode<synchronous>, transform_indices = @transform_1, window_bounds = array<i64: 48, 128>}, {pipeline_mode = #tpu.pipeline_mode<synchronous>, transform_indices = @transform_2, window_bounds = array<i64: 4, 128, 128>}, {pipeline_mode = #tpu.pipeline_mode<synchronous>, transform_indices = @transform_3, window_bounds = array<i64: 5, 1, 128>}, {transform_indices = @transform_4, window_bounds = array<i64: 504, 128>}]} {
    %c0 = arith.constant 0 : index
    %c0_0 = arith.constant 0 : index
    %0 = vector.load %arg1[%c0, %c0_0] : memref<504x48xf32, #tpu.memory_space<vmem>>, vector<504x48xf32>
    %c0_1 = arith.constant 0 : index
    %c0_2 = arith.constant 0 : index
    %1 = vector.load %arg2[%c0_1, %c0_2] : memref<48x128xf32, #tpu.memory_space<vmem>>, vector<48x128xf32>
    %cst = arith.constant dense<0.000000e+00> : vector<504x128xf32>
    %2 = tpu.matmul %0, %1, %cst {dimension_numbers = #tpu.dot_dimension_numbers<[1], [0], [0], [1], [0, 0, 1, 1], [], []>} : vector<504x48xf32>, vector<48x128xf32>, vector<504x128xf32> -> vector<504x128xf32>
    %c0_3 = arith.constant 0 : index
    %c0_4 = arith.constant 0 : index
    %c0_5 = arith.constant 0 : index
    %3 = vector.load %arg4[%c0_3, %c0_4, %c0_5] : memref<5x1x128xf32, #tpu.memory_space<vmem>>, vector<1x1x128xf32>
    %4 = vector.shape_cast %3 : vector<1x1x128xf32> to vector<1x128xf32>
    %5 = vector.broadcast %4 : vector<1x128xf32> to vector<504x128xf32>
    %6 = arith.addf %2, %5 : vector<504x128xf32>
    %7 = math.tanh %6 : vector<504x128xf32>
    %c0_6 = arith.constant 0 : index
    %c0_7 = arith.constant 0 : index
    %c0_8 = arith.constant 0 : index
    %8 = vector.load %arg3[%c0_6, %c0_7, %c0_8] : memref<4x128x128xf32, #tpu.memory_space<vmem>>, vector<1x128x128xf32>
    %9 = vector.shape_cast %8 : vector<1x128x128xf32> to vector<128x128xf32>
    %cst_9 = arith.constant dense<0.000000e+00> : vector<504x128xf32>
    %10 = tpu.matmul %7, %9, %cst_9 {dimension_numbers = #tpu.dot_dimension_numbers<[1], [0], [0], [1], [0, 0, 1, 1], [], []>} : vector<504x128xf32>, vector<128x128xf32>, vector<504x128xf32> -> vector<504x128xf32>
    %c1 = arith.constant 1 : index
    %c0_10 = arith.constant 0 : index
    %c0_11 = arith.constant 0 : index
    %11 = vector.load %arg4[%c1, %c0_10, %c0_11] : memref<5x1x128xf32, #tpu.memory_space<vmem>>, vector<1x1x128xf32>
    %12 = vector.shape_cast %11 : vector<1x1x128xf32> to vector<1x128xf32>
    %13 = vector.broadcast %12 : vector<1x128xf32> to vector<504x128xf32>
    %14 = arith.addf %10, %13 : vector<504x128xf32>
    %15 = math.tanh %14 : vector<504x128xf32>
    %16 = math.tanh %15 : vector<504x128xf32>
    %c1_12 = arith.constant 1 : index
    %c0_13 = arith.constant 0 : index
    %c0_14 = arith.constant 0 : index
    %17 = vector.load %arg3[%c1_12, %c0_13, %c0_14] : memref<4x128x128xf32, #tpu.memory_space<vmem>>, vector<1x128x128xf32>
    %18 = vector.shape_cast %17 : vector<1x128x128xf32> to vector<128x128xf32>
    %cst_15 = arith.constant dense<0.000000e+00> : vector<504x128xf32>
    %19 = tpu.matmul %16, %18, %cst_15 {dimension_numbers = #tpu.dot_dimension_numbers<[1], [0], [0], [1], [0, 0, 1, 1], [], []>} : vector<504x128xf32>, vector<128x128xf32>, vector<504x128xf32> -> vector<504x128xf32>
    %c2 = arith.constant 2 : index
    %c0_16 = arith.constant 0 : index
    %c0_17 = arith.constant 0 : index
    %20 = vector.load %arg4[%c2, %c0_16, %c0_17] : memref<5x1x128xf32, #tpu.memory_space<vmem>>, vector<1x1x128xf32>
    %21 = vector.shape_cast %20 : vector<1x1x128xf32> to vector<1x128xf32>
    %22 = vector.broadcast %21 : vector<1x128xf32> to vector<504x128xf32>
    %23 = arith.addf %19, %22 : vector<504x128xf32>
    %24 = math.tanh %23 : vector<504x128xf32>
    %c2_18 = arith.constant 2 : index
    %c0_19 = arith.constant 0 : index
    %c0_20 = arith.constant 0 : index
    %25 = vector.load %arg3[%c2_18, %c0_19, %c0_20] : memref<4x128x128xf32, #tpu.memory_space<vmem>>, vector<1x128x128xf32>
    %26 = vector.shape_cast %25 : vector<1x128x128xf32> to vector<128x128xf32>
    %cst_21 = arith.constant dense<0.000000e+00> : vector<504x128xf32>
    %27 = tpu.matmul %24, %26, %cst_21 {dimension_numbers = #tpu.dot_dimension_numbers<[1], [0], [0], [1], [0, 0, 1, 1], [], []>} : vector<504x128xf32>, vector<128x128xf32>, vector<504x128xf32> -> vector<504x128xf32>
    %c3 = arith.constant 3 : index
    %c0_22 = arith.constant 0 : index
    %c0_23 = arith.constant 0 : index
    %28 = vector.load %arg4[%c3, %c0_22, %c0_23] : memref<5x1x128xf32, #tpu.memory_space<vmem>>, vector<1x1x128xf32>
    %29 = vector.shape_cast %28 : vector<1x1x128xf32> to vector<1x128xf32>
    %30 = vector.broadcast %29 : vector<1x128xf32> to vector<504x128xf32>
    %31 = arith.addf %27, %30 : vector<504x128xf32>
    %32 = math.tanh %31 : vector<504x128xf32>
    %c3_24 = arith.constant 3 : index
    %c0_25 = arith.constant 0 : index
    %c0_26 = arith.constant 0 : index
    %33 = vector.load %arg3[%c3_24, %c0_25, %c0_26] : memref<4x128x128xf32, #tpu.memory_space<vmem>>, vector<1x128x128xf32>
    %34 = vector.shape_cast %33 : vector<1x128x128xf32> to vector<128x128xf32>
    %cst_27 = arith.constant dense<0.000000e+00> : vector<504x128xf32>
    %35 = tpu.matmul %32, %34, %cst_27 {dimension_numbers = #tpu.dot_dimension_numbers<[1], [0], [0], [1], [0, 0, 1, 1], [], []>} : vector<504x128xf32>, vector<128x128xf32>, vector<504x128xf32> -> vector<504x128xf32>
    %c4 = arith.constant 4 : index
    %c0_28 = arith.constant 0 : index
    %c0_29 = arith.constant 0 : index
    %36 = vector.load %arg4[%c4, %c0_28, %c0_29] : memref<5x1x128xf32, #tpu.memory_space<vmem>>, vector<1x1x128xf32>
    %37 = vector.shape_cast %36 : vector<1x1x128xf32> to vector<1x128xf32>
    %38 = vector.broadcast %37 : vector<1x128xf32> to vector<504x128xf32>
    %39 = arith.addf %35, %38 : vector<504x128xf32>
    %c0_30 = arith.constant 0 : index
    %c0_31 = arith.constant 0 : index
    %40 = vector.load %arg5[%c0_30, %c0_31] : memref<504x128xf32, #tpu.memory_space<vmem>>, vector<504x128xf32>
    tpu.vector_store %arg5[%c0_30, %c0_31], %39 {strides = array<i32>} : memref<504x128xf32, #tpu.memory_space<vmem>>, vector<504x128xf32>,
    return
  }
  func.func @transform_0(%arg0: i32) -> (i32, i32) {
    %c0_i32 = arith.constant 0 : i32
    %c0_i32_0 = arith.constant 0 : i32
    return %arg0, %c0_i32 : i32, i32
  }
  func.func @transform_1(%arg0: i32) -> (i32, i32) {
    %c0_i32 = arith.constant 0 : i32
    %c0_i32_0 = arith.constant 0 : i32
    %c0_i32_1 = arith.constant 0 : i32
    return %c0_i32, %c0_i32_0 : i32, i32
  }
  func.func @transform_2(%arg0: i32) -> (i32, i32, i32) {
    %c0_i32 = arith.constant 0 : i32
    %c0_i32_0 = arith.constant 0 : i32
    %c0_i32_1 = arith.constant 0 : i32
    %c0_i32_2 = arith.constant 0 : i32
    return %c0_i32, %c0_i32_0, %c0_i32_1 : i32, i32, i32
  }
  func.func @transform_3(%arg0: i32) -> (i32, i32, i32) {
    %c0_i32 = arith.constant 0 : i32
    %c0_i32_0 = arith.constant 0 : i32
    %c0_i32_1 = arith.constant 0 : i32
    %c0_i32_2 = arith.constant 0 : i32
    return %c0_i32, %c0_i32_0, %c0_i32_1 : i32, i32, i32
  }
  func.func @transform_4(%arg0: i32) -> (i32, i32) {
    %c0_i32 = arith.constant 0 : i32
    %c0_i32_0 = arith.constant 0 : i32
    return %arg0, %c0_i32 : i32, i32
  }
}

</mosaic_0001>

<bundles_post_ra>
// kernel: tpu_custom_call.1
= control target key start
LH: loop header
LB: loop body
LE: loop exit
PB: predicated region body
PF: predicated region fallthrough
CT: control target
= control target key end

     0   :  { %9 = vsyncpa [#allocation3], 0  ;;  %s7071_s0 = inlined_call_operand.vmem [shape: f32[1000,48], index: 0, kind: input, shape index: {}]   ;;  %s7072_s1 = inlined_call_operand.vmem [shape: f32[48,128], index: 1, kind: input, shape index: {}]   ;;  %s7073_s2 = inlined_call_operand.vmem [shape: f32[4,128,128], index: 2, kind: input, shape index: {}]   ;;  %s7074_s3 = inlined_call_operand.vmem [shape: f32[5,1,128], index: 3, kind: input, shape index: {}]   ;;  %s7075_s4 = inlined_call_operand.hbm [shape: f32[1000,128], index: 4, kind: output, shape index: {}]  }
   0x1   :  { %11 = vsyncpa [#allocation3 + $0x1], 0  ;;  %s5435_s15 = smov 0   ;;  %s5437_s16 = smov 0  }
   0x2   :  { %s5439_s17 = smov 0   ;;  %s5441_s18 = smov 0  }
   0x3 LB: > { %s5456_s19 = sadd.s32 4294967295, %s5402_s18   ;;  %s2948_s20 = sadd.s32 4294967294, %s5402_s18   ;;  %s5402_s18 = sphi %s5441_s18, %s7081_s18   ;;  %s5398_s17 = sphi %s5439_s17, %s7080_s17   ;;  %s5394_s16 = sphi %s5437_s16, %s7079_s16   ;;  %s5390_s15 = sphi %s5435_s15, %s7078_s15  }
   0x4   : > { %s5460_s21 = sadd.s32 1, %s5402_s18   ;;  %s113_s22 = sadd.s32 1, %s5398_s17 }
   0x5   : > { %s110_s23 = ssub.s32 %s5402_s18, %s5460_s21  ;;  %p123_p0 = scmp.ne.s32.totalorder %s5398_s17, %s5394_s16 }
   0x6   : > { %p111_p1 = scmp.eq.s32.totalorder %s110_s23, 0  ;;  %p124_p2 = scmp.eq.s32.totalorder %s5456_s19, 1 }
   0x7   : > { %p129_p3 = scmp.ne.s32.totalorder %s5394_s16, %s5390_s15  ;;  %p130_p4 = scmp.eq.s32.totalorder %s2948_s20, 1 }
   0x8   : > { %s5471_s24 = scalar_select %p111_p1, %s5398_s17, %s113_s22  }
   0x9   : > { %p5473_p5 = por %p124_p2, %p123_p0  ;;  %p5477_p6 = por %p130_p4, %p129_p3 }
   0xa   : > { %p2951_p7 = scmp.ge.s32.totalorder %s5402_s18, 1  ;;  %p174_p8 = scmp.lt.s32.totalorder %s5402_s18, 3 }
   0xc   : > { %p175_p9 = pnand %p2951_p7, %p174_p8 }
   0xd   : > { %v286_v0 = vld [vmem:[%s7072_s1] sm:$0xff] (!%p175_p9)  ;;  %v287_v1 = vld [vmem:[%s7072_s1 + $0x8] sm:$0xff] (!%p175_p9)  ;;  %v288_v2 = vld [vmem:[%s7072_s1 + $0x10] sm:$0xff] (!%p175_p9)  ;;  %v5404_v3 = vmov (!%p175_p9), 0.0|0.0   ;;  %vm5405_vm0 = vmmov (!%p175_p9), 0   ;;  %v5406_v6 = vmov (!%p175_p9), 0.0  }
   0xe   : > { %178 = sbr.rel (%p175_p9) target bundleno = 1431 (0x597), region = 36  ;;  %4551 = vmatprep.subr.bf16.mxu0 (!%p175_p9), %v5404_v3  ;;  %v4552_v4 = vpack.c.bf16 (!%p175_p9), %v287_v1, %v286_v0  ;;  %v289_v5 = vld [vmem:[%s7072_s1 + $0x18] sm:$0xff] (!%p175_p9)  ;;  %3478 = vmatprep.mubr.msk.f32.mxu0 (!%p175_p9), %vm5405_vm0, %v5406_v6  ;;  %v290_v8 = vld [vmem:[%s7072_s1 + $0x20] sm:$0xff] (!%p175_p9)  ;;  %v291_v9 = vld [vmem:[%s7072_s1 + $0x28] sm:$0xff] (!%p175_p9)  ;;  %vm299_vm1 = vcmask (!%p175_p9), 392192   ;;  %s201_s28 = sand.u32 (!%p175_p9), 1, %s5394_s16  }
   0xf   : > { %s5499_s9 = smul.u32 (!%p175_p9), 63, %s5456_s19  ;;  %4656 = vmatprep.subr.bf16.mxu1 (!%p175_p9), %v5404_v3  ;;  %3574 = vmatprep.mubr.msk.f32.mxu1 (!%p175_p9), %vm5405_vm0, %v5406_v6  ;;  %v4555_v7 = vpack.c.bf16 (!%p175_p9), %v289_v5, %v288_v2  ;;  %v4558_v10 = vpack.c.bf16 (!%p175_p9), %v291_v9, %v290_v8  ;;  %v932_v12 = vld [vmem:[%s7073_s2] sm:$0xff] (!%p175_p9)  ;;  %v933_v13 = vld [vmem:[%s7073_s2 + $0x8] sm:$0xff] (!%p175_p9)  ;;  %v934_v17 = vld [vmem:[%s7073_s2 + $0x10] sm:$0xff] (!%p175_p9)  ;;  %s7010_s8 = scalar_lea.sflag (!%p175_p9), [#allocation3], %s201_s28 }
  0x10   : > { %4553 = vmatpush3.bf16.msra.mxu0 (!%p175_p9), %v4552_v4  ;;  %4659 = vmatpush3.bf16.msra.mxu1 (!%p175_p9), %v4552_v4  ;;  %v4561_v15 = vpack.c.bf16 (!%p175_p9), %v933_v13, %v932_v12  ;;  %v935_v18 = vld [vmem:[%s7073_s2 + $0x18] sm:$0xff] (!%p175_p9)  ;;  %v936_v22 = vld [vmem:[%s7073_s2 + $0x20] sm:$0xff] (!%p175_p9)  ;;  %v937_v25 = vld [vmem:[%s7073_s2 + $0x28] sm:$0xff] (!%p175_p9)  ;;  %s4662_s29 = smul.u32 (!%p175_p9), 504, %s201_s28 }
  0x11   : > { %p209_p10 = scmp.lt.s32.totalorder (!%p175_p9), %s5499_s9, 124  ;;  %4554 = vmatprep.subr.bf16.mxu0 (!%p175_p9), %v5404_v3  ;;  %4657 = vmatprep.subr.bf16.mxu1 (!%p175_p9), %v5404_v3  ;;  %v4564_v21 = vpack.c.bf16 (!%p175_p9), %v935_v18, %v934_v17  ;;  %v4567_v26 = vpack.c.bf16 (!%p175_p9), %v937_v25, %v936_v22  ;;  %v938_v27 = vld [vmem:[%s7073_s2 + $0x30] sm:$0xff] (!%p175_p9)  ;;  %v939_v28 = vld [vmem:[%s7073_s2 + $0x38] sm:$0xff] (!%p175_p9)  ;;  %v940_v32 = vld [vmem:[%s7073_s2 + $0x40] sm:$0xff] (!%p175_p9) }
  0x12   : > { %v4570_v31 = vpack.c.bf16 (!%p175_p9), %v939_v28, %v938_v27  ;;  %v941_v33 = vld [vmem:[%s7073_s2 + $0x48] sm:$0xff] (!%p175_p9)  ;;  %v942_v37 = vld [vmem:[%s7073_s2 + $0x50] sm:$0xff] (!%p175_p9)  ;;  %v943_v38 = vld [vmem:[%s7073_s2 + $0x58] sm:$0xff] (!%p175_p9)  ;;  %s6857_s6 = scalar_lea.vmem (!%p175_p9), [#allocation2], %s4662_s29 }
  0x13   : > { %v4573_v36 = vpack.c.bf16 (!%p175_p9), %v941_v33, %v940_v32  ;;  %v4576_v41 = vpack.c.bf16 (!%p175_p9), %v943_v38, %v942_v37  ;;  %v944_v42 = vld [vmem:[%s7073_s2 + $0x60] sm:$0xff] (!%p175_p9)  ;;  %v945_v43 = vld [vmem:[%s7073_s2 + $0x68] sm:$0xff] (!%p175_p9)  ;;  %v946_v47 = vld [vmem:[%s7073_s2 + $0x70] sm:$0xff] (!%p175_p9) }
  0x14   : > { %4556 = vmatpush3.bf16.msra.mxu0 (!%p175_p9), %v4555_v7  ;;  %4660 = vmatpush3.bf16.msra.mxu1 (!%p175_p9), %v4555_v7  ;;  %v4579_v46 = vpack.c.bf16 (!%p175_p9), %v945_v43, %v944_v42  ;;  %v947_v48 = vld [vmem:[%s7073_s2 + $0x78] sm:$0xff] (!%p175_p9)  ;;  %v3020_v37 = vld [vmem:[%s7073_s2 + $0x88] sm:$0xff] (!%p175_p9) }
  0x15   : > { %s210_s14 = scalar_select %p209_p10, %s5499_s9, 124  ;;  %4557 = vmatprep.subr.bf16.mxu0 %v5404_v3  ;;  %4658 = vmatprep.subr.bf16.mxu1 %v5404_v3  ;;  %v4582_v51 = vpack.c.bf16 %v947_v48, %v946_v47 }
  0x16   : > { %s2875_s10 = ssub.s32 (%p5473_p5), 125, %s5499_s9 }
  0x17   : > { %s2952_s20 = sshll.u32 %s210_s14, 3  ;;  %p2876_p11 = scmp.lt.s32.totalorder (%p5473_p5), %s2875_s10, 63 }
  0x18   : > { %s5518_s27 = scalar_lea.vmem %s7071_s0, %s2952_s20  ;;  %4559 = vmatpush3.bf16.msra.mxu0 %v4558_v10  ;;  %4661 = vmatpush3.bf16.msra.mxu1 %v4558_v10 }
  0x19   : > { %v223_v11 = vld [vmem:[%s5518_s27] sm:$0xff]  ;;  %4560 = vmatprep.subr.bf16.mxu1 %v5404_v3  ;;  %4584 = vmatprep.subr.bf16.mxu0 %v5404_v3  ;;  %v224_v14 = vld [vmem:[%s5518_s27 + $0x8] sm:$0xff]  ;;  %v225_v19 = vld [vmem:[%s5518_s27 + $0x10] sm:$0xff] }
  0x1a   : > { %v255_v16 = vld [vmem:[%s5518_s27 + $0x100] sm:$0xff]  ;;  %v256_v20 = vld [vmem:[%s5518_s27 + $0x108] sm:$0xff]  ;;  %v226_v23 = vld [vmem:[%s5518_s27 + $0x18] sm:$0xff] }
  0x1b   : > { %3479 = vmatmul.mubr.msk.f32.vlgmr.msra.gmra.mrb[0].mxu0 %vm299_vm1, %v223_v11  ;;  %3575 = vmatmul.mubr.msk.f32.vlgmr.msra.gmra.mrb[0].mxu1 %vm299_vm1, %v255_v16  ;;  %v257_v24 = vld [vmem:[%s5518_s27 + $0x110] sm:$0xff]  ;;  %v227_v29 = vld [vmem:[%s5518_s27 + $0x20] sm:$0xff]  ;;  %v258_v30 = vld [vmem:[%s5518_s27 + $0x118] sm:$0xff] }
  0x1c   : > { %3481 = vmatprep.mubr.msk.f32.mxu0 %vm5405_vm0, %v5406_v6  ;;  %4562 = vmatpush3.bf16.msra.mxu1 %v4561_v15  ;;  %v228_v34 = vld [vmem:[%s5518_s27 + $0x28] sm:$0xff]  ;;  %v259_v35 = vld [vmem:[%s5518_s27 + $0x120] sm:$0xff]  ;;  %v229_v39 = vld [vmem:[%s5518_s27 + $0x30] sm:$0xff] }
  0x1d   : > { %3577 = vmatprep.mubr.msk.f32.mxu1 %vm5405_vm0, %v5406_v6  ;;  %4563 = vmatprep.subr.bf16.mxu1 %v5404_v3  ;;  %v260_v40 = vld [vmem:[%s5518_s27 + $0x128] sm:$0xff]  ;;  %v230_v44 = vld [vmem:[%s5518_s27 + $0x38] sm:$0xff]  ;;  %v261_v45 = vld [vmem:[%s5518_s27 + $0x130] sm:$0xff] }
  0x1e   : > { %v231_v49 = vld [vmem:[%s5518_s27 + $0x40] sm:$0xff]  ;;  %v262_v50 = vld [vmem:[%s5518_s27 + $0x138] sm:$0xff]  ;;  %v232_v52 = vld [vmem:[%s5518_s27 + $0x48] sm:$0xff] }
  0x1f   : > { %3482 = vmatmul.mubr.msk.f32.gmra.mrb[2].mxu0 %vm299_vm1, %v224_v14  ;;  %3578 = vmatmul.mubr.msk.f32.gmra.mrb[2].mxu1 %vm299_vm1, %v256_v20  ;;  %v263_v53 = vld [vmem:[%s5518_s27 + $0x140] sm:$0xff]  ;;  %v233_v54 = vld [vmem:[%s5518_s27 + $0x50] sm:$0xff]  ;;  %v264_v55 = vld [vmem:[%s5518_s27 + $0x148] sm:$0xff] }
  0x20   : > { %3484 = vmatprep.mubr.msk.f32.mxu0 %vm5405_vm0, %v5406_v6  ;;  %3580 = vmatprep.mubr.msk.f32.mxu1 %vm5405_vm0, %v5406_v6  ;;  %v234_v56 = vld [vmem:[%s5518_s27 + $0x58] sm:$0xff]  ;;  %v265_v57 = vld [vmem:[%s5518_s27 + $0x150] sm:$0xff]  ;;  %v235_v58 = vld [vmem:[%s5518_s27 + $0x60] sm:$0xff] }
  0x21   : > { %4565 = vmatpush3.bf16.msra.mxu1 %v4564_v21  ;;  %v266_v59 = vld [vmem:[%s5518_s27 + $0x158] sm:$0xff]  ;;  %v236_v60 = vld [vmem:[%s5518_s27 + $0x68] sm:$0xff]  ;;  %v267_v61 = vld [vmem:[%s5518_s27 + $0x160] sm:$0xff] }
  0x22   : > { %4566 = vmatprep.subr.bf16.mxu1 %v5404_v3  ;;  %v237_v62 = vld [vmem:[%s5518_s27 + $0x70] sm:$0xff]  ;;  %v268_v63 = vld [vmem:[%s5518_s27 + $0x168] sm:$0xff]  ;;  %v238_v0 = vld [vmem:[%s5518_s27 + $0x78] sm:$0xff] }
  0x23   : > { %3485 = vmatmul.mubr.msk.f32.gmra.mrb[4].mxu0 %vm299_vm1, %v225_v19  ;;  %3581 = vmatmul.mubr.msk.f32.gmra.mrb[4].mxu1 %vm299_vm1, %v257_v24  ;;  %v269_v1 = vld [vmem:[%s5518_s27 + $0x170] sm:$0xff]  ;;  %v239_v2 = vld [vmem:[%s5518_s27 + $0x80] sm:$0xff]  ;;  %v270_v4 = vld [vmem:[%s5518_s27 + $0x178] sm:$0xff] }
  0x24   : > { %3487 = vmatprep.mubr.msk.f32.mxu0 %vm5405_vm0, %v5406_v6  ;;  %3583 = vmatprep.mubr.msk.f32.mxu1 %vm5405_vm0, %v5406_v6  ;;  %v240_v5 = vld [vmem:[%s5518_s27 + $0x88] sm:$0xff]  ;;  %v271_v7 = vld [vmem:[%s5518_s27 + $0x180] sm:$0xff]  ;;  %v241_v8 = vld [vmem:[%s5518_s27 + $0x90] sm:$0xff] }
  0x25   : > { %4568 = vmatpush3.bf16.msra.mxu1 %v4567_v26  ;;  %v272_v9 = vld [vmem:[%s5518_s27 + $0x188] sm:$0xff]  ;;  %v242_v10 = vld [vmem:[%s5518_s27 + $0x98] sm:$0xff]  ;;  %v273_v11 = vld [vmem:[%s5518_s27 + $0x190] sm:$0xff] }
  0x26   : > { %4569 = vmatprep.subr.bf16.mxu1 %v5404_v3  ;;  %v243_v12 = vld [vmem:[%s5518_s27 + $0xa0] sm:$0xff]  ;;  %v274_v13 = vld [vmem:[%s5518_s27 + $0x198] sm:$0xff]  ;;  %v244_v14 = vld [vmem:[%s5518_s27 + $0xa8] sm:$0xff] }
  0x27   : > { %3488 = vmatmul.mubr.msk.f32.gmra.mrb[6].mxu0 %vm299_vm1, %v226_v23  ;;  %3584 = vmatmul.mubr.msk.f32.gmra.mrb[6].mxu1 %vm299_vm1, %v258_v30  ;;  %v275_v15 = vld [vmem:[%s5518_s27 + $0x1a0] sm:$0xff]  ;;  %v245_v16 = vld [vmem:[%s5518_s27 + $0xb0] sm:$0xff]  ;;  %v276_v17 = vld [vmem:[%s5518_s27 + $0x1a8] sm:$0xff] }
  0x28   : > { %3490 = vmatprep.mubr.msk.f32.mxu0 %vm5405_vm0, %v5406_v6  ;;  %3586 = vmatprep.mubr.msk.f32.mxu1 %vm5405_vm0, %v5406_v6  ;;  %v246_v18 = vld [vmem:[%s5518_s27 + $0xb8] sm:$0xff]  ;;  %v277_v19 = vld [vmem:[%s5518_s27 + $0x1b0] sm:$0xff]  ;;  %v247_v20 = vld [vmem:[%s5518_s27 + $0xc0] sm:$0xff] }
  0x29   : > { %4571 = vmatpush3.bf16.msra.mxu1 %v4570_v31  ;;  %v278_v21 = vld [vmem:[%s5518_s27 + $0x1b8] sm:$0xff]  ;;  %v248_v22 = vld [vmem:[%s5518_s27 + $0xc8] sm:$0xff]  ;;  %v279_v23 = vld [vmem:[%s5518_s27 + $0x1c0] sm:$0xff] }
  0x2a   : > { %4572 = vmatprep.subr.bf16.mxu1 %v5404_v3  ;;  %v249_v24 = vld [vmem:[%s5518_s27 + $0xd0] sm:$0xff]  ;;  %v280_v25 = vld [vmem:[%s5518_s27 + $0x1c8] sm:$0xff]  ;;  %v250_v26 = vld [vmem:[%s5518_s27 + $0xd8] sm:$0xff] }
  0x2b   : > { %3491 = vmatmul.mubr.msk.f32.gmra.mrb[8].mxu0 %vm299_vm1, %v227_v29  ;;  %3587 = vmatmul.mubr.msk.f32.gmra.mrb[8].mxu1 %vm299_vm1, %v259_v35  ;;  %v281_v27 = vld [vmem:[%s5518_s27 + $0x1d0] sm:$0xff]  ;;  %v251_v28 = vld [vmem:[%s5518_s27 + $0xe0] sm:$0xff]  ;;  %v282_v29 = vld [vmem:[%s5518_s27 + $0x1d8] sm:$0xff] }
  0x2c   : > { %3493 = vmatprep.mubr.msk.f32.mxu0 %vm5405_vm0, %v5406_v6  ;;  %3589 = vmatprep.mubr.msk.f32.mxu1 %vm5405_vm0, %v5406_v6  ;;  %v252_v30 = vld [vmem:[%s5518_s27 + $0xe8] sm:$0xff]  ;;  %v283_v31 = vld [vmem:[%s5518_s27 + $0x1e0] sm:$0xff]  ;;  %v253_v32 = vld [vmem:[%s5518_s27 + $0xf0] sm:$0xff] }
  0x2d   : > { %4574 = vmatpush3.bf16.msra.mxu1 %v4573_v36  ;;  %v284_v33 = vld [vmem:[%s5518_s27 + $0x1e8] sm:$0xff]  ;;  %v285_v35 = vld [vmem:[%s5518_s27 + $0x1f0] sm:$0xff]  ;;  %v3019_v36 = vld [vmem:[%s7073_s2 + $0x80] sm:$0xff] }
  0x2e   : > { %4575 = vmatprep.subr.bf16.mxu1 %v5404_v3  ;;  %v4585_v38 = vpack.c.bf16 %v3020_v37, %v3019_v36 }
  0x2f   : > { %3494 = vmatmul.mubr.msk.f32.gmra.mrb[10].mxu0 %vm299_vm1, %v228_v34  ;;  %3590 = vmatmul.mubr.msk.f32.gmra.mrb[10].mxu1 %vm299_vm1, %v260_v40  ;;  %v254_v34 = vld [vmem:[%s5518_s27 + $0xf8] sm:$0xff] }
  0x30   : > { %3496 = vmatprep.mubr.msk.f32.mxu0 %vm5405_vm0, %v5406_v6  ;;  %3592 = vmatprep.mubr.msk.f32.mxu1 %vm5405_vm0, %v5406_v6 }
  0x31   : > { %4577 = vmatpush3.bf16.msra.mxu1 %v4576_v41  ;;  %4586 = vmatpush3.bf16.msra.mxu0 %v4585_v38 }
  0x32   : > { %4578 = vmatprep.subr.bf16.mxu1 %v5404_v3  ;;  %4587 = vmatprep.subr.bf16.mxu0 %v5404_v3 }
  0x33   : > { %3497 = vmatmul.mubr.msk.f32.gmra.mrb[12].mxu0 %vm299_vm1, %v229_v39  ;;  %3593 = vmatmul.mubr.msk.f32.gmra.mrb[12].mxu1 %vm299_vm1, %v261_v45  ;;  %v5840_v39 = vld [vmem:[%s7074_s3] ss:$0 sm:$0xff] }
  0x34   : > { %3499 = vmatprep.mubr.msk.f32.mxu0 %vm5405_vm0, %v5406_v6  ;;  %3595 = vmatprep.mubr.msk.f32.mxu1 %vm5405_vm0, %v5406_v6 }
  0x35   : > { %4580 = vmatpush3.bf16.msra.mxu1 %v4579_v46 }
  0x36   : > { %4581 = vmatprep.subr.bf16.mxu1 %v5404_v3 }
  0x37   : > { %3500 = vmatmul.mubr.msk.f32.gmra.mrb[14].mxu0 %vm299_vm1, %v230_v44  ;;  %3596 = vmatmul.mubr.msk.f32.gmra.mrb[14].mxu1 %vm299_vm1, %v262_v50 }
  0x38   : > { %3502 = vmatprep.mubr.msk.f32.mxu0 %vm5405_vm0, %v5406_v6  ;;  %3598 = vmatprep.mubr.msk.f32.mxu1 %vm5405_vm0, %v5406_v6 }
  0x39   : > { %4583 = vmatpush3.bf16.msra.mxu1 %v4582_v51 }
  0x3a   : > { %4608 = vmatprep.subr.bf16.mxu1 %v5404_v3 }
  0x3b   : > { %3503 = vmatmul.mubr.msk.f32.gmra.mrb[16].mxu0 %vm299_vm1, %v231_v49  ;;  %3599 = vmatmul.mubr.msk.f32.gmra.mrb[16].mxu1 %vm299_vm1, %v263_v53  ;;  %v3021_v53 = vld [vmem:[%s7073_s2 + $0x90] sm:$0xff] }
  0x3c   : > { %3505 = vmatprep.mubr.msk.f32.mxu0 %vm5405_vm0, %v5406_v6  ;;  %3601 = vmatprep.mubr.msk.f32.mxu1 %vm5405_vm0, %v5406_v6 }
  0x3f   : > { %3506 = vmatmul.mubr.msk.f32.gmra.mrb[18].mxu0 %vm299_vm1, %v232_v52  ;;  %3602 = vmatmul.mubr.msk.f32.gmra.mrb[18].mxu1 %vm299_vm1, %v264_v55 }
  0x40   : > { %3508 = vmatprep.mubr.msk.f32.mxu0 %vm5405_vm0, %v5406_v6  ;;  %3604 = vmatprep.mubr.msk.f32.mxu1 %vm5405_vm0, %v5406_v6 }
  0x43   : > { %3509 = vmatmul.mubr.msk.f32.gmra.mrb[20].mxu0 %vm299_vm1, %v233_v54  ;;  %3605 = vmatmul.mubr.msk.f32.gmra.mrb[20].mxu1 %vm299_vm1, %v265_v57  ;;  %v3022_v54 = vld [vmem:[%s7073_s2 + $0x98] sm:$0xff] }
  0x44   : > { %3511 = vmatprep.mubr.msk.f32.mxu0 %vm5405_vm0, %v5406_v6  ;;  %3607 = vmatprep.mubr.msk.f32.mxu1 %vm5405_vm0, %v5406_v6  ;;  %v4588_v55 = vpack.c.bf16 %v3022_v54, %v3021_v53 }
  0x46   : > { %4589 = vmatpush3.bf16.msra.mxu0 %v4588_v55 }
  0x47   : > { %3512 = vmatmul.mubr.msk.f32.gmra.mrb[22].mxu0 %vm299_vm1, %v234_v56  ;;  %3608 = vmatmul.mubr.msk.f32.gmra.mrb[22].mxu1 %vm299_vm1, %v266_v59 }
  0x48   : > { %3514 = vmatprep.mubr.msk.f32.mxu0 %vm5405_vm0, %v5406_v6  ;;  %3610 = vmatprep.mubr.msk.f32.mxu1 %vm5405_vm0, %v5406_v6 }
  0x49   : > { %4590 = vmatprep.subr.bf16.mxu0 %v5404_v3 }
  0x4b   : > { %3515 = vmatmul.mubr.msk.f32.gmra.mrb[24].mxu0 %vm299_vm1, %v235_v58  ;;  %3611 = vmatmul.mubr.msk.f32.gmra.mrb[24].mxu1 %vm299_vm1, %v267_v61 }
  0x4c   : > { %3517 = vmatprep.mubr.msk.f32.mxu0 %vm5405_vm0, %v5406_v6  ;;  %3613 = vmatprep.mubr.msk.f32.mxu1 %vm5405_vm0, %v5406_v6 }
  0x4f   : > { %3518 = vmatmul.mubr.msk.f32.gmra.mrb[26].mxu0 %vm299_vm1, %v236_v60  ;;  %3614 = vmatmul.mubr.msk.f32.gmra.mrb[26].mxu1 %vm299_vm1, %v268_v63 }
  0x50   : > { %3520 = vmatprep.mubr.msk.f32.mxu0 %vm5405_vm0, %v5406_v6  ;;  %3616 = vmatprep.mubr.msk.f32.mxu1 %vm5405_vm0, %v5406_v6 }
  0x53   : > { %3521 = vmatmul.mubr.msk.f32.gmra.mrb[28].mxu0 %vm299_vm1, %v237_v62  ;;  %3617 = vmatmul.mubr.msk.f32.gmra.mrb[28].mxu1 %vm299_vm1, %v269_v1 }
  0x54   : > { %3523 = vmatprep.mubr.msk.f32.mxu0 %vm5405_vm0, %v5406_v6  ;;  %3619 = vmatprep.mubr.msk.f32.mxu1 %vm5405_vm0, %v5406_v6 }
  0x57   : > { %3524 = vmatmul.mubr.msk.f32.gmra.mrb[30].mxu0 %vm299_vm1, %v238_v0  ;;  %3620 = vmatmul.mubr.msk.f32.gmra.mrb[30].mxu1 %vm299_vm1, %v270_v4 }
  0x58   : > { %3526 = vmatprep.mubr.msk.f32.mxu0 %vm5405_vm0, %v5406_v6  ;;  %3622 = vmatprep.mubr.msk.f32.mxu1 %vm5405_vm0, %v5406_v6 }
  0x5b   : > { %3527 = vmatmul.mubr.msk.f32.gmra.mrb[32].mxu0 %vm299_vm1, %v239_v2  ;;  %3623 = vmatmul.mubr.msk.f32.gmra.mrb[32].mxu1 %vm299_vm1, %v271_v7 }
  0x5c   : > { %3529 = vmatprep.mubr.msk.f32.mxu0 %vm5405_vm0, %v5406_v6  ;;  %3625 = vmatprep.mubr.msk.f32.mxu1 %vm5405_vm0, %v5406_v6 }
  0x5f   : > { %3530 = vmatmul.mubr.msk.f32.gmra.mrb[34].mxu0 %vm299_vm1, %v240_v5  ;;  %3626 = vmatmul.mubr.msk.f32.gmra.mrb[34].mxu1 %vm299_vm1, %v272_v9 }
  0x60   : > { %3532 = vmatprep.mubr.msk.f32.mxu0 %vm5405_vm0, %v5406_v6  ;;  %3628 = vmatprep.mubr.msk.f32.mxu1 %vm5405_vm0, %v5406_v6 }
  0x63   : > { %3533 = vmatmul.mubr.msk.f32.gmra.mrb[36].mxu0 %vm299_vm1, %v241_v8  ;;  %3629 = vmatmul.mubr.msk.f32.gmra.mrb[36].mxu1 %vm299_vm1, %v273_v11 }
  0x64   : > { %3535 = vmatprep.mubr.msk.f32.mxu0 %vm5405_vm0, %v5406_v6  ;;  %3631 = vmatprep.mubr.msk.f32.mxu1 %vm5405_vm0, %v5406_v6 }
  0x67   : > { %3536 = vmatmul.mubr.msk.f32.gmra.mrb[38].mxu0 %vm299_vm1, %v242_v10  ;;  %3632 = vmatmul.mubr.msk.f32.gmra.mrb[38].mxu1 %vm299_vm1, %v274_v13 }
  0x68   : > { %3538 = vmatprep.mubr.msk.f32.mxu0 %vm5405_vm0, %v5406_v6  ;;  %3634 = vmatprep.mubr.msk.f32.mxu1 %vm5405_vm0, %v5406_v6 }
  0x6b   : > { %3539 = vmatmul.mubr.msk.f32.gmra.mrb[40].mxu0 %vm299_vm1, %v243_v12  ;;  %3635 = vmatmul.mubr.msk.f32.gmra.mrb[40].mxu1 %vm299_vm1, %v275_v15 }
  0x6c   : > { %3541 = vmatprep.mubr.msk.f32.mxu0 %vm5405_vm0, %v5406_v6  ;;  %3637 = vmatprep.mubr.msk.f32.mxu1 %vm5405_vm0, %v5406_v6 }
  0x6f   : > { %3542 = vmatmul.mubr.msk.f32.gmra.mrb[42].mxu0 %vm299_vm1, %v244_v14  ;;  %3638 = vmatmul.mubr.msk.f32.gmra.mrb[42].mxu1 %vm299_vm1, %v276_v17 }
  0x70   : > { %3544 = vmatprep.mubr.msk.f32.mxu0 %vm5405_vm0, %v5406_v6  ;;  %3640 = vmatprep.mubr.msk.f32.mxu1 %vm5405_vm0, %v5406_v6 }
  0x73   : > { %3545 = vmatmul.mubr.msk.f32.gmra.mrb[44].mxu0 %vm299_vm1, %v245_v16  ;;  %3641 = vmatmul.mubr.msk.f32.gmra.mrb[44].mxu1 %vm299_vm1, %v277_v19  ;;  %v3024_v19 = vld [vmem:[%s7073_s2 + $0xa8] sm:$0xff] }
  0x74   : > { %3547 = vmatprep.mubr.msk.f32.mxu0 %vm5405_vm0, %v5406_v6  ;;  %3643 = vmatprep.mubr.msk.f32.mxu1 %vm5405_vm0, %v5406_v6 }
  0x77   : > { %3548 = vmatmul.mubr.msk.f32.gmra.mrb[46].mxu0 %vm299_vm1, %v246_v18  ;;  %3644 = vmatmul.mubr.msk.f32.gmra.mrb[46].mxu1 %vm299_vm1, %v278_v21  ;;  %v3023_v18 = vld [vmem:[%s7073_s2 + $0xa0] sm:$0xff] }
  0x78   : > { %3550 = vmatprep.mubr.msk.f32.mxu0 %vm5405_vm0, %v5406_v6  ;;  %3646 = vmatprep.mubr.msk.f32.mxu1 %vm5405_vm0, %v5406_v6 }
  0x7b   : > { %3551 = vmatmul.mubr.msk.f32.gmra.mrb[48].mxu0 %vm299_vm1, %v247_v20  ;;  %3647 = vmatmul.mubr.msk.f32.gmra.mrb[48].mxu1 %vm299_vm1, %v279_v23  ;;  %v4591_v20 = vpack.c.bf16 %v3024_v19, %v3023_v18  ;;  %v3028_v18 = vld [vmem:[%s7073_s2 + $0xc8] sm:$0xff] }
  0x7c   : > { %3553 = vmatprep.mubr.msk.f32.mxu0 %vm5405_vm0, %v5406_v6  ;;  %3649 = vmatprep.mubr.msk.f32.mxu1 %vm5405_vm0, %v5406_v6 }
  0x7d   : > { %4592 = vmatpush3.bf16.msra.mxu0 %v4591_v20 }
  0x7e   : > { %4593 = vmatprep.subr.bf16.mxu0 %v5404_v3 }
  0x7f   : > { %3554 = vmatmul.mubr.msk.f32.gmra.mrb[50].mxu0 %vm299_vm1, %v248_v22  ;;  %3650 = vmatmul.mubr.msk.f32.gmra.mrb[50].mxu1 %vm299_vm1, %v280_v25 }
  0x80   : > { %3556 = vmatprep.mubr.msk.f32.mxu0 %vm5405_vm0, %v5406_v6  ;;  %3652 = vmatprep.mubr.msk.f32.mxu1 %vm5405_vm0, %v5406_v6 }
  0x83   : > { %3557 = vmatmul.mubr.msk.f32.gmra.mrb[52].mxu0 %vm299_vm1, %v249_v24  ;;  %3653 = vmatmul.mubr.msk.f32.gmra.mrb[52].mxu1 %vm299_vm1, %v281_v27 }
  0x84   : > { %3559 = vmatprep.mubr.msk.f32.mxu0 %vm5405_vm0, %v5406_v6  ;;  %3655 = vmatprep.mubr.msk.f32.mxu1 %vm5405_vm0, %v5406_v6 }
  0x87   : > { %3560 = vmatmul.mubr.msk.f32.gmra.mrb[54].mxu0 %vm299_vm1, %v250_v26  ;;  %3656 = vmatmul.mubr.msk.f32.gmra.mrb[54].mxu1 %vm299_vm1, %v282_v29 }
  0x88   : > { %3562 = vmatprep.mubr.msk.f32.mxu0 %vm5405_vm0, %v5406_v6  ;;  %3658 = vmatprep.mubr.msk.f32.mxu1 %vm5405_vm0, %v5406_v6 }
  0x8b   : > { %3563 = vmatmul.mubr.msk.f32.gmra.mrb[56].mxu0 %vm299_vm1, %v251_v28  ;;  %3659 = vmatmul.mubr.msk.f32.gmra.mrb[56].mxu1 %vm299_vm1, %v283_v31 }
  0x8c   : > { %3565 = vmatprep.mubr.msk.f32.mxu0 %vm5405_vm0, %v5406_v6  ;;  %3661 = vmatprep.mubr.msk.f32.mxu1 %vm5405_vm0, %v5406_v6 }
  0x8f   : > { %3566 = vmatmul.mubr.msk.f32.gmra.mrb[58].mxu0 %vm299_vm1, %v252_v30  ;;  %3662 = vmatmul.mubr.msk.f32.gmra.mrb[58].mxu1 %vm299_vm1, %v284_v33 }
  0x90   : > { %3568 = vmatprep.mubr.msk.f32.mxu0 %vm5405_vm0, %v5406_v6  ;;  %3664 = vmatprep.mubr.msk.f32.mxu1 %vm5405_vm0, %v5406_v6 }
  0x93   : > { %3569 = vmatmul.mubr.msk.f32.gmra.mrb[60].mxu0 %vm299_vm1, %v253_v32  ;;  %3665 = vmatmul.mubr.msk.f32.gmra.mrb[60].mxu1 %vm299_vm1, %v285_v35 }
  0x94   : > { %3571 = vmatprep.mubr.msk.f32.mxu0 %vm5405_vm0, %v5406_v6  ;;  %3699 = vmatprep.mubr.msk.f32.mxu1 %vm5405_vm0, %v5406_v6 }
  0x97   : > { %3572 = vmatmul.mubr.msk.f32.gmra.mrb[62].mxu0 %vm299_vm1, %v254_v34 }
  0x98   : > { %3920 = vmatprep.mubr.msk.f32.mxu0 %vm5405_vm0, %v5406_v6 }
  0xee   : > { %v555_v40 = vpop.f32.mrb[0].mxu0  ;;  %v5844_v44 = vpop.f32.mrb[0].mxu1 }
  0xef   : > { %v556_v41 = vadd.f32 %v5840_v39, %v555_v40  ;;  %v3480_v42 = vpop.f32.mrb[1].mxu0  ;;  %v3576_v47 = vpop.f32.mrb[1].mxu1 }
  0xf0   : > { %v3025_v47 = vld [vmem:[%s7073_s2 + $0xb0] sm:$0xff] }
  0xf1   : > { %4706 = vtanh.f32 %v556_v41 }
  0xf2   : > { %v560_v43 = vpop.f32.mrb[2].mxu0  ;;  %v5847_v49 = vpop.f32.mrb[2].mxu1 }
  0xf3   : > { %v561_v45 = vadd.f32 %v5840_v39, %v560_v43  ;;  %v3483_v46 = vpop.f32.mrb[3].mxu0  ;;  %v3579_v52 = vpop.f32.mrb[3].mxu1 }
  0xf5   : > { %4708 = vtanh.f32 %v561_v45 }
  0xf6   : > { %v565_v48 = vpop.f32.mrb[4].mxu0  ;;  %v5856_v57 = vpop.f32.mrb[4].mxu1 }
  0xf7   : > { %v566_v50 = vadd.f32 %v5840_v39, %v565_v48  ;;  %v3486_v51 = vpop.f32.mrb[5].mxu0  ;;  %v3582_v61 = vpop.f32.mrb[5].mxu1  ;;  %v3026_v48 = vld [vmem:[%s7073_s2 + $0xb8] sm:$0xff] }
  0xf9   : > { %4710 = vtanh.f32 %v566_v50  ;;  %v4594_v50 = vpack.c.bf16 %v3026_v48, %v3025_v47 }
  0xfa   : > { %v570_v56 = vpop.f32.mrb[6].mxu0  ;;  %v5862_v63 = vpop.f32.mrb[6].mxu1 }
  0xfb   : > { %v4707_v58 = vpop.eup %4706  ;;  %v571_v59 = vadd.f32 %v5840_v39, %v570_v56  ;;  %v3489_v60 = vpop.f32.mrb[7].mxu0  ;;  %4595 = vmatpush3.bf16.msra.mxu0 %v4594_v50 }
  0xfc   : > { %3700 = vmatmul.mubr.f32.vlgmr.msra.gmra.mrb[62].mxu1 %v4707_v58  ;;  %v3585_v4 = vpop.f32.mrb[7].mxu1  ;;  %4596 = vmatprep.subr.bf16.mxu0 %v5404_v3 }
  0xfd   : > { %4712 = vtanh.f32 %v571_v59  ;;  %3702 = vmatprep.mubr.msk.f32.mxu1 %vm5405_vm0, %v5406_v6 }
  0xfe   : > { %v575_v62 = vpop.f32.mrb[8].mxu0  ;;  %v5867_v7 = vpop.f32.mrb[8].mxu1 }
  0xff   : > { %v4709_v0 = vpop.eup %4708  ;;  %v576_v1 = vadd.f32 %v5840_v39, %v575_v62  ;;  %v3492_v2 = vpop.f32.mrb[9].mxu0 }
 0x100   : > { %3703 = vmatmul.mubr.f32.gmra.mrb[64].mxu1 %v4709_v0  ;;  %v3588_v11 = vpop.f32.mrb[9].mxu1 }
 0x101   : > { %4714 = vtanh.f32 %v576_v1  ;;  %3705 = vmatprep.mubr.msk.f32.mxu1 %vm5405_vm0, %v5406_v6 }
 0x102   : > { %v580_v5 = vpop.f32.mrb[10].mxu0  ;;  %v5872_v13 = vpop.f32.mrb[10].mxu1 }
 0x103   : > { %v4711_v8 = vpop.eup %4710  ;;  %v581_v9 = vadd.f32 %v5840_v39, %v580_v5  ;;  %v3495_v10 = vpop.f32.mrb[11].mxu0 }
 0x104   : > { %3706 = vmatmul.mubr.f32.gmra.mrb[66].mxu1 %v4711_v8  ;;  %v3591_v17 = vpop.f32.mrb[11].mxu1 }
 0x105   : > { %4716 = vtanh.f32 %v581_v9  ;;  %3708 = vmatprep.mubr.msk.f32.mxu1 %vm5405_vm0, %v5406_v6  ;;  %v3027_v17 = vld [vmem:[%s7073_s2 + $0xc0] sm:$0xff] }
 0x106   : > { %v585_v12 = vpop.f32.mrb[12].mxu0  ;;  %v5883_v22 = vpop.f32.mrb[12].mxu1  ;;  %v4597_v19 = vpack.c.bf16 %v3028_v18, %v3027_v17 }
 0x107   : > { %v4713_v14 = vpop.eup %4712  ;;  %v586_v15 = vadd.f32 %v5840_v39, %v585_v12  ;;  %v3498_v16 = vpop.f32.mrb[13].mxu0 }
 0x108   : > { %3709 = vmatmul.mubr.f32.gmra.mrb[68].mxu1 %v4713_v14  ;;  %v3594_v26 = vpop.f32.mrb[13].mxu1  ;;  %4598 = vmatpush3.bf16.msra.mxu0 %v4597_v19 }
 0x109   : > { %4718 = vtanh.f32 %v586_v15  ;;  %3711 = vmatprep.mubr.msk.f32.mxu1 %vm5405_vm0, %v5406_v6  ;;  %4599 = vmatprep.subr.bf16.mxu0 %v5404_v3 }
 0x10a   : > { %v590_v21 = vpop.f32.mrb[14].mxu0  ;;  %v5889_v28 = vpop.f32.mrb[14].mxu1 }
 0x10b   : > { %v4715_v23 = vpop.eup %4714  ;;  %v591_v24 = vadd.f32 %v5840_v39, %v590_v21  ;;  %v3501_v25 = vpop.f32.mrb[15].mxu0 }
 0x10c   : > { %3712 = vmatmul.mubr.f32.gmra.mrb[70].mxu1 %v4715_v23  ;;  %v3597_v32 = vpop.f32.mrb[15].mxu1 }
 0x10d   : > { %4720 = vtanh.f32 %v591_v24  ;;  %3714 = vmatprep.mubr.msk.f32.mxu1 %vm5405_vm0, %v5406_v6 }
 0x10e   : > { %v595_v27 = vpop.f32.mrb[16].mxu0  ;;  %v5894_v34 = vpop.f32.mrb[16].mxu1 }
 0x10f   : > { %v4717_v29 = vpop.eup %4716  ;;  %v596_v30 = vadd.f32 %v5840_v39, %v595_v27  ;;  %v3504_v31 = vpop.f32.mrb[17].mxu0 }
 0x110   : > { %3715 = vmatmul.mubr.f32.gmra.mrb[72].mxu1 %v4717_v29  ;;  %v3600_v38 = vpop.f32.mrb[17].mxu1 }
 0x111   : > { %4722 = vtanh.f32 %v596_v30  ;;  %3717 = vmatprep.mubr.msk.f32.mxu1 %vm5405_vm0, %v5406_v6 }
 0x112   : > { %v600_v33 = vpop.f32.mrb[18].mxu0  ;;  %v5899_v41 = vpop.f32.mrb[18].mxu1 }
 0x113   : > { %v4719_v35 = vpop.eup %4718  ;;  %v601_v36 = vadd.f32 %v5840_v39, %v600_v33  ;;  %v3507_v37 = vpop.f32.mrb[19].mxu0 }
 0x114   : > { %3718 = vmatmul.mubr.f32.gmra.mrb[74].mxu1 %v4719_v35  ;;  %v3603_v46 = vpop.f32.mrb[19].mxu1 }
 0x115   : > { %4724 = vtanh.f32 %v601_v36  ;;  %3720 = vmatprep.mubr.msk.f32.mxu1 %vm5405_vm0, %v5406_v6 }
 0x116   : > { %v605_v40 = vpop.f32.mrb[20].mxu0  ;;  %v5910_v52 = vpop.f32.mrb[20].mxu1 }
 0x117   : > { %v4721_v42 = vpop.eup %4720  ;;  %v606_v43 = vadd.f32 %v5840_v39, %v605_v40  ;;  %v3510_v45 = vpop.f32.mrb[21].mxu0 }
 0x118   : > { %3721 = vmatmul.mubr.f32.gmra.mrb[76].mxu1 %v4721_v42  ;;  %v3606_v56 = vpop.f32.mrb[21].mxu1 }
 0x119   : > { %4726 = vtanh.f32 %v606_v43  ;;  %3723 = vmatprep.mubr.msk.f32.mxu1 %vm5405_vm0, %v5406_v6 }
 0x11a   : > { %v610_v51 = vpop.f32.mrb[22].mxu0  ;;  %v5916_v59 = vpop.f32.mrb[22].mxu1 }
 0x11b   : > { %v4723_v53 = vpop.eup %4722  ;;  %v611_v54 = vadd.f32 %v5840_v39, %v610_v51  ;;  %v3513_v55 = vpop.f32.mrb[23].mxu0  ;;  %v3029_v51 = vld [vmem:[%s7073_s2 + $0xd0] sm:$0xff] }
 0x11c   : > { %3724 = vmatmul.mubr.f32.gmra.mrb[78].mxu1 %v4723_v53  ;;  %v3609_v0 = vpop.f32.mrb[23].mxu1  ;;  %v3030_v53 = vld [vmem:[%s7073_s2 + $0xd8] sm:$0xff] }
 0x11d   : > { %4728 = vtanh.f32 %v611_v54  ;;  %3726 = vmatprep.mubr.msk.f32.mxu1 %vm5405_vm0, %v5406_v6  ;;  %v4600_v54 = vpack.c.bf16 %v3030_v53, %v3029_v51 }
 0x11e   : > { %v615_v58 = vpop.f32.mrb[24].mxu0  ;;  %v5921_v2 = vpop.f32.mrb[24].mxu1 }
 0x11f   : > { %v4725_v60 = vpop.eup %4724  ;;  %v616_v61 = vadd.f32 %v5840_v39, %v615_v58  ;;  %v3516_v62 = vpop.f32.mrb[25].mxu0  ;;  %4601 = vmatpush3.bf16.msra.mxu0 %v4600_v54 }
 0x120   : > { %3727 = vmatmul.mubr.f32.gmra.mrb[80].mxu1 %v4725_v60  ;;  %v3612_v9 = vpop.f32.mrb[25].mxu1  ;;  %4602 = vmatprep.subr.bf16.mxu0 %v5404_v3 }
 0x121   : > { %4730 = vtanh.f32 %v616_v61  ;;  %3729 = vmatprep.mubr.msk.f32.mxu1 %vm5405_vm0, %v5406_v6 }
 0x122   : > { %v620_v1 = vpop.f32.mrb[26].mxu0  ;;  %v5926_v11 = vpop.f32.mrb[26].mxu1 }
 0x123   : > { %v4727_v4 = vpop.eup %4726  ;;  %v621_v5 = vadd.f32 %v5840_v39, %v620_v1  ;;  %v3519_v8 = vpop.f32.mrb[27].mxu0 }
 0x124   : > { %3730 = vmatmul.mubr.f32.gmra.mrb[82].mxu1 %v4727_v4  ;;  %v3615_v16 = vpop.f32.mrb[27].mxu1 }
 0x125   : > { %4732 = vtanh.f32 %v621_v5  ;;  %3732 = vmatprep.mubr.msk.f32.mxu1 %vm5405_vm0, %v5406_v6 }
 0x126   : > { %v625_v10 = vpop.f32.mrb[28].mxu0  ;;  %v5937_v21 = vpop.f32.mrb[28].mxu1 }
 0x127   : > { %v4729_v12 = vpop.eup %4728  ;;  %v626_v14 = vadd.f32 %v5840_v39, %v625_v10  ;;  %v3522_v15 = vpop.f32.mrb[29].mxu0 }
 0x128   : > { %3733 = vmatmul.mubr.f32.gmra.mrb[84].mxu1 %v4729_v12  ;;  %v3618_v26 = vpop.f32.mrb[29].mxu1 }
 0x129   : > { %4734 = vtanh.f32 %v626_v14  ;;  %3735 = vmatprep.mubr.msk.f32.mxu1 %vm5405_vm0, %v5406_v6  ;;  %v3031_v26 = vld [vmem:[%s7073_s2 + $0xe0] sm:$0xff] }
 0x12a   : > { %v630_v20 = vpop.f32.mrb[30].mxu0  ;;  %v5943_v29 = vpop.f32.mrb[30].mxu1 }
 0x12b   : > { %v4731_v23 = vpop.eup %4730  ;;  %v631_v24 = vadd.f32 %v5840_v39, %v630_v20  ;;  %v3525_v25 = vpop.f32.mrb[31].mxu0 }
 0x12c   : > { %3736 = vmatmul.mubr.f32.gmra.mrb[86].mxu1 %v4731_v23  ;;  %v3621_v33 = vpop.f32.mrb[31].mxu1 }
 0x12d   : > { %4736 = vtanh.f32 %v631_v24  ;;  %3738 = vmatprep.mubr.msk.f32.mxu1 %vm5405_vm0, %v5406_v6 }
 0x12e   : > { %v635_v27 = vpop.f32.mrb[32].mxu0  ;;  %v5948_v36 = vpop.f32.mrb[32].mxu1 }
 0x12f   : > { %v4733_v30 = vpop.eup %4732  ;;  %v636_v31 = vadd.f32 %v5840_v39, %v635_v27  ;;  %v3528_v32 = vpop.f32.mrb[33].mxu0  ;;  %v3032_v27 = vld [vmem:[%s7073_s2 + $0xe8] sm:$0xff] }
 0x130   : > { %3739 = vmatmul.mubr.f32.gmra.mrb[88].mxu1 %v4733_v30  ;;  %v3624_v42 = vpop.f32.mrb[33].mxu1  ;;  %v4603_v30 = vpack.c.bf16 %v3032_v27, %v3031_v26 }
 0x131   : > { %4738 = vtanh.f32 %v636_v31  ;;  %3741 = vmatprep.mubr.msk.f32.mxu1 %vm5405_vm0, %v5406_v6  ;;  %v3038_v42 = vld [vmem:[%s7073_s2 + $0x108] sm:$0xff] }
 0x132   : > { %v640_v35 = vpop.f32.mrb[34].mxu0  ;;  %v5953_v45 = vpop.f32.mrb[34].mxu1  ;;  %4604 = vmatpush3.bf16.msra.mxu0 %v4603_v30 }
 0x133   : > { %v4735_v37 = vpop.eup %4734  ;;  %v641_v38 = vadd.f32 %v5840_v39, %v640_v35  ;;  %v3531_v40 = vpop.f32.mrb[35].mxu0  ;;  %4605 = vmatprep.subr.bf16.mxu0 %v5404_v3 }
 0x134   : > { %3742 = vmatmul.mubr.f32.gmra.mrb[90].mxu1 %v4735_v37  ;;  %v3627_v50 = vpop.f32.mrb[35].mxu1  ;;  %v3037_v40 = vld [vmem:[%s7073_s2 + $0x100] sm:$0xff] }
 0x135   : > { %4740 = vtanh.f32 %v641_v38  ;;  %3744 = vmatprep.mubr.msk.f32.mxu1 %vm5405_vm0, %v5406_v6 }
 0x136   : > { %v645_v43 = vpop.f32.mrb[36].mxu0  ;;  %v5964_v56 = vpop.f32.mrb[36].mxu1 }
 0x137   : > { %v4737_v46 = vpop.eup %4736  ;;  %v646_v47 = vadd.f32 %v5840_v39, %v645_v43  ;;  %v3534_v48 = vpop.f32.mrb[37].mxu0  ;;  %v4609_v43 = vpack.c.bf16 %v3038_v42, %v3037_v40 }
 0x138   : > { %3745 = vmatmul.mubr.f32.gmra.mrb[92].mxu1 %v4737_v46  ;;  %v3630_v62 = vpop.f32.mrb[37].mxu1 }
 0x139   : > { %4742 = vtanh.f32 %v646_v47  ;;  %3747 = vmatprep.mubr.msk.f32.mxu1 %vm5405_vm0, %v5406_v6  ;;  %4610 = vmatpush3.bf16.msra.mxu1 %v4609_v43 }
 0x13a   : > { %v650_v55 = vpop.f32.mrb[38].mxu0  ;;  %v5970_v1 = vpop.f32.mrb[38].mxu1  ;;  %4611 = vmatprep.subr.bf16.mxu1 %v5404_v3 }
 0x13b   : > { %v4739_v58 = vpop.eup %4738  ;;  %v651_v60 = vadd.f32 %v5840_v39, %v650_v55  ;;  %v3537_v61 = vpop.f32.mrb[39].mxu0 }
 0x13c   : > { %3748 = vmatmul.mubr.f32.gmra.mrb[94].mxu1 %v4739_v58  ;;  %v3633_v9 = vpop.f32.mrb[39].mxu1 }
 0x13d   : > { %4744 = vtanh.f32 %v651_v60  ;;  %3750 = vmatprep.mubr.msk.f32.mxu1 %vm5405_vm0, %v5406_v6 }
 0x13e   : > { %v655_v0 = vpop.f32.mrb[40].mxu0  ;;  %v5975_v12 = vpop.f32.mrb[40].mxu1 }
 0x13f   : > { %v4741_v4 = vpop.eup %4740  ;;  %v656_v5 = vadd.f32 %v5840_v39, %v655_v0  ;;  %v3540_v8 = vpop.f32.mrb[41].mxu0 }
 0x140   : > { %3751 = vmatmul.mubr.f32.gmra.mrb[96].mxu1 %v4741_v4  ;;  %v3636_v17 = vpop.f32.mrb[41].mxu1 }
 0x141   : > { %4746 = vtanh.f32 %v656_v5  ;;  %3753 = vmatprep.mubr.msk.f32.mxu1 %vm5405_vm0, %v5406_v6 }
 0x142   : > { %v660_v10 = vpop.f32.mrb[42].mxu0  ;;  %v5980_v19 = vpop.f32.mrb[42].mxu1 }
 0x143   : > { %v4743_v14 = vpop.eup %4742  ;;  %v661_v15 = vadd.f32 %v5840_v39, %v660_v10  ;;  %v3543_v16 = vpop.f32.mrb[43].mxu0 }
 0x144   : > { %3754 = vmatmul.mubr.f32.gmra.mrb[98].mxu1 %v4743_v14  ;;  %v3639_v25 = vpop.f32.mrb[43].mxu1 }
 0x145   : > { %4748 = vtanh.f32 %v661_v15  ;;  %3756 = vmatprep.mubr.msk.f32.mxu1 %vm5405_vm0, %v5406_v6 }
 0x146   : > { %v665_v18 = vpop.f32.mrb[44].mxu0  ;;  %v5991_v32 = vpop.f32.mrb[44].mxu1 }
 0x147   : > { %v4745_v20 = vpop.eup %4744  ;;  %v666_v23 = vadd.f32 %v5840_v39, %v665_v18  ;;  %v3546_v24 = vpop.f32.mrb[45].mxu0 }
 0x148   : > { %3757 = vmatmul.mubr.f32.gmra.mrb[100].mxu1 %v4745_v20  ;;  %v3642_v38 = vpop.f32.mrb[45].mxu1 }
 0x149   : > { %4750 = vtanh.f32 %v666_v23  ;;  %3759 = vmatprep.mubr.msk.f32.mxu1 %vm5405_vm0, %v5406_v6 }
 0x14a   : > { %v670_v31 = vpop.f32.mrb[46].mxu0  ;;  %v6003_v47 = vpop.f32.mrb[46].mxu1 }
 0x14b   : > { %v4747_v33 = vpop.eup %4746  ;;  %v671_v35 = vadd.f32 %v5840_v39, %v670_v31  ;;  %v3549_v37 = vpop.f32.mrb[47].mxu0 }
 0x14c   : > { %3760 = vmatmul.mubr.f32.gmra.mrb[102].mxu1 %v4747_v33  ;;  %v3645_v53 = vpop.f32.mrb[47].mxu1  ;;  %v3034_v37 = vld [vmem:[%s7073_s2 + $0xf8] sm:$0xff] }
 0x14d   : > { %4752 = vtanh.f32 %v671_v35  ;;  %3762 = vmatprep.mubr.msk.f32.mxu1 %vm5405_vm0, %v5406_v6  ;;  %v3033_v35 = vld [vmem:[%s7073_s2 + $0xf0] sm:$0xff] }
 0x14e   : > { %v675_v46 = vpop.f32.mrb[48].mxu0  ;;  %v6009_v55 = vpop.f32.mrb[48].mxu1 }
 0x14f   : > { %v4749_v48 = vpop.eup %4748  ;;  %v676_v50 = vadd.f32 %v5840_v39, %v675_v46  ;;  %v3552_v51 = vpop.f32.mrb[49].mxu0  ;;  %v4606_v46 = vpack.c.bf16 %v3034_v37, %v3033_v35  ;;  %v756_v35 = vadd.f32 %v5840_v39, %v5894_v34  ;;  %v761_v37 = vadd.f32 %v5840_v39, %v5899_v41  ;;  %v3041_v41 = vld [vmem:[%s7073_s2 + $0x120] sm:$0xff] }
 0x150   : > { %3763 = vmatmul.mubr.f32.gmra.mrb[104].mxu1 %v4749_v48  ;;  %v3648_v62 = vpop.f32.mrb[49].mxu1 }
 0x151   : > { %4754 = vtanh.f32 %v676_v50  ;;  %3765 = vmatprep.mubr.msk.f32.mxu1 %vm5405_vm0, %v5406_v6  ;;  %4607 = vmatpush3.bf16.msra.mxu0 %v4606_v46  ;;  %v776_v46 = vadd.f32 %v5840_v39, %v5921_v2  ;;  %v786_v2 = vadd.f32 %v5840_v39, %v5937_v21 }
 0x152   : > { %v680_v54 = vpop.f32.mrb[50].mxu0  ;;  %v6014_v4 = vpop.f32.mrb[50].mxu1  ;;  %4632 = vmatprep.subr.bf16.mxu0 %v5404_v3 }
 0x153   : > { %v4751_v58 = vpop.eup %4750  ;;  %v681_v60 = vadd.f32 %v5840_v39, %v680_v54  ;;  %v3555_v61 = vpop.f32.mrb[51].mxu0 }
 0x154   : > { %3766 = vmatmul.mubr.f32.gmra.mrb[106].mxu1 %v4751_v58  ;;  %v3651_v10 = vpop.f32.mrb[51].mxu1 }
 0x155   : > { %4756 = vtanh.f32 %v681_v60  ;;  %3768 = vmatprep.mubr.msk.f32.mxu1 %vm5405_vm0, %v5406_v6 }
 0x156   : > { %v685_v0 = vpop.f32.mrb[52].mxu0  ;;  %v6019_v15 = vpop.f32.mrb[52].mxu1 }
 0x157   : > { %v4753_v5 = vpop.eup %4752  ;;  %v686_v8 = vadd.f32 %v5840_v39, %v685_v0  ;;  %v3558_v9 = vpop.f32.mrb[53].mxu0 }
 0x158   : > { %3769 = vmatmul.mubr.f32.gmra.mrb[108].mxu1 %v4753_v5  ;;  %v3654_v20 = vpop.f32.mrb[53].mxu1  ;;  %v716_v9 = vadd.f32 %v5840_v39, %v5844_v44 }
 0x159   : > { %4758 = vtanh.f32 %v686_v8  ;;  %3771 = vmatprep.mubr.msk.f32.mxu1 %vm5405_vm0, %v5406_v6 }
 0x15a   : > { %v690_v14 = vpop.f32.mrb[54].mxu0  ;;  %v6024_v24 = vpop.f32.mrb[54].mxu1 }
 0x15b   : > { %v4755_v16 = vpop.eup %4754  ;;  %v691_v17 = vadd.f32 %v5840_v39, %v690_v14  ;;  %v3561_v18 = vpop.f32.mrb[55].mxu0  ;;  %v721_v14 = vadd.f32 %v5840_v39, %v5847_v49  ;;  %v3039_v49 = vld [vmem:[%s7073_s2 + $0x110] sm:$0xff] }
 0x15c   : > { %3772 = vmatmul.mubr.f32.gmra.mrb[110].mxu1 %v4755_v16  ;;  %v3657_v30 = vpop.f32.mrb[55].mxu1  ;;  %v731_v18 = vadd.f32 %v5840_v39, %v5862_v63 }
 0x15d   : > { %4760 = vtanh.f32 %v691_v17  ;;  %3774 = vmatprep.mubr.msk.f32.mxu1 %vm5405_vm0, %v5406_v6  ;;  %v726_v17 = vadd.f32 %v5840_v39, %v5856_v57  ;;  %v3040_v57 = vld [vmem:[%s7073_s2 + $0x118] sm:$0xff] }
 0x15e   : > { %v695_v23 = vpop.f32.mrb[56].mxu0  ;;  %v6029_v33 = vpop.f32.mrb[56].mxu1  ;;  %v4612_v20 = vpack.c.bf16 %v3040_v57, %v3039_v49 }
 0x15f   : > { %v4757_v25 = vpop.eup %4756  ;;  %v696_v26 = vadd.f32 %v5840_v39, %v695_v23  ;;  %v3564_v27 = vpop.f32.mrb[57].mxu0 }
 0x160   : > { %3775 = vmatmul.mubr.f32.gmra.mrb[112].mxu1 %v4757_v25  ;;  %v3660_v43 = vpop.f32.mrb[57].mxu1  ;;  %v736_v25 = vadd.f32 %v5840_v39, %v5867_v7  ;;  %v746_v7 = vadd.f32 %v5840_v39, %v5883_v22 }
 0x161   : > { %4762 = vtanh.f32 %v696_v26  ;;  %3777 = vmatprep.mubr.msk.f32.mxu1 %vm5405_vm0, %v5406_v6  ;;  %4613 = vmatpush3.bf16.msra.mxu1 %v4612_v20  ;;  %v741_v26 = vadd.f32 %v5840_v39, %v5872_v13  ;;  %v841_v20 = vadd.f32 %v5840_v39, %v6014_v4 }
 0x162   : > { %v700_v31 = vpop.f32.mrb[58].mxu0  ;;  %v6040_v50 = vpop.f32.mrb[58].mxu1  ;;  %4614 = vmatprep.subr.bf16.mxu1 %v5404_v3 }
 0x163   : > { %v4759_v38 = vpop.eup %4758  ;;  %v701_v40 = vadd.f32 %v5840_v39, %v700_v31  ;;  %v3567_v42 = vpop.f32.mrb[59].mxu0  ;;  %v751_v31 = vadd.f32 %v5840_v39, %v5889_v28 }
 0x164   : > { %3778 = vmatmul.mubr.f32.gmra.mrb[114].mxu1 %v4759_v38  ;;  %v3663_v58 = vpop.f32.mrb[59].mxu1  ;;  %v766_v38 = vadd.f32 %v5840_v39, %v5910_v52  ;;  %v3042_v52 = vld [vmem:[%s7073_s2 + $0x128] sm:$0xff] }
 0x165   : > { %4764 = vtanh.f32 %v701_v40  ;;  %3780 = vmatprep.mubr.msk.f32.mxu1 %vm5405_vm0, %v5406_v6  ;;  %v771_v40 = vadd.f32 %v5840_v39, %v5916_v59  ;;  %v4615_v42 = vpack.c.bf16 %v3042_v52, %v3041_v41  ;;  %v796_v58 = vadd.f32 %v5840_v39, %v5948_v36 }
 0x166   : > { %v705_v48 = vpop.f32.mrb[60].mxu0  ;;  %v6046_v61 = vpop.f32.mrb[60].mxu1 }
 0x167   : > { %v4761_v51 = vpop.eup %4760  ;;  %v706_v53 = vadd.f32 %v5840_v39, %v705_v48  ;;  %v3570_v54 = vpop.f32.mrb[61].mxu0  ;;  %4616 = vmatpush3.bf16.msra.mxu1 %v4615_v42  ;;  %v781_v48 = vadd.f32 %v5840_v39, %v5926_v11  ;;  %v861_v42 = vadd.f32 %v5840_v39, %v6040_v50 }
 0x168   : > { %3781 = vmatmul.mubr.f32.gmra.mrb[116].mxu1 %v4761_v51  ;;  %v3666_v8 = vpop.f32.mrb[61].mxu1  ;;  %4617 = vmatprep.subr.bf16.mxu1 %v5404_v3  ;;  %v791_v54 = vadd.f32 %v5840_v39, %v5943_v29 }
 0x169   : > { %4766 = vtanh.f32 %v706_v53  ;;  %3783 = vmatprep.mubr.msk.f32.mxu1 %vm5405_vm0, %v5406_v6 }
 0x16a   : > { %v710_v60 = vpop.f32.mrb[62].mxu0 }
 0x16b   : > { %v4763_v62 = vpop.eup %4762  ;;  %v711_v0 = vadd.f32 %v5840_v39, %v710_v60  ;;  %v3573_v5 = vpop.f32.mrb[63].mxu0  ;;  %v801_v60 = vadd.f32 %v5840_v39, %v5953_v45  ;;  %v3043_v45 = vld [vmem:[%s7073_s2 + $0x130] sm:$0xff] }
 0x16c   : > { %3784 = vmatmul.mubr.f32.gmra.mrb[118].mxu1 %v4763_v62  ;;  %v806_v62 = vadd.f32 %v5840_v39, %v5964_v56  ;;  %v3044_v56 = vld [vmem:[%s7073_s2 + $0x138] sm:$0xff] }
 0x16d   : > { %4768 = vtanh.f32 %v711_v0  ;;  %3786 = vmatprep.mubr.msk.f32.mxu1 %vm5405_vm0, %v5406_v6  ;;  %v811_v0 = vadd.f32 %v5840_v39, %v5970_v1  ;;  %v4618_v5 = vpack.c.bf16 %v3044_v56, %v3043_v45 }
 0x16e   : > { %4770 = vtanh.f32 %v716_v9  ;;  %v816_v9 = vadd.f32 %v5840_v39, %v5975_v12  ;;  %v826_v12 = vadd.f32 %v5840_v39, %v5991_v32  ;;  %v6171_v32 = vld [vmem:[%s7074_s3 + $0x1] ss:$0 sm:$0xff] }
 0x16f   : > { %v4765_v10 = vpop.eup %4764  ;;  %4772 = vtanh.f32 %v721_v14  ;;  %4619 = vmatpush3.bf16.msra.mxu1 %v4618_v5 }
 0x170   : > { %3787 = vmatmul.mubr.f32.gmra.mrb[120].mxu1 %v4765_v10  ;;  %4774 = vtanh.f32 %v726_v17  ;;  %4620 = vmatprep.subr.bf16.mxu1 %v5404_v3  ;;  %v821_v10 = vadd.f32 %v5840_v39, %v5980_v19  ;;  %v831_v17 = vadd.f32 %v5840_v39, %v6003_v47 }
 0x171   : > { %3789 = vmatprep.mubr.msk.f32.mxu1 %vm5405_vm0, %v5406_v6  ;;  %4776 = vtanh.f32 %v731_v18 }
 0x172   : > { %4778 = vtanh.f32 %v736_v25 }
 0x173   : > { %v4767_v16 = vpop.eup %4766  ;;  %4780 = vtanh.f32 %v741_v26  ;;  %v846_v26 = vadd.f32 %v5840_v39, %v6019_v15  ;;  %v3045_v15 = vld [vmem:[%s7073_s2 + $0x140] sm:$0xff] }
 0x174   : > { %3790 = vmatmul.mubr.f32.gmra.mrb[122].mxu1 %v4767_v16  ;;  %4782 = vtanh.f32 %v746_v7  ;;  %v851_v7 = vadd.f32 %v5840_v39, %v6024_v24 }
 0x175   : > { %3792 = vmatprep.mubr.msk.f32.mxu1 %vm5405_vm0, %v5406_v6  ;;  %4784 = vtanh.f32 %v751_v31 }
 0x176   : > { %4786 = vtanh.f32 %v756_v35 }
 0x177   : > { %v4769_v44 = vpop.eup %4768  ;;  %4788 = vtanh.f32 %v761_v37 }
 0x178   : > { %3793 = vmatmul.mubr.f32.gmra.mrb[124].mxu1 %v4769_v44  ;;  %v4771_v23 = vpop.eup %4770  ;;  %4790 = vtanh.f32 %v766_v38  ;;  %v836_v44 = vadd.f32 %v5840_v39, %v6009_v55 }
 0x179   : > { %3795 = vmatprep.mubr.msk.f32.mxu1 %vm5405_vm0, %v5406_v6  ;;  %v4773_v63 = vpop.eup %4772  ;;  %4792 = vtanh.f32 %v771_v40 }
 0x17a   : > { %v4775_v27 = vpop.eup %4774  ;;  %4794 = vtanh.f32 %v776_v46 }
 0x17b   : > { %v4777_v30 = vpop.eup %4776  ;;  %4796 = vtanh.f32 %v781_v48 }
 0x17c   : > { %3796 = vmatmul.mubr.f32.gmra.mrb[126].mxu1 %v4771_v23  ;;  %v4779_v13 = vpop.eup %4778  ;;  %4798 = vtanh.f32 %v786_v2 }
 0x17d   : > { %3798 = vmatprep.mubr.msk.f32.mxu1 %vm5405_vm0, %v5406_v6  ;;  %v4781_v22 = vpop.eup %4780  ;;  %4800 = vtanh.f32 %v791_v54 }
 0x17e   : > { %v4783_v28 = vpop.eup %4782  ;;  %4802 = vtanh.f32 %v796_v58 }
 0x17f   : > { %v4785_v34 = vpop.eup %4784  ;;  %4804 = vtanh.f32 %v801_v60 }
 0x180   : > { %3799 = vmatmul.mubr.f32.gmra.mrb[128].mxu1 %v4773_v63  ;;  %v4787_v43 = vpop.eup %4786  ;;  %4806 = vtanh.f32 %v806_v62 }
 0x181   : > { %3801 = vmatprep.mubr.msk.f32.mxu1 %vm5405_vm0, %v5406_v6  ;;  %v4789_v59 = vpop.eup %4788  ;;  %4808 = vtanh.f32 %v811_v0 }
 0x182   : > { %v4791_v51 = vpop.eup %4790  ;;  %4810 = vtanh.f32 %v816_v9 }
 0x183   : > { %v4793_v53 = vpop.eup %4792  ;;  %4812 = vtanh.f32 %v821_v10 }
 0x184   : > { %3802 = vmatmul.mubr.f32.gmra.mrb[130].mxu1 %v4775_v27  ;;  %v4795_v11 = vpop.eup %4794  ;;  %4814 = vtanh.f32 %v826_v12 }
 0x185   : > { %3804 = vmatprep.mubr.msk.f32.mxu1 %vm5405_vm0, %v5406_v6  ;;  %v4797_v21 = vpop.eup %4796  ;;  %4816 = vtanh.f32 %v831_v17 }
 0x186   : > { %v4799_v29 = vpop.eup %4798  ;;  %4818 = vtanh.f32 %v836_v44 }
 0x187   : > { %v4801_v36 = vpop.eup %4800 }
 0x188   : > { %3805 = vmatmul.mubr.f32.gmra.mrb[132].mxu1 %v4777_v30  ;;  %v4803_v8 = vpop.eup %4802 }
 0x189   : > { %3807 = vmatprep.mubr.msk.f32.mxu1 %vm5405_vm0, %v5406_v6  ;;  %v4805_v1 = vpop.eup %4804 }
 0x18a   : > { %v4807_v14 = vpop.eup %4806 }
 0x18b   : > { %v4809_v16 = vpop.eup %4808 }
 0x18c   : > { %3808 = vmatmul.mubr.f32.gmra.mrb[134].mxu1 %v4779_v13  ;;  %v4811_v19 = vpop.eup %4810  ;;  %v3046_v13 = vld [vmem:[%s7073_s2 + $0x148] sm:$0xff] }
 0x18d   : > { %3810 = vmatprep.mubr.msk.f32.mxu1 %vm5405_vm0, %v5406_v6  ;;  %v4813_v18 = vpop.eup %4812  ;;  %v4621_v35 = vpack.c.bf16 %v3046_v13, %v3045_v15 }
 0x18e   : > { %v4815_v55 = vpop.eup %4814 }
 0x18f   : > { %v4817_v27 = vpop.eup %4816  ;;  %4622 = vmatpush3.bf16.msra.mxu1 %v4621_v35 }
 0x190   : > { %3811 = vmatmul.mubr.f32.gmra.mrb[136].mxu1 %v4781_v22  ;;  %v4819_v22 = vpop.eup %4818  ;;  %4623 = vmatprep.subr.bf16.mxu1 %v5404_v3 }
 0x191   : > { %3813 = vmatprep.mubr.msk.f32.mxu1 %vm5405_vm0, %v5406_v6 }
 0x194   : > { %3814 = vmatmul.mubr.f32.gmra.mrb[138].mxu1 %v4783_v28  ;;  %v856_v28 = vadd.f32 %v5840_v39, %v6029_v33 }
 0x195   : > { %3816 = vmatprep.mubr.msk.f32.mxu1 %vm5405_vm0, %v5406_v6 }
 0x198   : > { %3817 = vmatmul.mubr.f32.gmra.mrb[140].mxu1 %v4785_v34 }
 0x199   : > { %3819 = vmatprep.mubr.msk.f32.mxu1 %vm5405_vm0, %v5406_v6 }
 0x19c   : > { %3820 = vmatmul.mubr.f32.gmra.mrb[142].mxu1 %v4787_v43 }
 0x19d   : > { %3822 = vmatprep.mubr.msk.f32.mxu1 %vm5405_vm0, %v5406_v6 }
 0x1a0   : > { %3823 = vmatmul.mubr.f32.gmra.mrb[144].mxu1 %v4789_v59 }
 0x1a1   : > { %3825 = vmatprep.mubr.msk.f32.mxu1 %vm5405_vm0, %v5406_v6 }
 0x1a4   : > { %3826 = vmatmul.mubr.f32.gmra.mrb[146].mxu1 %v4791_v51  ;;  %v5336_v51 = vld [vmem:[%s7074_s3] ss:$0 sm:$0xff] }
 0x1a5   : > { %3828 = vmatprep.mubr.msk.f32.mxu1 %vm5405_vm0, %v5406_v6  ;;  %v866_v2 = vadd.f32 %v5336_v51, %v6046_v61 }
 0x1a8   : > { %3829 = vmatmul.mubr.f32.gmra.mrb[148].mxu1 %v4793_v53 }
 0x1a9   : > { %3831 = vmatprep.mubr.msk.f32.mxu1 %vm5405_vm0, %v5406_v6 }
 0x1ac   : > { %3832 = vmatmul.mubr.f32.gmra.mrb[150].mxu1 %v4795_v11 }
 0x1ad   : > { %3834 = vmatprep.mubr.msk.f32.mxu1 %vm5405_vm0, %v5406_v6 }
 0x1b0   : > { %3835 = vmatmul.mubr.f32.gmra.mrb[152].mxu1 %v4797_v21 }
 0x1b1   : > { %3837 = vmatprep.mubr.msk.f32.mxu1 %vm5405_vm0, %v5406_v6 }
 0x1b4   : > { %3838 = vmatmul.mubr.f32.gmra.mrb[154].mxu1 %v4799_v29 }
 0x1b5   : > { %3840 = vmatprep.mubr.msk.f32.mxu1 %vm5405_vm0, %v5406_v6 }
 0x1b8   : > { %3841 = vmatmul.mubr.f32.gmra.mrb[156].mxu1 %v4801_v36 }
 0x1b9   : > { %3843 = vmatprep.mubr.msk.f32.mxu1 %vm5405_vm0, %v5406_v6 }
 0x1bc   : > { %3844 = vmatmul.mubr.f32.gmra.mrb[158].mxu1 %v4803_v8 }
 0x1bd   : > { %3846 = vmatprep.mubr.msk.f32.mxu1 %vm5405_vm0, %v5406_v6 }
 0x1c0   : > { %3847 = vmatmul.mubr.f32.gmra.mrb[160].mxu1 %v4805_v1 }
 0x1c1   : > { %3849 = vmatprep.mubr.msk.f32.mxu1 %vm5405_vm0, %v5406_v6 }
 0x1c4   : > { %3850 = vmatmul.mubr.f32.gmra.mrb[162].mxu1 %v4807_v14 }
 0x1c5   : > { %3852 = vmatprep.mubr.msk.f32.mxu1 %vm5405_vm0, %v5406_v6 }
 0x1c8   : > { %3853 = vmatmul.mubr.f32.gmra.mrb[164].mxu1 %v4809_v16 }
 0x1c9   : > { %3855 = vmatprep.mubr.msk.f32.mxu1 %vm5405_vm0, %v5406_v6 }
 0x1cc   : > { %3856 = vmatmul.mubr.f32.gmra.mrb[166].mxu1 %v4811_v19 }
 0x1cd   : > { %3858 = vmatprep.mubr.msk.f32.mxu1 %vm5405_vm0, %v5406_v6 }
 0x1cf   : > { %v1022_v49 = vpop.f32.mrb[62].mxu1 }
 0x1d0   : > { %v1023_v47 = vadd.f32 %v6171_v32, %v1022_v49  ;;  %v3701_v57 = vpop.f32.mrb[63].mxu1  ;;  %3859 = vmatmul.mubr.f32.gmra.mrb[168].mxu1 %v4813_v18 }
 0x1d1   : > { %3861 = vmatprep.mubr.msk.f32.mxu1 %vm5405_vm0, %v5406_v6 }
 0x1d2   : > { %4820 = vtanh.f32 %v1023_v47 }
 0x1d3   : > { %v1027_v23 = vpop.f32.mrb[64].mxu1  ;;  %4822 = vtanh.f32 %v841_v20 }
 0x1d4   : > { %v1028_v25 = vadd.f32 %v6171_v32, %v1027_v23  ;;  %v3704_v63 = vpop.f32.mrb[65].mxu1  ;;  %3862 = vmatmul.mubr.f32.gmra.mrb[170].mxu1 %v4815_v55  ;;  %v3047_v55 = vld [vmem:[%s7073_s2 + $0x150] sm:$0xff]  ;;  %v3048_v23 = vld [vmem:[%s7073_s2 + $0x158] sm:$0xff] }
 0x1d5   : > { %3864 = vmatprep.mubr.msk.f32.mxu1 %vm5405_vm0, %v5406_v6 }
 0x1d6   : > { %4824 = vtanh.f32 %v1028_v25  ;;  %v4624_v25 = vpack.c.bf16 %v3048_v23, %v3047_v55 }
 0x1d7   : > { %v1032_v4 = vpop.f32.mrb[66].mxu1  ;;  %4826 = vtanh.f32 %v846_v26 }
 0x1d8   : > { %v1033_v30 = vadd.f32 %v6171_v32, %v1032_v4  ;;  %v3707_v31 = vpop.f32.mrb[67].mxu1  ;;  %3865 = vmatmul.mubr.f32.gmra.mrb[172].mxu1 %v4817_v27 }
 0x1d9   : > { %3867 = vmatprep.mubr.msk.f32.mxu1 %vm5405_vm0, %v5406_v6  ;;  %4625 = vmatpush3.bf16.msra.mxu1 %v4624_v25 }
 0x1da   : > { %4828 = vtanh.f32 %v1033_v30  ;;  %4626 = vmatprep.subr.bf16.mxu1 %v5404_v3 }
 0x1db   : > { %v1037_v24 = vpop.f32.mrb[68].mxu1  ;;  %4830 = vtanh.f32 %v851_v7 }
 0x1dc   : > { %v4821_v37 = vpop.eup %4820  ;;  %v1038_v38 = vadd.f32 %v6171_v32, %v1037_v24  ;;  %v3710_v34 = vpop.f32.mrb[69].mxu1  ;;  %3868 = vmatmul.mubr.f32.gmra.mrb[174].mxu1 %v4819_v22 }
 0x1dd   : > { %4832 = vtanh.f32 %v4821_v37  ;;  %3870 = vmatprep.mubr.msk.f32.mxu1 %vm5405_vm0, %v5406_v6  ;;  %v4823_v40 = vpop.eup %4822 }
 0x1de   : > { %4834 = vtanh.f32 %v1038_v38 }
 0x1df   : > { %v1042_v41 = vpop.f32.mrb[70].mxu1  ;;  %4836 = vtanh.f32 %v856_v28 }
 0x1e0   : > { %v4825_v52 = vpop.eup %4824  ;;  %v1043_v33 = vadd.f32 %v6171_v32, %v1042_v41  ;;  %v3713_v43 = vpop.f32.mrb[71].mxu1  ;;  %3871 = vmatmul.mubr.f32.gmra.mrb[176].mxu1 %v4823_v40 }
 0x1e1   : > { %4838 = vtanh.f32 %v4825_v52  ;;  %3873 = vmatprep.mubr.msk.f32.mxu1 %vm5405_vm0, %v5406_v6  ;;  %v4827_v46 = vpop.eup %4826 }
 0x1e2   : > { %4840 = vtanh.f32 %v1043_v33 }
 0x1e3   : > { %v1047_v59 = vpop.f32.mrb[72].mxu1  ;;  %4842 = vtanh.f32 %v861_v42 }
 0x1e4   : > { %v4829_v48 = vpop.eup %4828  ;;  %v1048_v39 = vadd.f32 %v6171_v32, %v1047_v59  ;;  %v3716_v50 = vpop.f32.mrb[73].mxu1  ;;  %3874 = vmatmul.mubr.f32.gmra.mrb[178].mxu1 %v4827_v46 }
 0x1e5   : > { %4844 = vtanh.f32 %v4829_v48  ;;  %3876 = vmatprep.mubr.msk.f32.mxu1 %vm5405_vm0, %v5406_v6  ;;  %v4831_v53 = vpop.eup %4830 }
 0x1e6   : > { %4846 = vtanh.f32 %v1048_v39 }
 0x1e7   : > { %v4833_v54 = vpop.eup %4832  ;;  %v1052_v11 = vpop.f32.mrb[74].mxu1  ;;  %4848 = vtanh.f32 %v866_v2 }
 0x1e8   : > { %v4835_v58 = vpop.eup %4834  ;;  %v1053_v21 = vadd.f32 %v6171_v32, %v1052_v11  ;;  %v3719_v60 = vpop.f32.mrb[75].mxu1  ;;  %3877 = vmatmul.mubr.f32.gmra.mrb[180].mxu1 %v4831_v53  ;;  %3921 = vmatmul.mubr.f32.vlgmr.msra.gmra.mrb[64].mxu0 %v4833_v54 }
 0x1e9   : > { %4850 = vtanh.f32 %v4835_v58  ;;  %3879 = vmatprep.mubr.msk.f32.mxu1 %vm5405_vm0, %v5406_v6  ;;  %3923 = vmatprep.mubr.msk.f32.mxu0 %vm5405_vm0, %v5406_v6  ;;  %v4837_v61 = vpop.eup %4836 }
 0x1ea   : > { %4852 = vtanh.f32 %v1053_v21 }
 0x1eb   : > { %v4839_v29 = vpop.eup %4838  ;;  %v1057_v62 = vpop.f32.mrb[76].mxu1 }
 0x1ec   : > { %v4841_v36 = vpop.eup %4840  ;;  %v1058_v0 = vadd.f32 %v6171_v32, %v1057_v62  ;;  %v3722_v45 = vpop.f32.mrb[77].mxu1  ;;  %3880 = vmatmul.mubr.f32.gmra.mrb[182].mxu1 %v4837_v61  ;;  %3924 = vmatmul.mubr.f32.gmra.mrb[66].mxu0 %v4839_v29  ;;  %v3049_v61 = vld [vmem:[%s7073_s2 + $0x160] sm:$0xff]  ;;  %v3050_v29 = vld [vmem:[%s7073_s2 + $0x168] sm:$0xff] }
 0x1ed   : > { %4854 = vtanh.f32 %v4841_v36  ;;  %3882 = vmatprep.mubr.msk.f32.mxu1 %vm5405_vm0, %v5406_v6  ;;  %3926 = vmatprep.mubr.msk.f32.mxu0 %vm5405_vm0, %v5406_v6  ;;  %v4843_v56 = vpop.eup %4842  ;;  %v4627_v62 = vpack.c.bf16 %v3050_v29, %v3049_v61 }
 0x1ee   : > { %4856 = vtanh.f32 %v1058_v0 }
 0x1ef   : > { %v4845_v5 = vpop.eup %4844  ;;  %v1062_v8 = vpop.f32.mrb[78].mxu1  ;;  %4628 = vmatpush3.bf16.msra.mxu1 %v4627_v62 }
 0x1f0   : > { %v4847_v9 = vpop.eup %4846  ;;  %v1063_v1 = vadd.f32 %v6171_v32, %v1062_v8  ;;  %v3725_v10 = vpop.f32.mrb[79].mxu1  ;;  %3883 = vmatmul.mubr.f32.gmra.mrb[184].mxu1 %v4843_v56  ;;  %3927 = vmatmul.mubr.f32.gmra.mrb[68].mxu0 %v4845_v5 }
 0x1f1   : > { %4858 = vtanh.f32 %v4847_v9  ;;  %3885 = vmatprep.mubr.msk.f32.mxu1 %vm5405_vm0, %v5406_v6  ;;  %3929 = vmatprep.mubr.msk.f32.mxu0 %vm5405_vm0, %v5406_v6  ;;  %v4849_v14 = vpop.eup %4848 }
 0x1f2   : > { %4860 = vtanh.f32 %v1063_v1  ;;  %4629 = vmatprep.subr.bf16.mxu1 %v5404_v3 }
 0x1f3   : > { %v4851_v12 = vpop.eup %4850  ;;  %v1067_v16 = vpop.f32.mrb[80].mxu1 }
 0x1f4   : > { %v4853_v17 = vpop.eup %4852  ;;  %v1068_v19 = vadd.f32 %v6171_v32, %v1067_v16  ;;  %v3728_v44 = vpop.f32.mrb[81].mxu1  ;;  %3886 = vmatmul.mubr.f32.gmra.mrb[186].mxu1 %v4849_v14  ;;  %3930 = vmatmul.mubr.f32.gmra.mrb[70].mxu0 %v4851_v12 }
 0x1f5   : > { %4862 = vtanh.f32 %v4853_v17  ;;  %3932 = vmatprep.mubr.msk.f32.mxu0 %vm5405_vm0, %v5406_v6  ;;  %4141 = vmatprep.mubr.msk.f32.mxu1 %vm5405_vm0, %v5406_v6 }
 0x1f6   : > { %4864 = vtanh.f32 %v1068_v19 }
 0x1f7   : > { %v4855_v18 = vpop.eup %4854  ;;  %v1072_v49 = vpop.f32.mrb[82].mxu1 }
 0x1f8   : > { %v4857_v47 = vpop.eup %4856  ;;  %v1073_v57 = vadd.f32 %v6171_v32, %v1072_v49  ;;  %v3731_v20 = vpop.f32.mrb[83].mxu1  ;;  %3933 = vmatmul.mubr.f32.gmra.mrb[72].mxu0 %v4855_v18 }
 0x1f9   : > { %4866 = vtanh.f32 %v4857_v47  ;;  %3935 = vmatprep.mubr.msk.f32.mxu0 %vm5405_vm0, %v5406_v6 }
 0x1fa   : > { %4868 = vtanh.f32 %v1073_v57 }
 0x1fb   : > { %v4859_v63 = vpop.eup %4858  ;;  %v1077_v26 = vpop.f32.mrb[84].mxu1 }
 0x1fc   : > { %v4861_v27 = vpop.eup %4860  ;;  %v1078_v4 = vadd.f32 %v6171_v32, %v1077_v26  ;;  %v3734_v7 = vpop.f32.mrb[85].mxu1  ;;  %3936 = vmatmul.mubr.f32.gmra.mrb[74].mxu0 %v4859_v63 }
 0x1fd   : > { %4870 = vtanh.f32 %v4861_v27  ;;  %3938 = vmatprep.mubr.msk.f32.mxu0 %vm5405_vm0, %v5406_v6 }
 0x1fe   : > { %4872 = vtanh.f32 %v1078_v4 }
 0x1ff   : > { %v4863_v30 = vpop.eup %4862  ;;  %v1082_v31 = vpop.f32.mrb[86].mxu1 }
 0x200   : > { %v4865_v15 = vpop.eup %4864  ;;  %v1083_v13 = vadd.f32 %v6171_v32, %v1082_v31  ;;  %v3737_v35 = vpop.f32.mrb[87].mxu1  ;;  %3939 = vmatmul.mubr.f32.gmra.mrb[76].mxu0 %v4863_v30 }
 0x201   : > { %4874 = vtanh.f32 %v4865_v15  ;;  %3941 = vmatprep.mubr.msk.f32.mxu0 %vm5405_vm0, %v5406_v6 }
 0x202   : > { %4876 = vtanh.f32 %v1083_v13 }
 0x203   : > { %v4867_v22 = vpop.eup %4866  ;;  %v1087_v24 = vpop.f32.mrb[88].mxu1 }
 0x204   : > { %v4869_v37 = vpop.eup %4868  ;;  %v1088_v28 = vadd.f32 %v6171_v32, %v1087_v24  ;;  %v3740_v38 = vpop.f32.mrb[89].mxu1  ;;  %3942 = vmatmul.mubr.f32.gmra.mrb[78].mxu0 %v4867_v22 }
 0x205   : > { %4878 = vtanh.f32 %v4869_v37  ;;  %3944 = vmatprep.mubr.msk.f32.mxu0 %vm5405_vm0, %v5406_v6 }
 0x206   : > { %4880 = vtanh.f32 %v1088_v28 }
 0x207   : > { %v4871_v34 = vpop.eup %4870  ;;  %v1092_v40 = vpop.f32.mrb[90].mxu1 }
 0x208   : > { %v4873_v41 = vpop.eup %4872  ;;  %v1093_v52 = vadd.f32 %v6171_v32, %v1092_v40  ;;  %v3743_v42 = vpop.f32.mrb[91].mxu1  ;;  %3945 = vmatmul.mubr.f32.gmra.mrb[80].mxu0 %v4871_v34 }
 0x209   : > { %4882 = vtanh.f32 %v4873_v41  ;;  %3947 = vmatprep.mubr.msk.f32.mxu0 %vm5405_vm0, %v5406_v6  ;;  %v3051_v41 = vld [vmem:[%s7073_s2 + $0x170] sm:$0xff] }
 0x20a   : > { %4884 = vtanh.f32 %v1093_v52  ;;  %v3052_v52 = vld [vmem:[%s7073_s2 + $0x178] sm:$0xff] }
 0x20b   : > { %v4875_v33 = vpop.eup %4874  ;;  %v1097_v43 = vpop.f32.mrb[92].mxu1  ;;  %v4630_v42 = vpack.c.bf16 %v3052_v52, %v3051_v41 }
 0x20c   : > { %v4877_v46 = vpop.eup %4876  ;;  %v1098_v59 = vadd.f32 %v6171_v32, %v1097_v43  ;;  %v3746_v48 = vpop.f32.mrb[93].mxu1  ;;  %3948 = vmatmul.mubr.f32.gmra.mrb[82].mxu0 %v4875_v33 }
 0x20d   : > { %4886 = vtanh.f32 %v4877_v46  ;;  %3950 = vmatprep.mubr.msk.f32.mxu0 %vm5405_vm0, %v5406_v6  ;;  %4631 = vmatpush3.bf16.msra.mxu1 %v4630_v42 }
 0x20e   : > { %4888 = vtanh.f32 %v1098_v59 }
 0x20f   : > { %v4879_v51 = vpop.eup %4878  ;;  %v1102_v2 = vpop.f32.mrb[94].mxu1 }
 0x210   : > { %v4881_v39 = vpop.eup %4880  ;;  %v1103_v50 = vadd.f32 %v6171_v32, %v1102_v2  ;;  %v3749_v53 = vpop.f32.mrb[95].mxu1  ;;  %3951 = vmatmul.mubr.f32.gmra.mrb[84].mxu0 %v4879_v51  ;;  %v3055_v51 = vld [vmem:[%s7073_s2 + $0x180] sm:$0xff]  ;;  %v3056_v2 = vld [vmem:[%s7073_s2 + $0x188] sm:$0xff] }
 0x211   : > { %4890 = vtanh.f32 %v4881_v39  ;;  %3953 = vmatprep.mubr.msk.f32.mxu0 %vm5405_vm0, %v5406_v6  ;;  %v4633_v39 = vpack.c.bf16 %v3056_v2, %v3055_v51 }
 0x212   : > { %4892 = vtanh.f32 %v1103_v50 }
 0x213   : > { %v4883_v54 = vpop.eup %4882  ;;  %v1107_v11 = vpop.f32.mrb[96].mxu1  ;;  %4634 = vmatpush3.bf16.msra.mxu0 %v4633_v39 }
 0x214   : > { %v4885_v58 = vpop.eup %4884  ;;  %v1108_v21 = vadd.f32 %v6171_v32, %v1107_v11  ;;  %v3752_v60 = vpop.f32.mrb[97].mxu1  ;;  %3954 = vmatmul.mubr.f32.gmra.mrb[86].mxu0 %v4883_v54  ;;  %4635 = vmatprep.subr.bf16.mxu0 %v5404_v3 }
 0x215   : > { %4894 = vtanh.f32 %v4885_v58  ;;  %3956 = vmatprep.mubr.msk.f32.mxu0 %vm5405_vm0, %v5406_v6 }
 0x216   : > { %4896 = vtanh.f32 %v1108_v21 }
 0x217   : > { %v4887_v36 = vpop.eup %4886  ;;  %v1112_v0 = vpop.f32.mrb[98].mxu1 }
 0x218   : > { %v4889_v45 = vpop.eup %4888  ;;  %v1113_v56 = vadd.f32 %v6171_v32, %v1112_v0  ;;  %v3755_v5 = vpop.f32.mrb[99].mxu1  ;;  %3957 = vmatmul.mubr.f32.gmra.mrb[88].mxu0 %v4887_v36 }
 0x219   : > { %4898 = vtanh.f32 %v4889_v45  ;;  %3959 = vmatprep.mubr.msk.f32.mxu0 %vm5405_vm0, %v5406_v6 }
 0x21a   : > { %4900 = vtanh.f32 %v1113_v56 }
 0x21b   : > { %v4891_v8 = vpop.eup %4890  ;;  %v1117_v9 = vpop.f32.mrb[100].mxu1 }
 0x21c   : > { %v4893_v1 = vpop.eup %4892  ;;  %v1118_v10 = vadd.f32 %v6171_v32, %v1117_v9  ;;  %v3758_v14 = vpop.f32.mrb[101].mxu1  ;;  %3960 = vmatmul.mubr.f32.gmra.mrb[90].mxu0 %v4891_v8 }
 0x21d   : > { %4902 = vtanh.f32 %v4893_v1  ;;  %3962 = vmatprep.mubr.msk.f32.mxu0 %vm5405_vm0, %v5406_v6 }
 0x21e   : > { %4904 = vtanh.f32 %v1118_v10 }
 0x21f   : > { %v4895_v12 = vpop.eup %4894  ;;  %v1122_v16 = vpop.f32.mrb[102].mxu1 }
 0x220   : > { %v4897_v17 = vpop.eup %4896  ;;  %v1123_v19 = vadd.f32 %v6171_v32, %v1122_v16  ;;  %v3761_v44 = vpop.f32.mrb[103].mxu1  ;;  %3963 = vmatmul.mubr.f32.gmra.mrb[92].mxu0 %v4895_v12 }
 0x221   : > { %4906 = vtanh.f32 %v4897_v17  ;;  %3965 = vmatprep.mubr.msk.f32.mxu0 %vm5405_vm0, %v5406_v6 }
 0x222   : > { %4908 = vtanh.f32 %v1123_v19 }
 0x223   : > { %v4899_v18 = vpop.eup %4898  ;;  %v1127_v49 = vpop.f32.mrb[104].mxu1 }
 0x224   : > { %v4901_v47 = vpop.eup %4900  ;;  %v1128_v57 = vadd.f32 %v6171_v32, %v1127_v49  ;;  %v3764_v20 = vpop.f32.mrb[105].mxu1  ;;  %3966 = vmatmul.mubr.f32.gmra.mrb[94].mxu0 %v4899_v18 }
 0x225   : > { %4910 = vtanh.f32 %v4901_v47  ;;  %3968 = vmatprep.mubr.msk.f32.mxu0 %vm5405_vm0, %v5406_v6 }
 0x226   : > { %4912 = vtanh.f32 %v1128_v57 }
 0x227   : > { %v4903_v55 = vpop.eup %4902  ;;  %v1132_v23 = vpop.f32.mrb[106].mxu1 }
 0x228   : > { %v4905_v25 = vpop.eup %4904  ;;  %v1133_v63 = vadd.f32 %v6171_v32, %v1132_v23  ;;  %v3767_v26 = vpop.f32.mrb[107].mxu1  ;;  %3969 = vmatmul.mubr.f32.gmra.mrb[96].mxu0 %v4903_v55 }
 0x229   : > { %4914 = vtanh.f32 %v4905_v25  ;;  %3971 = vmatprep.mubr.msk.f32.mxu0 %vm5405_vm0, %v5406_v6 }
 0x22a   : > { %4916 = vtanh.f32 %v1133_v63 }
 0x22b   : > { %v4907_v27 = vpop.eup %4906  ;;  %v1137_v4 = vpop.f32.mrb[108].mxu1 }
 0x22c   : > { %v4909_v7 = vpop.eup %4908  ;;  %v1138_v30 = vadd.f32 %v6171_v32, %v1137_v4  ;;  %v3770_v31 = vpop.f32.mrb[109].mxu1  ;;  %3972 = vmatmul.mubr.f32.gmra.mrb[98].mxu0 %v4907_v27  ;;  %v3057_v27 = vld [vmem:[%s7073_s2 + $0x190] sm:$0xff]  ;;  %v3058_v4 = vld [vmem:[%s7073_s2 + $0x198] sm:$0xff] }
 0x22d   : > { %4918 = vtanh.f32 %v4909_v7  ;;  %3974 = vmatprep.mubr.msk.f32.mxu0 %vm5405_vm0, %v5406_v6  ;;  %v4636_v7 = vpack.c.bf16 %v3058_v4, %v3057_v27 }
 0x22e   : > { %4920 = vtanh.f32 %v1138_v30 }
 0x22f   : > { %v4911_v15 = vpop.eup %4910  ;;  %v1142_v13 = vpop.f32.mrb[110].mxu1  ;;  %4637 = vmatpush3.bf16.msra.mxu0 %v4636_v7 }
 0x230   : > { %v4913_v35 = vpop.eup %4912  ;;  %v1143_v22 = vadd.f32 %v6171_v32, %v1142_v13  ;;  %v3773_v24 = vpop.f32.mrb[111].mxu1  ;;  %3975 = vmatmul.mubr.f32.gmra.mrb[100].mxu0 %v4911_v15  ;;  %4638 = vmatprep.subr.bf16.mxu0 %v5404_v3 }
 0x231   : > { %4922 = vtanh.f32 %v4913_v35  ;;  %3977 = vmatprep.mubr.msk.f32.mxu0 %vm5405_vm0, %v5406_v6 }
 0x232   : > { %4924 = vtanh.f32 %v1143_v22 }
 0x233   : > { %v4915_v37 = vpop.eup %4914  ;;  %v1147_v28 = vpop.f32.mrb[112].mxu1 }
 0x234   : > { %v4917_v38 = vpop.eup %4916  ;;  %v1148_v34 = vadd.f32 %v6171_v32, %v1147_v28  ;;  %v3776_v40 = vpop.f32.mrb[113].mxu1  ;;  %3978 = vmatmul.mubr.f32.gmra.mrb[102].mxu0 %v4915_v37 }
 0x235   : > { %4926 = vtanh.f32 %v4917_v38  ;;  %3980 = vmatprep.mubr.msk.f32.mxu0 %vm5405_vm0, %v5406_v6 }
 0x236   : > { %4928 = vtanh.f32 %v1148_v34 }
 0x237   : > { %v4919_v33 = vpop.eup %4918  ;;  %v1152_v43 = vpop.f32.mrb[114].mxu1 }
 0x238   : > { %v4921_v46 = vpop.eup %4920  ;;  %v1153_v59 = vadd.f32 %v6171_v32, %v1152_v43  ;;  %v3779_v48 = vpop.f32.mrb[115].mxu1  ;;  %3981 = vmatmul.mubr.f32.gmra.mrb[104].mxu0 %v4919_v33 }
 0x239   : > { %4930 = vtanh.f32 %v4921_v46  ;;  %3983 = vmatprep.mubr.msk.f32.mxu0 %vm5405_vm0, %v5406_v6 }
 0x23a   : > { %4932 = vtanh.f32 %v1153_v59 }
 0x23b   : > { %v4923_v50 = vpop.eup %4922  ;;  %v1157_v53 = vpop.f32.mrb[116].mxu1 }
 0x23c   : > { %v4925_v54 = vpop.eup %4924  ;;  %v1158_v11 = vadd.f32 %v6171_v32, %v1157_v53  ;;  %v3782_v58 = vpop.f32.mrb[117].mxu1  ;;  %3984 = vmatmul.mubr.f32.gmra.mrb[106].mxu0 %v4923_v50 }
 0x23d   : > { %4934 = vtanh.f32 %v4925_v54  ;;  %3986 = vmatprep.mubr.msk.f32.mxu0 %vm5405_vm0, %v5406_v6 }
 0x23e   : > { %4936 = vtanh.f32 %v1158_v11 }
 0x23f   : > { %v4927_v21 = vpop.eup %4926  ;;  %v1162_v60 = vpop.f32.mrb[118].mxu1 }
 0x240   : > { %v4929_v61 = vpop.eup %4928  ;;  %v1163_v29 = vadd.f32 %v6171_v32, %v1162_v60  ;;  %v3785_v62 = vpop.f32.mrb[119].mxu1  ;;  %3987 = vmatmul.mubr.f32.gmra.mrb[108].mxu0 %v4927_v21 }
 0x241   : > { %4938 = vtanh.f32 %v4929_v61  ;;  %3989 = vmatprep.mubr.msk.f32.mxu0 %vm5405_vm0, %v5406_v6  ;;  %v3059_v61 = vld [vmem:[%s7073_s2 + $0x1a0] sm:$0xff] }
 0x242   : > { %4940 = vtanh.f32 %v1163_v29  ;;  %v3060_v29 = vld [vmem:[%s7073_s2 + $0x1a8] sm:$0xff] }
 0x243   : > { %v4931_v36 = vpop.eup %4930  ;;  %v1167_v0 = vpop.f32.mrb[120].mxu1 }
 0x244   : > { %v4933_v45 = vpop.eup %4932  ;;  %v1168_v56 = vadd.f32 %v6171_v32, %v1167_v0  ;;  %v3788_v5 = vpop.f32.mrb[121].mxu1  ;;  %3990 = vmatmul.mubr.f32.gmra.mrb[110].mxu0 %v4931_v36  ;;  %v4639_v0 = vpack.c.bf16 %v3060_v29, %v3059_v61 }
 0x245   : > { %4942 = vtanh.f32 %v4933_v45  ;;  %3992 = vmatprep.mubr.msk.f32.mxu0 %vm5405_vm0, %v5406_v6 }
 0x246   : > { %4944 = vtanh.f32 %v1168_v56  ;;  %4640 = vmatpush3.bf16.msra.mxu0 %v4639_v0 }
 0x247   : > { %v4935_v8 = vpop.eup %4934  ;;  %v1172_v9 = vpop.f32.mrb[122].mxu1  ;;  %4641 = vmatprep.subr.bf16.mxu0 %v5404_v3 }
 0x248   : > { %v4937_v1 = vpop.eup %4936  ;;  %v1173_v10 = vadd.f32 %v6171_v32, %v1172_v9  ;;  %v3791_v14 = vpop.f32.mrb[123].mxu1  ;;  %3993 = vmatmul.mubr.f32.gmra.mrb[112].mxu0 %v4935_v8 }
 0x249   : > { %4946 = vtanh.f32 %v4937_v1  ;;  %3995 = vmatprep.mubr.msk.f32.mxu0 %vm5405_vm0, %v5406_v6 }
 0x24a   : > { %4948 = vtanh.f32 %v1173_v10 }
 0x24b   : > { %v4939_v12 = vpop.eup %4938  ;;  %v1177_v16 = vpop.f32.mrb[124].mxu1 }
 0x24c   : > { %v4941_v17 = vpop.eup %4940  ;;  %v1178_v19 = vadd.f32 %v6171_v32, %v1177_v16  ;;  %v3794_v44 = vpop.f32.mrb[125].mxu1  ;;  %3996 = vmatmul.mubr.f32.gmra.mrb[114].mxu0 %v4939_v12 }
 0x24d   : > { %4950 = vtanh.f32 %v4941_v17  ;;  %3998 = vmatprep.mubr.msk.f32.mxu0 %vm5405_vm0, %v5406_v6 }
 0x24e   : > { %4952 = vtanh.f32 %v1178_v19 }
 0x24f   : > { %v4943_v18 = vpop.eup %4942  ;;  %v1182_v49 = vpop.f32.mrb[126].mxu1 }
 0x250   : > { %v4945_v47 = vpop.eup %4944  ;;  %v1183_v57 = vadd.f32 %v6171_v32, %v1182_v49  ;;  %v3797_v20 = vpop.f32.mrb[127].mxu1  ;;  %3999 = vmatmul.mubr.f32.gmra.mrb[116].mxu0 %v4943_v18 }
 0x251   : > { %4954 = vtanh.f32 %v4945_v47  ;;  %4001 = vmatprep.mubr.msk.f32.mxu0 %vm5405_vm0, %v5406_v6 }
 0x252   : > { %4956 = vtanh.f32 %v1183_v57 }
 0x253   : > { %v4947_v55 = vpop.eup %4946  ;;  %v1187_v23 = vpop.f32.mrb[128].mxu1 }
 0x254   : > { %v4949_v25 = vpop.eup %4948  ;;  %v1188_v63 = vadd.f32 %v6171_v32, %v1187_v23  ;;  %v3800_v26 = vpop.f32.mrb[129].mxu1  ;;  %4002 = vmatmul.mubr.f32.gmra.mrb[118].mxu0 %v4947_v55 }
 0x255   : > { %4958 = vtanh.f32 %v4949_v25  ;;  %4004 = vmatprep.mubr.msk.f32.mxu0 %vm5405_vm0, %v5406_v6 }
 0x256   : > { %4960 = vtanh.f32 %v1188_v63 }
 0x257   : > { %v4951_v30 = vpop.eup %4950  ;;  %v1192_v31 = vpop.f32.mrb[130].mxu1 }
 0x258   : > { %v4953_v15 = vpop.eup %4952  ;;  %v1193_v13 = vadd.f32 %v6171_v32, %v1192_v31  ;;  %v3803_v35 = vpop.f32.mrb[131].mxu1  ;;  %4005 = vmatmul.mubr.f32.gmra.mrb[120].mxu0 %v4951_v30 }
 0x259   : > { %4962 = vtanh.f32 %v4953_v15  ;;  %4007 = vmatprep.mubr.msk.f32.mxu0 %vm5405_vm0, %v5406_v6 }
 0x25a   : > { %4964 = vtanh.f32 %v1193_v13 }
 0x25b   : > { %v4955_v22 = vpop.eup %4954  ;;  %v1197_v24 = vpop.f32.mrb[132].mxu1 }
 0x25c   : > { %v4957_v37 = vpop.eup %4956  ;;  %v1198_v28 = vadd.f32 %v6171_v32, %v1197_v24  ;;  %v3806_v38 = vpop.f32.mrb[133].mxu1  ;;  %4008 = vmatmul.mubr.f32.gmra.mrb[122].mxu0 %v4955_v22 }
 0x25d   : > { %4966 = vtanh.f32 %v4957_v37  ;;  %4010 = vmatprep.mubr.msk.f32.mxu0 %vm5405_vm0, %v5406_v6 }
 0x25e   : > { %4968 = vtanh.f32 %v1198_v28 }
 0x25f   : > { %v4959_v34 = vpop.eup %4958  ;;  %v1202_v40 = vpop.f32.mrb[134].mxu1 }
 0x260   : > { %v4961_v41 = vpop.eup %4960  ;;  %v1203_v52 = vadd.f32 %v6171_v32, %v1202_v40  ;;  %v3809_v42 = vpop.f32.mrb[135].mxu1  ;;  %4011 = vmatmul.mubr.f32.gmra.mrb[124].mxu0 %v4959_v34 }
 0x261   : > { %4970 = vtanh.f32 %v4961_v41  ;;  %4013 = vmatprep.mubr.msk.f32.mxu0 %vm5405_vm0, %v5406_v6  ;;  %v3061_v41 = vld [vmem:[%s7073_s2 + $0x1b0] sm:$0xff] }
 0x262   : > { %4972 = vtanh.f32 %v1203_v52  ;;  %v3062_v52 = vld [vmem:[%s7073_s2 + $0x1b8] sm:$0xff] }
 0x263   : > { %v4963_v33 = vpop.eup %4962  ;;  %v1207_v43 = vpop.f32.mrb[136].mxu1 }
 0x264   : > { %v4965_v46 = vpop.eup %4964  ;;  %v1208_v59 = vadd.f32 %v6171_v32, %v1207_v43  ;;  %v3812_v48 = vpop.f32.mrb[137].mxu1  ;;  %4014 = vmatmul.mubr.f32.gmra.mrb[126].mxu0 %v4963_v33  ;;  %v4642_v43 = vpack.c.bf16 %v3062_v52, %v3061_v41  ;;  %v6442_v41 = vld [vmem:[%s7074_s3 + $0x2] ss:$0 sm:$0xff] }
 0x265   : > { %4974 = vtanh.f32 %v4965_v46  ;;  %4016 = vmatprep.mubr.msk.f32.mxu0 %vm5405_vm0, %v5406_v6 }
 0x266   : > { %4976 = vtanh.f32 %v1208_v59  ;;  %4643 = vmatpush3.bf16.msra.mxu0 %v4642_v43 }
 0x267   : > { %v4967_v51 = vpop.eup %4966  ;;  %v1212_v2 = vpop.f32.mrb[138].mxu1  ;;  %4644 = vmatprep.subr.bf16.mxu0 %v5404_v3 }
 0x268   : > { %v4969_v39 = vpop.eup %4968  ;;  %v1213_v50 = vadd.f32 %v6171_v32, %v1212_v2  ;;  %v3815_v53 = vpop.f32.mrb[139].mxu1  ;;  %4017 = vmatmul.mubr.f32.gmra.mrb[128].mxu0 %v4967_v51 }
 0x269   : > { %4978 = vtanh.f32 %v4969_v39  ;;  %4019 = vmatprep.mubr.msk.f32.mxu0 %vm5405_vm0, %v5406_v6 }
 0x26a   : > { %4980 = vtanh.f32 %v1213_v50 }
 0x26b   : > { %v4971_v54 = vpop.eup %4970  ;;  %v1217_v11 = vpop.f32.mrb[140].mxu1 }
 0x26c   : > { %v4973_v58 = vpop.eup %4972  ;;  %v1218_v21 = vadd.f32 %v6171_v32, %v1217_v11  ;;  %v3818_v60 = vpop.f32.mrb[141].mxu1  ;;  %4020 = vmatmul.mubr.f32.gmra.mrb[130].mxu0 %v4971_v54 }
 0x26d   : > { %4982 = vtanh.f32 %v4973_v58  ;;  %4022 = vmatprep.mubr.msk.f32.mxu0 %vm5405_vm0, %v5406_v6 }
 0x26e   : > { %4984 = vtanh.f32 %v1218_v21  ;;  %v6405_v21 = vld [vmem:[%s7074_s3 + $0x1] ss:$0 sm:$0xff] }
 0x26f   : > { %v4975_v62 = vpop.eup %4974  ;;  %v1222_v36 = vpop.f32.mrb[142].mxu1 }
 0x270   : > { %v4977_v45 = vpop.eup %4976  ;;  %v1223_v56 = vadd.f32 %v6171_v32, %v1222_v36  ;;  %v3821_v5 = vpop.f32.mrb[143].mxu1  ;;  %4023 = vmatmul.mubr.f32.gmra.mrb[132].mxu0 %v4975_v62 }
 0x271   : > { %4986 = vtanh.f32 %v4977_v45  ;;  %4025 = vmatprep.mubr.msk.f32.mxu0 %vm5405_vm0, %v5406_v6 }
 0x272   : > { %4988 = vtanh.f32 %v1223_v56 }
 0x273   : > { %v4979_v8 = vpop.eup %4978  ;;  %v1227_v9 = vpop.f32.mrb[144].mxu1 }
 0x274   : > { %v4981_v1 = vpop.eup %4980  ;;  %v1228_v10 = vadd.f32 %v6171_v32, %v1227_v9  ;;  %v3824_v14 = vpop.f32.mrb[145].mxu1  ;;  %4026 = vmatmul.mubr.f32.gmra.mrb[134].mxu0 %v4979_v8 }
 0x275   : > { %4990 = vtanh.f32 %v4981_v1  ;;  %4028 = vmatprep.mubr.msk.f32.mxu0 %vm5405_vm0, %v5406_v6 }
 0x276   : > { %4992 = vtanh.f32 %v1228_v10 }
 0x277   : > { %v4983_v12 = vpop.eup %4982  ;;  %v1232_v16 = vpop.f32.mrb[146].mxu1 }
 0x278   : > { %v4985_v17 = vpop.eup %4984  ;;  %v1233_v19 = vadd.f32 %v6171_v32, %v1232_v16  ;;  %v3827_v44 = vpop.f32.mrb[147].mxu1  ;;  %4029 = vmatmul.mubr.f32.gmra.mrb[136].mxu0 %v4983_v12 }
 0x279   : > { %4994 = vtanh.f32 %v4985_v17  ;;  %4031 = vmatprep.mubr.msk.f32.mxu0 %vm5405_vm0, %v5406_v6 }
 0x27a   : > { %4996 = vtanh.f32 %v1233_v19 }
 0x27b   : > { %v4987_v18 = vpop.eup %4986  ;;  %v1237_v49 = vpop.f32.mrb[148].mxu1 }
 0x27c   : > { %v4989_v47 = vpop.eup %4988  ;;  %v1238_v57 = vadd.f32 %v6171_v32, %v1237_v49  ;;  %v3830_v20 = vpop.f32.mrb[149].mxu1  ;;  %4032 = vmatmul.mubr.f32.gmra.mrb[138].mxu0 %v4987_v18 }
 0x27d   : > { %4998 = vtanh.f32 %v4989_v47  ;;  %4034 = vmatprep.mubr.msk.f32.mxu0 %vm5405_vm0, %v5406_v6 }
 0x27e   : > { %5000 = vtanh.f32 %v1238_v57 }
 0x27f   : > { %v4991_v55 = vpop.eup %4990  ;;  %v1242_v23 = vpop.f32.mrb[150].mxu1 }
 0x280   : > { %v4993_v25 = vpop.eup %4992  ;;  %v1243_v63 = vadd.f32 %v6171_v32, %v1242_v23  ;;  %v3833_v26 = vpop.f32.mrb[151].mxu1  ;;  %4035 = vmatmul.mubr.f32.gmra.mrb[140].mxu0 %v4991_v55 }
 0x281   : > { %5002 = vtanh.f32 %v4993_v25  ;;  %4037 = vmatprep.mubr.msk.f32.mxu0 %vm5405_vm0, %v5406_v6  ;;  %v3063_v25 = vld [vmem:[%s7073_s2 + $0x1c0] sm:$0xff] }
 0x282   : > { %5004 = vtanh.f32 %v1243_v63  ;;  %v3064_v63 = vld [vmem:[%s7073_s2 + $0x1c8] sm:$0xff] }
 0x283   : > { %v4995_v27 = vpop.eup %4994  ;;  %v1247_v4 = vpop.f32.mrb[152].mxu1 }
 0x284   : > { %v4997_v7 = vpop.eup %4996  ;;  %v1248_v30 = vadd.f32 %v6171_v32, %v1247_v4  ;;  %v3836_v31 = vpop.f32.mrb[153].mxu1  ;;  %4038 = vmatmul.mubr.f32.gmra.mrb[142].mxu0 %v4995_v27  ;;  %v4645_v4 = vpack.c.bf16 %v3064_v63, %v3063_v25 }
 0x285   : > { %5006 = vtanh.f32 %v4997_v7  ;;  %4040 = vmatprep.mubr.msk.f32.mxu0 %vm5405_vm0, %v5406_v6 }
 0x286   : > { %5008 = vtanh.f32 %v1248_v30  ;;  %4646 = vmatpush3.bf16.msra.mxu0 %v4645_v4 }
 0x287   : > { %v4999_v15 = vpop.eup %4998  ;;  %v1252_v13 = vpop.f32.mrb[154].mxu1  ;;  %4647 = vmatprep.subr.bf16.mxu0 %v5404_v3 }
 0x288   : > { %v5001_v35 = vpop.eup %5000  ;;  %v1253_v22 = vadd.f32 %v6171_v32, %v1252_v13  ;;  %v3839_v24 = vpop.f32.mrb[155].mxu1  ;;  %4041 = vmatmul.mubr.f32.gmra.mrb[144].mxu0 %v4999_v15 }
 0x289   : > { %5010 = vtanh.f32 %v5001_v35  ;;  %4043 = vmatprep.mubr.msk.f32.mxu0 %vm5405_vm0, %v5406_v6 }
 0x28a   : > { %5012 = vtanh.f32 %v1253_v22 }
 0x28b   : > { %v5003_v37 = vpop.eup %5002  ;;  %v1257_v28 = vpop.f32.mrb[156].mxu1 }
 0x28c   : > { %v5005_v38 = vpop.eup %5004  ;;  %v1258_v34 = vadd.f32 %v6171_v32, %v1257_v28  ;;  %v3842_v40 = vpop.f32.mrb[157].mxu1  ;;  %4044 = vmatmul.mubr.f32.gmra.mrb[146].mxu0 %v5003_v37 }
 0x28d   : > { %5014 = vtanh.f32 %v5005_v38  ;;  %4046 = vmatprep.mubr.msk.f32.mxu0 %vm5405_vm0, %v5406_v6 }
 0x28e   : > { %5016 = vtanh.f32 %v1258_v34 }
 0x28f   : > { %v5007_v42 = vpop.eup %5006  ;;  %v1262_v33 = vpop.f32.mrb[158].mxu1 }
 0x290   : > { %v5009_v46 = vpop.eup %5008  ;;  %v1263_v59 = vadd.f32 %v6171_v32, %v1262_v33  ;;  %v3845_v48 = vpop.f32.mrb[159].mxu1  ;;  %4047 = vmatmul.mubr.f32.gmra.mrb[148].mxu0 %v5007_v42 }
 0x291   : > { %5018 = vtanh.f32 %v5009_v46  ;;  %4049 = vmatprep.mubr.msk.f32.mxu0 %vm5405_vm0, %v5406_v6 }
 0x292   : > { %5020 = vtanh.f32 %v1263_v59 }
 0x293   : > { %v5011_v51 = vpop.eup %5010  ;;  %v1267_v2 = vpop.f32.mrb[160].mxu1 }
 0x294   : > { %v5013_v39 = vpop.eup %5012  ;;  %v1268_v50 = vadd.f32 %v6171_v32, %v1267_v2  ;;  %v3848_v53 = vpop.f32.mrb[161].mxu1  ;;  %4050 = vmatmul.mubr.f32.gmra.mrb[150].mxu0 %v5011_v51 }
 0x295   : > { %5022 = vtanh.f32 %v5013_v39  ;;  %4052 = vmatprep.mubr.msk.f32.mxu0 %vm5405_vm0, %v5406_v6 }
 0x296   : > { %5024 = vtanh.f32 %v1268_v50 }
 0x297   : > { %v5015_v54 = vpop.eup %5014  ;;  %v1272_v11 = vpop.f32.mrb[162].mxu1 }
 0x298   : > { %v5017_v58 = vpop.eup %5016  ;;  %v1273_v60 = vadd.f32 %v6405_v21, %v1272_v11  ;;  %v3851_v61 = vpop.f32.mrb[163].mxu1  ;;  %4053 = vmatmul.mubr.f32.gmra.mrb[152].mxu0 %v5015_v54 }
 0x299   : > { %5026 = vtanh.f32 %v5017_v58  ;;  %4055 = vmatprep.mubr.msk.f32.mxu0 %vm5405_vm0, %v5406_v6 }
 0x29a   : > { %5028 = vtanh.f32 %v1273_v60 }
 0x29b   : > { %v5019_v32 = vpop.eup %5018  ;;  %v1277_v29 = vpop.f32.mrb[164].mxu1 }
 0x29c   : > { %v5021_v62 = vpop.eup %5020  ;;  %v1278_v36 = vadd.f32 %v6405_v21, %v1277_v29  ;;  %v3854_v0 = vpop.f32.mrb[165].mxu1  ;;  %4056 = vmatmul.mubr.f32.gmra.mrb[154].mxu0 %v5019_v32 }
 0x29d   : > { %5030 = vtanh.f32 %v5021_v62  ;;  %4058 = vmatprep.mubr.msk.f32.mxu0 %vm5405_vm0, %v5406_v6 }
 0x29e   : > { %5032 = vtanh.f32 %v1278_v36 }
 0x29f   : > { %v5023_v45 = vpop.eup %5022  ;;  %v1282_v56 = vpop.f32.mrb[166].mxu1 }
 0x2a0   : > { %v5025_v5 = vpop.eup %5024  ;;  %v1283_v8 = vadd.f32 %v6405_v21, %v1282_v56  ;;  %v3857_v9 = vpop.f32.mrb[167].mxu1  ;;  %4059 = vmatmul.mubr.f32.gmra.mrb[156].mxu0 %v5023_v45 }
 0x2a1   : > { %5034 = vtanh.f32 %v5025_v5  ;;  %4061 = vmatprep.mubr.msk.f32.mxu0 %vm5405_vm0, %v5406_v6 }
 0x2a2   : > { %5036 = vtanh.f32 %v1283_v8 }
 0x2a3   : > { %v5027_v1 = vpop.eup %5026  ;;  %v1287_v10 = vpop.f32.mrb[168].mxu1 }
 0x2a4   : > { %v5029_v14 = vpop.eup %5028  ;;  %v1288_v12 = vadd.f32 %v6405_v21, %v1287_v10  ;;  %v3860_v16 = vpop.f32.mrb[169].mxu1  ;;  %4062 = vmatmul.mubr.f32.gmra.mrb[158].mxu0 %v5027_v1 }
 0x2a5   : > { %5038 = vtanh.f32 %v5029_v14  ;;  %4064 = vmatprep.mubr.msk.f32.mxu0 %vm5405_vm0, %v5406_v6 }
 0x2a6   : > { %5040 = vtanh.f32 %v1288_v12 }
 0x2a7   : > { %v5031_v17 = vpop.eup %5030  ;;  %v1292_v19 = vpop.f32.mrb[170].mxu1 }
 0x2a8   : > { %v5033_v44 = vpop.eup %5032  ;;  %v1293_v18 = vadd.f32 %v6405_v21, %v1292_v19  ;;  %v3863_v49 = vpop.f32.mrb[171].mxu1  ;;  %4065 = vmatmul.mubr.f32.gmra.mrb[160].mxu0 %v5031_v17 }
 0x2a9   : > { %5042 = vtanh.f32 %v5033_v44  ;;  %4067 = vmatprep.mubr.msk.f32.mxu0 %vm5405_vm0, %v5406_v6 }
 0x2aa   : > { %5044 = vtanh.f32 %v1293_v18 }
 0x2ab   : > { %v5035_v47 = vpop.eup %5034  ;;  %v1297_v57 = vpop.f32.mrb[172].mxu1 }
 0x2ac   : > { %v5037_v20 = vpop.eup %5036  ;;  %v1298_v55 = vadd.f32 %v6405_v21, %v1297_v57  ;;  %v3866_v23 = vpop.f32.mrb[173].mxu1  ;;  %4068 = vmatmul.mubr.f32.gmra.mrb[162].mxu0 %v5035_v47  ;;  %v3065_v57 = vld [vmem:[%s7073_s2 + $0x1d0] sm:$0xff] }
 0x2ad   : > { %5046 = vtanh.f32 %v5037_v20  ;;  %4070 = vmatprep.mubr.msk.f32.mxu0 %vm5405_vm0, %v5406_v6  ;;  %v3066_v20 = vld [vmem:[%s7073_s2 + $0x1d8] sm:$0xff] }
 0x2ae   : > { %5048 = vtanh.f32 %v1298_v55  ;;  %v4648_v25 = vpack.c.bf16 %v3066_v20, %v3065_v57 }
 0x2af   : > { %v5039_v26 = vpop.eup %5038  ;;  %v1302_v27 = vpop.f32.mrb[174].mxu1 }
 0x2b0   : > { %v5041_v7 = vpop.eup %5040  ;;  %v1303_v30 = vadd.f32 %v6405_v21, %v1302_v27  ;;  %v3869_v31 = vpop.f32.mrb[175].mxu1  ;;  %4071 = vmatmul.mubr.f32.gmra.mrb[164].mxu0 %v5039_v26 }
 0x2b1   : > { %5050 = vtanh.f32 %v5041_v7  ;;  %4073 = vmatprep.mubr.msk.f32.mxu0 %vm5405_vm0, %v5406_v6  ;;  %4649 = vmatpush3.bf16.msra.mxu0 %v4648_v25 }
 0x2b2   : > { %5052 = vtanh.f32 %v1303_v30  ;;  %4650 = vmatprep.subr.bf16.mxu0 %v5404_v3 }
 0x2b3   : > { %v5043_v15 = vpop.eup %5042  ;;  %v1307_v13 = vpop.f32.mrb[176].mxu1 }
 0x2b4   : > { %v5045_v35 = vpop.eup %5044  ;;  %v1308_v22 = vadd.f32 %v6405_v21, %v1307_v13  ;;  %v3872_v24 = vpop.f32.mrb[177].mxu1  ;;  %4074 = vmatmul.mubr.f32.gmra.mrb[166].mxu0 %v5043_v15 }
 0x2b5   : > { %5054 = vtanh.f32 %v5045_v35  ;;  %4076 = vmatprep.mubr.msk.f32.mxu0 %vm5405_vm0, %v5406_v6 }
 0x2b6   : > { %5056 = vtanh.f32 %v1308_v22 }
 0x2b7   : > { %v5047_v37 = vpop.eup %5046  ;;  %v1312_v28 = vpop.f32.mrb[178].mxu1 }
 0x2b8   : > { %v5049_v38 = vpop.eup %5048  ;;  %v1313_v34 = vadd.f32 %v6405_v21, %v1312_v28  ;;  %v3875_v40 = vpop.f32.mrb[179].mxu1  ;;  %4077 = vmatmul.mubr.f32.gmra.mrb[168].mxu0 %v5047_v37 }
 0x2b9   : > { %5058 = vtanh.f32 %v5049_v38  ;;  %4079 = vmatprep.mubr.msk.f32.mxu0 %vm5405_vm0, %v5406_v6 }
 0x2ba   : > { %5060 = vtanh.f32 %v1313_v34 }
 0x2bb   : > { %v5051_v52 = vpop.eup %5050  ;;  %v1317_v42 = vpop.f32.mrb[180].mxu1 }
 0x2bc   : > { %v1553_v33 = vpop.f32.mrb[64].mxu0  ;;  %v5053_v43 = vpop.eup %5052  ;;  %v1318_v46 = vadd.f32 %v6405_v21, %v1317_v42  ;;  %4080 = vmatmul.mubr.f32.gmra.mrb[170].mxu0 %v5051_v52 }
 0x2bd   : > { %v1554_v59 = vadd.f32 %v6442_v41, %v1553_v33  ;;  %v3878_v48 = vpop.f32.mrb[181].mxu1  ;;  %v3922_v51 = vpop.f32.mrb[65].mxu0  ;;  %5062 = vtanh.f32 %v5053_v43  ;;  %4082 = vmatprep.mubr.msk.f32.mxu0 %vm5405_vm0, %v5406_v6 }
 0x2be   : > { %5064 = vtanh.f32 %v1318_v46 }
 0x2bf   : > { %v5055_v2 = vpop.eup %5054  ;;  %5066 = vtanh.f32 %v1554_v59  ;;  %v1322_v39 = vpop.f32.mrb[182].mxu1 }
 0x2c0   : > { %v1558_v50 = vpop.f32.mrb[66].mxu0  ;;  %v5057_v53 = vpop.eup %5056  ;;  %v1323_v54 = vadd.f32 %v6405_v21, %v1322_v39  ;;  %4083 = vmatmul.mubr.f32.gmra.mrb[172].mxu0 %v5055_v2 }
 0x2c1   : > { %v1559_v11 = vadd.f32 %v6442_v41, %v1558_v50  ;;  %v3881_v58 = vpop.f32.mrb[183].mxu1  ;;  %v3925_v60 = vpop.f32.mrb[67].mxu0  ;;  %5068 = vtanh.f32 %v5057_v53  ;;  %4085 = vmatprep.mubr.msk.f32.mxu0 %vm5405_vm0, %v5406_v6 }
 0x2c2   : > { %5070 = vtanh.f32 %v1323_v54 }
 0x2c3   : > { %v5059_v61 = vpop.eup %5058  ;;  %5072 = vtanh.f32 %v1559_v11  ;;  %v1327_v32 = vpop.f32.mrb[184].mxu1 }
 0x2c4   : > { %v1563_v29 = vpop.f32.mrb[68].mxu0  ;;  %v5061_v62 = vpop.eup %5060  ;;  %v1328_v36 = vadd.f32 %v6405_v21, %v1327_v32  ;;  %4086 = vmatmul.mubr.f32.gmra.mrb[174].mxu0 %v5059_v61 }
 0x2c5   : > { %v1564_v0 = vadd.f32 %v6442_v41, %v1563_v29  ;;  %v3884_v45 = vpop.f32.mrb[185].mxu1  ;;  %v3928_v56 = vpop.f32.mrb[69].mxu0  ;;  %5074 = vtanh.f32 %v5061_v62  ;;  %4088 = vmatprep.mubr.msk.f32.mxu0 %vm5405_vm0, %v5406_v6 }
 0x2c6   : > { %5076 = vtanh.f32 %v1328_v36  ;;  %v3067_v36 = vld [vmem:[%s7073_s2 + $0x1e0] sm:$0xff] }
 0x2c7   : > { %v5063_v5 = vpop.eup %5062  ;;  %5078 = vtanh.f32 %v1564_v0  ;;  %v1332_v8 = vpop.f32.mrb[186].mxu1  ;;  %v3068_v0 = vld [vmem:[%s7073_s2 + $0x1e8] sm:$0xff] }
 0x2c8   : > { %v1568_v9 = vpop.f32.mrb[70].mxu0  ;;  %v5065_v1 = vpop.eup %5064  ;;  %v1333_v10 = vadd.f32 %v6405_v21, %v1332_v8  ;;  %4089 = vmatmul.mubr.f32.gmra.mrb[176].mxu0 %v5063_v5  ;;  %v4651_v56 = vpack.c.bf16 %v3068_v0, %v3067_v36 }
 0x2c9   : > { %v1569_v14 = vadd.f32 %v6442_v41, %v1568_v9  ;;  %v3887_v12 = vpop.f32.mrb[187].mxu1  ;;  %v3931_v16 = vpop.f32.mrb[71].mxu0  ;;  %5080 = vtanh.f32 %v5065_v1  ;;  %4091 = vmatprep.mubr.msk.f32.mxu0 %vm5405_vm0, %v5406_v6 }
 0x2ca   : > { %v5067_v17 = vpop.eup %5066  ;;  %5082 = vtanh.f32 %v1333_v10  ;;  %4652 = vmatpush3.bf16.msra.mxu0 %v4651_v56 }
 0x2cb   : > { %4142 = vmatmul.mubr.f32.vlgmr.msra.gmra.mrb[188].mxu1 %v5067_v17  ;;  %v5069_v19 = vpop.eup %5068  ;;  %5084 = vtanh.f32 %v1569_v14  ;;  %v1573_v44 = vpop.f32.mrb[72].mxu0  ;;  %4653 = vmatprep.subr.bf16.mxu0 %v5404_v3 }
 0x2cc   : > { %4144 = vmatprep.mubr.msk.f32.mxu1 %vm5405_vm0, %v5406_v6  ;;  %v5071_v18 = vpop.eup %5070  ;;  %v1574_v21 = vadd.f32 %v6442_v41, %v1573_v44  ;;  %v3934_v49 = vpop.f32.mrb[73].mxu0  ;;  %4092 = vmatmul.mubr.f32.gmra.mrb[178].mxu0 %v5069_v19 }
 0x2cd   : > { %v5073_v47 = vpop.eup %5072  ;;  %5086 = vtanh.f32 %v5071_v18  ;;  %4094 = vmatprep.mubr.msk.f32.mxu0 %vm5405_vm0, %v5406_v6 }
 0x2ce   : > { %5088 = vtanh.f32 %v1574_v21 }
 0x2cf   : > { %4145 = vmatmul.mubr.f32.gmra.mrb[190].mxu1 %v5073_v47  ;;  %v5075_v55 = vpop.eup %5074  ;;  %v1578_v23 = vpop.f32.mrb[74].mxu0 }
 0x2d0   : > { %4147 = vmatprep.mubr.msk.f32.mxu1 %vm5405_vm0, %v5406_v6  ;;  %v5077_v63 = vpop.eup %5076  ;;  %v1579_v26 = vadd.f32 %v6442_v41, %v1578_v23  ;;  %v3937_v27 = vpop.f32.mrb[75].mxu0  ;;  %4095 = vmatmul.mubr.f32.gmra.mrb[180].mxu0 %v5075_v55 }
 0x2d1   : > { %v5079_v4 = vpop.eup %5078  ;;  %5090 = vtanh.f32 %v5077_v63  ;;  %4097 = vmatprep.mubr.msk.f32.mxu0 %vm5405_vm0, %v5406_v6 }
 0x2d2   : > { %5092 = vtanh.f32 %v1579_v26 }
 0x2d3   : > { %4148 = vmatmul.mubr.f32.gmra.mrb[192].mxu1 %v5079_v4  ;;  %v5081_v7 = vpop.eup %5080  ;;  %v1583_v30 = vpop.f32.mrb[76].mxu0 }
 0x2d4   : > { %4150 = vmatprep.mubr.msk.f32.mxu1 %vm5405_vm0, %v5406_v6  ;;  %v5083_v31 = vpop.eup %5082  ;;  %v1584_v15 = vadd.f32 %v6442_v41, %v1583_v30  ;;  %v3940_v13 = vpop.f32.mrb[77].mxu0  ;;  %4098 = vmatmul.mubr.f32.gmra.mrb[182].mxu0 %v5081_v7 }
 0x2d5   : > { %v5085_v35 = vpop.eup %5084  ;;  %5094 = vtanh.f32 %v5083_v31  ;;  %4100 = vmatprep.mubr.msk.f32.mxu0 %vm5405_vm0, %v5406_v6 }
 0x2d6   : > { %5096 = vtanh.f32 %v1584_v15 }
 0x2d7   : > { %4151 = vmatmul.mubr.f32.gmra.mrb[194].mxu1 %v5085_v35  ;;  %v5087_v22 = vpop.eup %5086  ;;  %v1588_v24 = vpop.f32.mrb[78].mxu0 }
 0x2d8   : > { %4153 = vmatprep.mubr.msk.f32.mxu1 %vm5405_vm0, %v5406_v6  ;;  %v5089_v37 = vpop.eup %5088  ;;  %v1589_v28 = vadd.f32 %v6442_v41, %v1588_v24  ;;  %v3943_v38 = vpop.f32.mrb[79].mxu0  ;;  %4101 = vmatmul.mubr.f32.gmra.mrb[184].mxu0 %v5087_v22  ;;  %v3069_v22 = vld [vmem:[%s7073_s2 + $0x1f0] sm:$0xff]  ;;  %v3070_v24 = vld [vmem:[%s7073_s2 + $0x1f8] sm:$0xff] }
 0x2d9   : > { %4103 = vmatprep.mubr.msk.f32.mxu0 %vm5405_vm0, %v5406_v6 }
 0x2da   : > { %5098 = vtanh.f32 %v1589_v28  ;;  %v4654_v28 = vpack.c.bf16 %v3070_v24, %v3069_v22 }
 0x2db   : > { %4154 = vmatmul.mubr.f32.gmra.mrb[196].mxu1 %v5089_v37  ;;  %v5091_v34 = vpop.eup %5090  ;;  %v1593_v40 = vpop.f32.mrb[80].mxu0 }
 0x2dc   : > { %4156 = vmatprep.mubr.msk.f32.mxu1 %vm5405_vm0, %v5406_v6  ;;  %v5093_v52 = vpop.eup %5092  ;;  %v1594_v42 = vadd.f32 %v6442_v41, %v1593_v40  ;;  %v3946_v33 = vpop.f32.mrb[81].mxu0  ;;  %4104 = vmatmul.mubr.f32.gmra.mrb[186].mxu0 %v5091_v34 }
 0x2dd   : > { %4106 = vmatprep.mubr.msk.f32.mxu0 %vm5405_vm0, %v5406_v6  ;;  %4655 = vmatpush3.bf16.msra.mxu0 %v4654_v28 }
 0x2de   : > { %5100 = vtanh.f32 %v1594_v42 }
 0x2df   : > { %4157 = vmatmul.mubr.f32.gmra.mrb[198].mxu1 %v5093_v52  ;;  %v5095_v43 = vpop.eup %5094  ;;  %v1598_v46 = vpop.f32.mrb[82].mxu0 }
 0x2e0   : > { %4159 = vmatprep.mubr.msk.f32.mxu1 %vm5405_vm0, %v5406_v6  ;;  %v5097_v59 = vpop.eup %5096  ;;  %v1599_v48 = vadd.f32 %v6442_v41, %v1598_v46  ;;  %v3949_v51 = vpop.f32.mrb[83].mxu0  ;;  %4107 = vmatmul.mubr.f32.gmra.mrb[188].mxu0 %v5095_v43 }
 0x2e1   : > { %4362 = vmatprep.mubr.msk.f32.mxu0 %vm5405_vm0, %v5406_v6 }
 0x2e2   : > { %5102 = vtanh.f32 %v1599_v48 }
 0x2e3   : > { %4160 = vmatmul.mubr.f32.gmra.mrb[200].mxu1 %v5097_v59  ;;  %v1603_v2 = vpop.f32.mrb[84].mxu0 }
 0x2e4   : > { %4162 = vmatprep.mubr.msk.f32.mxu1 %vm5405_vm0, %v5406_v6  ;;  %v5099_v39 = vpop.eup %5098  ;;  %v1604_v50 = vadd.f32 %v6442_v41, %v1603_v2  ;;  %v3952_v53 = vpop.f32.mrb[85].mxu0 }
 0x2e6   : > { %5104 = vtanh.f32 %v1604_v50 }
 0x2e7   : > { %4163 = vmatmul.mubr.f32.gmra.mrb[202].mxu1 %v5099_v39  ;;  %v1608_v54 = vpop.f32.mrb[86].mxu0 }
 0x2e8   : > { %4165 = vmatprep.mubr.msk.f32.mxu1 %vm5405_vm0, %v5406_v6  ;;  %v5101_v11 = vpop.eup %5100  ;;  %v1609_v58 = vadd.f32 %v6442_v41, %v1608_v54  ;;  %v3955_v60 = vpop.f32.mrb[87].mxu0 }
 0x2ea   : > { %5106 = vtanh.f32 %v1609_v58 }
 0x2eb   : > { %4166 = vmatmul.mubr.f32.gmra.mrb[204].mxu1 %v5101_v11  ;;  %v1613_v61 = vpop.f32.mrb[88].mxu0 }
 0x2ec   : > { %4168 = vmatprep.mubr.msk.f32.mxu1 %vm5405_vm0, %v5406_v6  ;;  %v5103_v32 = vpop.eup %5102  ;;  %v1614_v29 = vadd.f32 %v6442_v41, %v1613_v61  ;;  %v3958_v62 = vpop.f32.mrb[89].mxu0 }
 0x2ee   : > { %5108 = vtanh.f32 %v1614_v29 }
 0x2ef   : > { %4169 = vmatmul.mubr.f32.gmra.mrb[206].mxu1 %v5103_v32  ;;  %v1618_v45 = vpop.f32.mrb[90].mxu0 }
 0x2f0   : > { %4171 = vmatprep.mubr.msk.f32.mxu1 %vm5405_vm0, %v5406_v6  ;;  %v5105_v5 = vpop.eup %5104  ;;  %v1619_v8 = vadd.f32 %v6442_v41, %v1618_v45  ;;  %v3961_v9 = vpop.f32.mrb[91].mxu0 }
 0x2f2   : > { %5110 = vtanh.f32 %v1619_v8 }
 0x2f3   : > { %4172 = vmatmul.mubr.f32.gmra.mrb[208].mxu1 %v5105_v5  ;;  %v1623_v1 = vpop.f32.mrb[92].mxu0 }
 0x2f4   : > { %4174 = vmatprep.mubr.msk.f32.mxu1 %vm5405_vm0, %v5406_v6  ;;  %v5107_v10 = vpop.eup %5106  ;;  %v1624_v14 = vadd.f32 %v6442_v41, %v1623_v1  ;;  %v3964_v12 = vpop.f32.mrb[93].mxu0 }
 0x2f6   : > { %5112 = vtanh.f32 %v1624_v14 }
 0x2f7   : > { %4175 = vmatmul.mubr.f32.gmra.mrb[210].mxu1 %v5107_v10  ;;  %v1628_v16 = vpop.f32.mrb[94].mxu0 }
 0x2f8   : > { %4177 = vmatprep.mubr.msk.f32.mxu1 %vm5405_vm0, %v5406_v6  ;;  %v5109_v17 = vpop.eup %5108  ;;  %v1629_v19 = vadd.f32 %v6442_v41, %v1628_v16  ;;  %v3967_v44 = vpop.f32.mrb[95].mxu0 }
 0x2fa   : > { %5114 = vtanh.f32 %v1629_v19 }
 0x2fb   : > { %4178 = vmatmul.mubr.f32.gmra.mrb[212].mxu1 %v5109_v17  ;;  %v1633_v3 = vpop.f32.mrb[96].mxu0 }
 0x2fc   : > { %4180 = vmatprep.mubr.msk.f32.mxu1 %vm5405_vm0, %v5406_v6  ;;  %v5111_v18 = vpop.eup %5110  ;;  %v1634_v21 = vadd.f32 %v6442_v41, %v1633_v3  ;;  %v3970_v49 = vpop.f32.mrb[97].mxu0 }
 0x2fe   : > { %5116 = vtanh.f32 %v1634_v21 }
 0x2ff   : > { %4181 = vmatmul.mubr.f32.gmra.mrb[214].mxu1 %v5111_v18  ;;  %v1638_v47 = vpop.f32.mrb[98].mxu0 }
 0x300   : > { %4183 = vmatprep.mubr.msk.f32.mxu1 %vm5405_vm0, %v5406_v6  ;;  %v5113_v57 = vpop.eup %5112  ;;  %v1639_v20 = vadd.f32 %v6442_v41, %v1638_v47  ;;  %v3973_v55 = vpop.f32.mrb[99].mxu0 }
 0x302   : > { %5118 = vtanh.f32 %v1639_v20 }
 0x303   : > { %4184 = vmatmul.mubr.f32.gmra.mrb[216].mxu1 %v5113_v57  ;;  %v1643_v23 = vpop.f32.mrb[100].mxu0 }
 0x304   : > { %4186 = vmatprep.mubr.msk.f32.mxu1 %vm5405_vm0, %v5406_v6  ;;  %v5115_v25 = vpop.eup %5114  ;;  %v1644_v63 = vadd.f32 %v6442_v41, %v1643_v23  ;;  %v3976_v26 = vpop.f32.mrb[101].mxu0 }
 0x306   : > { %5120 = vtanh.f32 %v1644_v63 }
 0x307   : > { %4187 = vmatmul.mubr.f32.gmra.mrb[218].mxu1 %v5115_v25  ;;  %v1648_v27 = vpop.f32.mrb[102].mxu0 }
 0x308   : > { %4189 = vmatprep.mubr.msk.f32.mxu1 %vm5405_vm0, %v5406_v6  ;;  %v5117_v4 = vpop.eup %5116  ;;  %v1649_v7 = vadd.f32 %v6442_v41, %v1648_v27  ;;  %v3979_v30 = vpop.f32.mrb[103].mxu0 }
 0x30a   : > { %5122 = vtanh.f32 %v1649_v7 }
 0x30b   : > { %4190 = vmatmul.mubr.f32.gmra.mrb[220].mxu1 %v5117_v4  ;;  %v1653_v31 = vpop.f32.mrb[104].mxu0 }
 0x30c   : > { %4192 = vmatprep.mubr.msk.f32.mxu1 %vm5405_vm0, %v5406_v6  ;;  %v5119_v15 = vpop.eup %5118  ;;  %v1654_v13 = vadd.f32 %v6442_v41, %v1653_v31  ;;  %v3982_v35 = vpop.f32.mrb[105].mxu0 }
 0x30e   : > { %5124 = vtanh.f32 %v1654_v13 }
 0x30f   : > { %4193 = vmatmul.mubr.f32.gmra.mrb[222].mxu1 %v5119_v15  ;;  %v1658_v37 = vpop.f32.mrb[106].mxu0 }
 0x310   : > { %4195 = vmatprep.mubr.msk.f32.mxu1 %vm5405_vm0, %v5406_v6  ;;  %v5121_v38 = vpop.eup %5120  ;;  %v1659_v34 = vadd.f32 %v6442_v41, %v1658_v37  ;;  %v3985_v40 = vpop.f32.mrb[107].mxu0 }
 0x312   : > { %5126 = vtanh.f32 %v1659_v34 }
 0x313   : > { %4196 = vmatmul.mubr.f32.gmra.mrb[224].mxu1 %v5121_v38  ;;  %v1663_v52 = vpop.f32.mrb[108].mxu0 }
 0x314   : > { %4198 = vmatprep.mubr.msk.f32.mxu1 %vm5405_vm0, %v5406_v6  ;;  %v5123_v42 = vpop.eup %5122  ;;  %v1664_v33 = vadd.f32 %v6442_v41, %v1663_v52  ;;  %v3988_v43 = vpop.f32.mrb[109].mxu0 }
 0x316   : > { %5128 = vtanh.f32 %v1664_v33 }
 0x317   : > { %4199 = vmatmul.mubr.f32.gmra.mrb[226].mxu1 %v5123_v42  ;;  %v1668_v46 = vpop.f32.mrb[110].mxu0 }
 0x318   : > { %4201 = vmatprep.mubr.msk.f32.mxu1 %vm5405_vm0, %v5406_v6  ;;  %v5125_v59 = vpop.eup %5124  ;;  %v1669_v48 = vadd.f32 %v6442_v41, %v1668_v46  ;;  %v3991_v51 = vpop.f32.mrb[111].mxu0 }
 0x31a   : > { %5130 = vtanh.f32 %v1669_v48 }
 0x31b   : > { %4202 = vmatmul.mubr.f32.gmra.mrb[228].mxu1 %v5125_v59  ;;  %v1673_v2 = vpop.f32.mrb[112].mxu0 }
 0x31c   : > { %4204 = vmatprep.mubr.msk.f32.mxu1 %vm5405_vm0, %v5406_v6  ;;  %v5127_v39 = vpop.eup %5126  ;;  %v1674_v50 = vadd.f32 %v6442_v41, %v1673_v2  ;;  %v3994_v53 = vpop.f32.mrb[113].mxu0 }
 0x31e   : > { %5132 = vtanh.f32 %v1674_v50 }
 0x31f   : > { %4205 = vmatmul.mubr.f32.gmra.mrb[230].mxu1 %v5127_v39  ;;  %v1678_v54 = vpop.f32.mrb[114].mxu0 }
 0x320   : > { %4207 = vmatprep.mubr.msk.f32.mxu1 %vm5405_vm0, %v5406_v6  ;;  %v5129_v11 = vpop.eup %5128  ;;  %v1679_v58 = vadd.f32 %v6442_v41, %v1678_v54  ;;  %v3997_v60 = vpop.f32.mrb[115].mxu0 }
 0x322   : > { %5134 = vtanh.f32 %v1679_v58 }
 0x323   : > { %4208 = vmatmul.mubr.f32.gmra.mrb[232].mxu1 %v5129_v11  ;;  %v1683_v61 = vpop.f32.mrb[116].mxu0 }
 0x324   : > { %4210 = vmatprep.mubr.msk.f32.mxu1 %vm5405_vm0, %v5406_v6  ;;  %v5131_v32 = vpop.eup %5130  ;;  %v1684_v29 = vadd.f32 %v6442_v41, %v1683_v61  ;;  %v4000_v62 = vpop.f32.mrb[117].mxu0 }
 0x326   : > { %5136 = vtanh.f32 %v1684_v29 }
 0x327   : > { %4211 = vmatmul.mubr.f32.gmra.mrb[234].mxu1 %v5131_v32  ;;  %v1688_v36 = vpop.f32.mrb[118].mxu0 }
 0x328   : > { %4213 = vmatprep.mubr.msk.f32.mxu1 %vm5405_vm0, %v5406_v6  ;;  %v5133_v0 = vpop.eup %5132  ;;  %v1689_v45 = vadd.f32 %v6442_v41, %v1688_v36  ;;  %v4003_v56 = vpop.f32.mrb[119].mxu0 }
 0x32a   : > { %5138 = vtanh.f32 %v1689_v45 }
 0x32b   : > { %4214 = vmatmul.mubr.f32.gmra.mrb[236].mxu1 %v5133_v0  ;;  %v1693_v5 = vpop.f32.mrb[120].mxu0 }
 0x32c   : > { %4216 = vmatprep.mubr.msk.f32.mxu1 %vm5405_vm0, %v5406_v6  ;;  %v5135_v8 = vpop.eup %5134  ;;  %v1694_v9 = vadd.f32 %v6442_v41, %v1693_v5  ;;  %v4006_v1 = vpop.f32.mrb[121].mxu0 }
 0x32e   : > { %5140 = vtanh.f32 %v1694_v9 }
 0x32f   : > { %4217 = vmatmul.mubr.f32.gmra.mrb[238].mxu1 %v5135_v8  ;;  %v1698_v10 = vpop.f32.mrb[122].mxu0 }
 0x330   : > { %4219 = vmatprep.mubr.msk.f32.mxu1 %vm5405_vm0, %v5406_v6  ;;  %v5137_v14 = vpop.eup %5136  ;;  %v1699_v12 = vadd.f32 %v6442_v41, %v1698_v10  ;;  %v4009_v16 = vpop.f32.mrb[123].mxu0 }
 0x332   : > { %5142 = vtanh.f32 %v1699_v12 }
 0x333   : > { %4220 = vmatmul.mubr.f32.gmra.mrb[240].mxu1 %v5137_v14  ;;  %v1703_v17 = vpop.f32.mrb[124].mxu0 }
 0x334   : > { %4222 = vmatprep.mubr.msk.f32.mxu1 %vm5405_vm0, %v5406_v6  ;;  %v5139_v19 = vpop.eup %5138  ;;  %v1704_v44 = vadd.f32 %v6442_v41, %v1703_v17  ;;  %v4012_v3 = vpop.f32.mrb[125].mxu0 }
 0x336   : > { %5144 = vtanh.f32 %v1704_v44 }
 0x337   : > { %4223 = vmatmul.mubr.f32.gmra.mrb[242].mxu1 %v5139_v19  ;;  %v1708_v18 = vpop.f32.mrb[126].mxu0 }
 0x338   : > { %4225 = vmatprep.mubr.msk.f32.mxu1 %vm5405_vm0, %v5406_v6  ;;  %v5141_v21 = vpop.eup %5140  ;;  %v1709_v49 = vadd.f32 %v6442_v41, %v1708_v18  ;;  %v4015_v47 = vpop.f32.mrb[127].mxu0 }
 0x33a   : > { %5146 = vtanh.f32 %v1709_v49 }
 0x33b   : > { %4226 = vmatmul.mubr.f32.gmra.mrb[244].mxu1 %v5141_v21  ;;  %v1713_v57 = vpop.f32.mrb[128].mxu0 }
 0x33c   : > { %4228 = vmatprep.mubr.msk.f32.mxu1 %vm5405_vm0, %v5406_v6  ;;  %v5143_v20 = vpop.eup %5142  ;;  %v1714_v55 = vadd.f32 %v6442_v41, %v1713_v57  ;;  %v4018_v23 = vpop.f32.mrb[129].mxu0 }
 0x33e   : > { %5148 = vtanh.f32 %v1714_v55 }
 0x33f   : > { %4229 = vmatmul.mubr.f32.gmra.mrb[246].mxu1 %v5143_v20  ;;  %v1718_v25 = vpop.f32.mrb[130].mxu0 }
 0x340   : > { %4231 = vmatprep.mubr.msk.f32.mxu1 %vm5405_vm0, %v5406_v6  ;;  %v5145_v63 = vpop.eup %5144  ;;  %v1719_v26 = vadd.f32 %v6442_v41, %v1718_v25  ;;  %v4021_v27 = vpop.f32.mrb[131].mxu0 }
 0x342   : > { %5150 = vtanh.f32 %v1719_v26 }
 0x343   : > { %4232 = vmatmul.mubr.f32.gmra.mrb[248].mxu1 %v5145_v63  ;;  %v1723_v4 = vpop.f32.mrb[132].mxu0 }
 0x344   : > { %4234 = vmatprep.mubr.msk.f32.mxu1 %vm5405_vm0, %v5406_v6  ;;  %v5147_v7 = vpop.eup %5146  ;;  %v1724_v30 = vadd.f32 %v6442_v41, %v1723_v4  ;;  %v4024_v31 = vpop.f32.mrb[133].mxu0 }
 0x346   : > { %5152 = vtanh.f32 %v1724_v30 }
 0x347   : > { %4235 = vmatmul.mubr.f32.gmra.mrb[250].mxu1 %v5147_v7  ;;  %v1728_v15 = vpop.f32.mrb[134].mxu0 }
 0x348   : > { %4237 = vmatprep.mubr.msk.f32.mxu1 %vm5405_vm0, %v5406_v6  ;;  %v5149_v13 = vpop.eup %5148  ;;  %v1729_v35 = vadd.f32 %v6442_v41, %v1728_v15  ;;  %v4027_v22 = vpop.f32.mrb[135].mxu0 }
 0x34a   : > { %5154 = vtanh.f32 %v1729_v35 }
 0x34b   : > { %4238 = vmatmul.mubr.f32.gmra.mrb[252].mxu1 %v5149_v13  ;;  %v1733_v24 = vpop.f32.mrb[136].mxu0 }
 0x34c   : > { %4240 = vmatprep.mubr.msk.f32.mxu1 %vm5405_vm0, %v5406_v6  ;;  %v5151_v37 = vpop.eup %5150  ;;  %v1734_v28 = vadd.f32 %v6442_v41, %v1733_v24  ;;  %v4030_v38 = vpop.f32.mrb[137].mxu0 }
 0x34e   : > { %5156 = vtanh.f32 %v1734_v28 }
 0x34f   : > { %4241 = vmatmul.mubr.f32.gmra.mrb[254].mxu1 %v5151_v37  ;;  %v1738_v34 = vpop.f32.mrb[138].mxu0 }
 0x350   : > { %4243 = vmatprep.mubr.msk.f32.mxu1 %vm5405_vm0, %v5406_v6  ;;  %v5153_v40 = vpop.eup %5152  ;;  %v1739_v52 = vadd.f32 %v6442_v41, %v1738_v34  ;;  %v4033_v42 = vpop.f32.mrb[139].mxu0 }
 0x352   : > { %5158 = vtanh.f32 %v1739_v52 }
 0x353   : > { %4244 = vmatmul.mubr.f32.gmra.mrb[0].mxu1 %v5153_v40  ;;  %v1743_v33 = vpop.f32.mrb[140].mxu0 }
 0x354   : > { %4246 = vmatprep.mubr.msk.f32.mxu1 %vm5405_vm0, %v5406_v6  ;;  %v5155_v43 = vpop.eup %5154  ;;  %v1744_v46 = vadd.f32 %v6442_v41, %v1743_v33  ;;  %v4036_v59 = vpop.f32.mrb[141].mxu0 }
 0x356   : > { %5160 = vtanh.f32 %v1744_v46 }
 0x357   : > { %4247 = vmatmul.mubr.f32.gmra.mrb[2].mxu1 %v5155_v43  ;;  %v1748_v48 = vpop.f32.mrb[142].mxu0 }
 0x358   : > { %4249 = vmatprep.mubr.msk.f32.mxu1 %vm5405_vm0, %v5406_v6  ;;  %v5157_v51 = vpop.eup %5156  ;;  %v1749_v2 = vadd.f32 %v6442_v41, %v1748_v48  ;;  %v4039_v39 = vpop.f32.mrb[143].mxu0 }
 0x35a   : > { %5162 = vtanh.f32 %v1749_v2 }
 0x35b   : > { %4250 = vmatmul.mubr.f32.gmra.mrb[4].mxu1 %v5157_v51  ;;  %v1753_v50 = vpop.f32.mrb[144].mxu0 }
 0x35c   : > { %4252 = vmatprep.mubr.msk.f32.mxu1 %vm5405_vm0, %v5406_v6  ;;  %v5159_v53 = vpop.eup %5158  ;;  %v1754_v54 = vadd.f32 %v6442_v41, %v1753_v50  ;;  %v4042_v11 = vpop.f32.mrb[145].mxu0 }
 0x35d   : > { %v6653_v11 = vld [vmem:[%s7074_s3 + $0x3] ss:$0 sm:$0xff] }
 0x35e   : > { %5164 = vtanh.f32 %v1754_v54 }
 0x35f   : > { %4253 = vmatmul.mubr.f32.gmra.mrb[6].mxu1 %v5159_v53  ;;  %v1758_v58 = vpop.f32.mrb[146].mxu0 }
 0x360   : > { %4255 = vmatprep.mubr.msk.f32.mxu1 %vm5405_vm0, %v5406_v6  ;;  %v5161_v60 = vpop.eup %5160  ;;  %v1759_v61 = vadd.f32 %v6442_v41, %v1758_v58  ;;  %v4045_v32 = vpop.f32.mrb[147].mxu0 }
 0x362   : > { %5166 = vtanh.f32 %v1759_v61 }
 0x363   : > { %4256 = vmatmul.mubr.f32.gmra.mrb[8].mxu1 %v5161_v60  ;;  %v1763_v29 = vpop.f32.mrb[148].mxu0 }
 0x364   : > { %4258 = vmatprep.mubr.msk.f32.mxu1 %vm5405_vm0, %v5406_v6  ;;  %v5163_v62 = vpop.eup %5162  ;;  %v1764_v36 = vadd.f32 %v6442_v41, %v1763_v29  ;;  %v4048_v0 = vpop.f32.mrb[149].mxu0 }
 0x366   : > { %5168 = vtanh.f32 %v1764_v36 }
 0x367   : > { %4259 = vmatmul.mubr.f32.gmra.mrb[10].mxu1 %v5163_v62  ;;  %v1768_v45 = vpop.f32.mrb[150].mxu0 }
 0x368   : > { %4261 = vmatprep.mubr.msk.f32.mxu1 %vm5405_vm0, %v5406_v6  ;;  %v5165_v56 = vpop.eup %5164  ;;  %v1769_v5 = vadd.f32 %v6442_v41, %v1768_v45  ;;  %v4051_v8 = vpop.f32.mrb[151].mxu0 }
 0x36a   : > { %5170 = vtanh.f32 %v1769_v5 }
 0x36b   : > { %4262 = vmatmul.mubr.f32.gmra.mrb[12].mxu1 %v5165_v56  ;;  %v1773_v9 = vpop.f32.mrb[152].mxu0 }
 0x36c   : > { %4264 = vmatprep.mubr.msk.f32.mxu1 %vm5405_vm0, %v5406_v6  ;;  %v5167_v1 = vpop.eup %5166  ;;  %v1774_v10 = vadd.f32 %v6442_v41, %v1773_v9  ;;  %v4054_v14 = vpop.f32.mrb[153].mxu0 }
 0x36e   : > { %5172 = vtanh.f32 %v1774_v10 }
 0x36f   : > { %4265 = vmatmul.mubr.f32.gmra.mrb[14].mxu1 %v5167_v1  ;;  %v1778_v12 = vpop.f32.mrb[154].mxu0 }
 0x370   : > { %4267 = vmatprep.mubr.msk.f32.mxu1 %vm5405_vm0, %v5406_v6  ;;  %v5169_v16 = vpop.eup %5168  ;;  %v1779_v17 = vadd.f32 %v6442_v41, %v1778_v12  ;;  %v4057_v19 = vpop.f32.mrb[155].mxu0 }
 0x372   : > { %5174 = vtanh.f32 %v1779_v17 }
 0x373   : > { %4268 = vmatmul.mubr.f32.gmra.mrb[16].mxu1 %v5169_v16  ;;  %v1783_v44 = vpop.f32.mrb[156].mxu0 }
 0x374   : > { %4270 = vmatprep.mubr.msk.f32.mxu1 %vm5405_vm0, %v5406_v6  ;;  %v5171_v3 = vpop.eup %5170  ;;  %v1784_v18 = vadd.f32 %v6442_v41, %v1783_v44  ;;  %v4060_v21 = vpop.f32.mrb[157].mxu0 }
 0x376   : > { %5176 = vtanh.f32 %v1784_v18 }
 0x377   : > { %4271 = vmatmul.mubr.f32.gmra.mrb[18].mxu1 %v5171_v3  ;;  %v1788_v49 = vpop.f32.mrb[158].mxu0 }
 0x378   : > { %4273 = vmatprep.mubr.msk.f32.mxu1 %vm5405_vm0, %v5406_v6  ;;  %v5173_v47 = vpop.eup %5172  ;;  %v1789_v57 = vadd.f32 %v6442_v41, %v1788_v49  ;;  %v4063_v20 = vpop.f32.mrb[159].mxu0 }
 0x37a   : > { %5178 = vtanh.f32 %v1789_v57 }
 0x37b   : > { %4274 = vmatmul.mubr.f32.gmra.mrb[20].mxu1 %v5173_v47  ;;  %v1793_v55 = vpop.f32.mrb[160].mxu0 }
 0x37c   : > { %4276 = vmatprep.mubr.msk.f32.mxu1 %vm5405_vm0, %v5406_v6  ;;  %v5175_v23 = vpop.eup %5174  ;;  %v1794_v25 = vadd.f32 %v6442_v41, %v1793_v55  ;;  %v4066_v63 = vpop.f32.mrb[161].mxu0 }
 0x37e   : > { %5180 = vtanh.f32 %v1794_v25 }
 0x37f   : > { %4277 = vmatmul.mubr.f32.gmra.mrb[22].mxu1 %v5175_v23  ;;  %v1798_v26 = vpop.f32.mrb[162].mxu0 }
 0x380   : > { %4279 = vmatprep.mubr.msk.f32.mxu1 %vm5405_vm0, %v5406_v6  ;;  %v5177_v27 = vpop.eup %5176  ;;  %v1799_v4 = vadd.f32 %v6442_v41, %v1798_v26  ;;  %v4069_v7 = vpop.f32.mrb[163].mxu0 }
 0x382   : > { %5182 = vtanh.f32 %v1799_v4 }
 0x383   : > { %4280 = vmatmul.mubr.f32.gmra.mrb[24].mxu1 %v5177_v27  ;;  %v1803_v30 = vpop.f32.mrb[164].mxu0 }
 0x384   : > { %4282 = vmatprep.mubr.msk.f32.mxu1 %vm5405_vm0, %v5406_v6  ;;  %v5179_v31 = vpop.eup %5178  ;;  %v1804_v15 = vadd.f32 %v6442_v41, %v1803_v30  ;;  %v4072_v13 = vpop.f32.mrb[165].mxu0 }
 0x386   : > { %5184 = vtanh.f32 %v1804_v15 }
 0x387   : > { %4283 = vmatmul.mubr.f32.gmra.mrb[26].mxu1 %v5179_v31  ;;  %v1808_v35 = vpop.f32.mrb[166].mxu0 }
 0x388   : > { %4285 = vmatprep.mubr.msk.f32.mxu1 %vm5405_vm0, %v5406_v6  ;;  %v5181_v22 = vpop.eup %5180  ;;  %v1809_v24 = vadd.f32 %v6442_v41, %v1808_v35  ;;  %v4075_v37 = vpop.f32.mrb[167].mxu0 }
 0x38a   : > { %5186 = vtanh.f32 %v1809_v24 }
 0x38b   : > { %4286 = vmatmul.mubr.f32.gmra.mrb[28].mxu1 %v5181_v22  ;;  %v1813_v28 = vpop.f32.mrb[168].mxu0 }
 0x38c   : > { %4288 = vmatprep.mubr.msk.f32.mxu1 %vm5405_vm0, %v5406_v6  ;;  %v5183_v38 = vpop.eup %5182  ;;  %v1814_v34 = vadd.f32 %v6442_v41, %v1813_v28  ;;  %v4078_v40 = vpop.f32.mrb[169].mxu0 }
 0x38e   : > { %5188 = vtanh.f32 %v1814_v34 }
 0x38f   : > { %4289 = vmatmul.mubr.f32.gmra.mrb[30].mxu1 %v5183_v38  ;;  %v1818_v52 = vpop.f32.mrb[170].mxu0 }
 0x390   : > { %4291 = vmatprep.mubr.msk.f32.mxu1 %vm5405_vm0, %v5406_v6  ;;  %v5185_v42 = vpop.eup %5184  ;;  %v1819_v33 = vadd.f32 %v6442_v41, %v1818_v52  ;;  %v4081_v43 = vpop.f32.mrb[171].mxu0 }
 0x392   : > { %5190 = vtanh.f32 %v1819_v33 }
 0x393   : > { %4292 = vmatmul.mubr.f32.gmra.mrb[32].mxu1 %v5185_v42  ;;  %v1823_v46 = vpop.f32.mrb[172].mxu0 }
 0x394   : > { %4294 = vmatprep.mubr.msk.f32.mxu1 %vm5405_vm0, %v5406_v6  ;;  %v5187_v59 = vpop.eup %5186  ;;  %v1824_v48 = vadd.f32 %v6442_v41, %v1823_v46  ;;  %v4084_v51 = vpop.f32.mrb[173].mxu0 }
 0x396   : > { %5192 = vtanh.f32 %v1824_v48 }
 0x397   : > { %4295 = vmatmul.mubr.f32.gmra.mrb[34].mxu1 %v5187_v59  ;;  %v1828_v2 = vpop.f32.mrb[174].mxu0 }
 0x398   : > { %4297 = vmatprep.mubr.msk.f32.mxu1 %vm5405_vm0, %v5406_v6  ;;  %v5189_v39 = vpop.eup %5188  ;;  %v1829_v50 = vadd.f32 %v6442_v41, %v1828_v2  ;;  %v4087_v53 = vpop.f32.mrb[175].mxu0 }
 0x39a   : > { %5194 = vtanh.f32 %v1829_v50 }
 0x39b   : > { %4298 = vmatmul.mubr.f32.gmra.mrb[36].mxu1 %v5189_v39  ;;  %v1833_v54 = vpop.f32.mrb[176].mxu0 }
 0x39c   : > { %4300 = vmatprep.mubr.msk.f32.mxu1 %vm5405_vm0, %v5406_v6  ;;  %v5191_v58 = vpop.eup %5190  ;;  %v1834_v60 = vadd.f32 %v6442_v41, %v1833_v54  ;;  %v4090_v61 = vpop.f32.mrb[177].mxu0 }
 0x39e   : > { %v2021_v32 = vpop.f32.mrb[188].mxu1  ;;  %5196 = vtanh.f32 %v1834_v60 }
 0x39f   : > { %v2022_v29 = vadd.f32 %v6653_v11, %v2021_v32  ;;  %v4143_v62 = vpop.f32.mrb[189].mxu1  ;;  %4301 = vmatmul.mubr.f32.gmra.mrb[38].mxu1 %v5191_v58  ;;  %v1838_v36 = vpop.f32.mrb[178].mxu0 }
 0x3a0   : > { %4303 = vmatprep.mubr.msk.f32.mxu1 %vm5405_vm0, %v5406_v6  ;;  %v5193_v0 = vpop.eup %5192  ;;  %v1839_v45 = vadd.f32 %v6442_v41, %v1838_v36  ;;  %v4093_v56 = vpop.f32.mrb[179].mxu0 }
 0x3a1   : > { %5198 = vtanh.f32 %v2022_v29 }
 0x3a2   : > { %v2026_v5 = vpop.f32.mrb[190].mxu1  ;;  %5200 = vtanh.f32 %v1839_v45 }
 0x3a3   : > { %v2027_v8 = vadd.f32 %v6653_v11, %v2026_v5  ;;  %v4146_v9 = vpop.f32.mrb[191].mxu1  ;;  %4304 = vmatmul.mubr.f32.gmra.mrb[40].mxu1 %v5193_v0  ;;  %v1843_v1 = vpop.f32.mrb[180].mxu0 }
 0x3a4   : > { %4306 = vmatprep.mubr.msk.f32.mxu1 %vm5405_vm0, %v5406_v6  ;;  %v5195_v10 = vpop.eup %5194  ;;  %v1844_v14 = vadd.f32 %v6442_v41, %v1843_v1  ;;  %v4096_v12 = vpop.f32.mrb[181].mxu0 }
 0x3a5   : > { %5202 = vtanh.f32 %v2027_v8 }
 0x3a6   : > { %v2031_v16 = vpop.f32.mrb[192].mxu1  ;;  %5204 = vtanh.f32 %v1844_v14 }
 0x3a7   : > { %v2032_v17 = vadd.f32 %v6653_v11, %v2031_v16  ;;  %v4149_v19 = vpop.f32.mrb[193].mxu1  ;;  %4307 = vmatmul.mubr.f32.gmra.mrb[42].mxu1 %v5195_v10  ;;  %v1848_v44 = vpop.f32.mrb[182].mxu0 }
 0x3a8   : > { %4309 = vmatprep.mubr.msk.f32.mxu1 %vm5405_vm0, %v5406_v6  ;;  %v5197_v3 = vpop.eup %5196  ;;  %v1849_v18 = vadd.f32 %v6442_v41, %v1848_v44  ;;  %v4099_v21 = vpop.f32.mrb[183].mxu0 }
 0x3a9   : > { %5206 = vtanh.f32 %v2032_v17 }
 0x3aa   : > { %v2036_v49 = vpop.f32.mrb[194].mxu1  ;;  %5208 = vtanh.f32 %v1849_v18 }
 0x3ab   : > { %v5199_v47 = vpop.eup %5198  ;;  %v2037_v57 = vadd.f32 %v6653_v11, %v2036_v49  ;;  %v4152_v20 = vpop.f32.mrb[195].mxu1  ;;  %4310 = vmatmul.mubr.f32.gmra.mrb[44].mxu1 %v5197_v3 }
 0x3ac   : > { %4363 = vmatmul.mubr.f32.vlgmr.msra.gmra.mrb[190].mxu0 %v5199_v47  ;;  %v1853_v55 = vpop.f32.mrb[184].mxu0  ;;  %4312 = vmatprep.mubr.msk.f32.mxu1 %vm5405_vm0, %v5406_v6  ;;  %v5201_v23 = vpop.eup %5200 }
 0x3ad   : > { %5210 = vtanh.f32 %v2037_v57  ;;  %v1854_v25 = vadd.f32 %v6442_v41, %v1853_v55  ;;  %v4102_v63 = vpop.f32.mrb[185].mxu0  ;;  %4365 = vmatprep.mubr.msk.f32.mxu0 %vm5405_vm0, %v5406_v6  ;;  %v5338_v41 = vld [vmem:[%s7074_s3 + $0x2] ss:$0 sm:$0xff] }
 0x3ae   : > { %v2041_v26 = vpop.f32.mrb[196].mxu1 }
 0x3af   : > { %v5203_v27 = vpop.eup %5202  ;;  %5212 = vtanh.f32 %v1854_v25  ;;  %v2042_v4 = vadd.f32 %v6653_v11, %v2041_v26  ;;  %v4155_v7 = vpop.f32.mrb[197].mxu1  ;;  %4313 = vmatmul.mubr.f32.gmra.mrb[46].mxu1 %v5201_v23 }
 0x3b0   : > { %4366 = vmatmul.mubr.f32.gmra.mrb[192].mxu0 %v5203_v27  ;;  %v1858_v30 = vpop.f32.mrb[186].mxu0  ;;  %4315 = vmatprep.mubr.msk.f32.mxu1 %vm5405_vm0, %v5406_v6  ;;  %v5205_v31 = vpop.eup %5204 }
 0x3b1   : > { %5214 = vtanh.f32 %v2042_v4  ;;  %v1859_v15 = vadd.f32 %v5338_v41, %v1858_v30  ;;  %v4105_v13 = vpop.f32.mrb[187].mxu0  ;;  %4368 = vmatprep.mubr.msk.f32.mxu0 %vm5405_vm0, %v5406_v6 }
 0x3b2   : > { %v2046_v35 = vpop.f32.mrb[198].mxu1 }
 0x3b3   : > { %v5207_v22 = vpop.eup %5206  ;;  %5216 = vtanh.f32 %v1859_v15  ;;  %v2047_v24 = vadd.f32 %v6653_v11, %v2046_v35  ;;  %v4158_v37 = vpop.f32.mrb[199].mxu1  ;;  %4316 = vmatmul.mubr.f32.gmra.mrb[48].mxu1 %v5205_v31 }
 0x3b4   : > { %4369 = vmatmul.mubr.f32.gmra.mrb[194].mxu0 %v5207_v22  ;;  %v1863_v28 = vpop.f32.mrb[188].mxu0  ;;  %4318 = vmatprep.mubr.msk.f32.mxu1 %vm5405_vm0, %v5406_v6  ;;  %v5209_v38 = vpop.eup %5208 }
 0x3b5   : > { %5218 = vtanh.f32 %v2047_v24  ;;  %v1864_v34 = vadd.f32 %v5338_v41, %v1863_v28  ;;  %v4108_v40 = vpop.f32.mrb[189].mxu0  ;;  %4371 = vmatprep.mubr.msk.f32.mxu0 %vm5405_vm0, %v5406_v6 }
 0x3b6   : > { %v2051_v52 = vpop.f32.mrb[200].mxu1 }
 0x3b7   : > { %v5211_v42 = vpop.eup %5210  ;;  %5220 = vtanh.f32 %v1864_v34  ;;  %v2052_v33 = vadd.f32 %v6653_v11, %v2051_v52  ;;  %v4161_v43 = vpop.f32.mrb[201].mxu1  ;;  %4319 = vmatmul.mubr.f32.gmra.mrb[50].mxu1 %v5209_v38 }
 0x3b8   : > { %4372 = vmatmul.mubr.f32.gmra.mrb[196].mxu0 %v5211_v42  ;;  %4321 = vmatprep.mubr.msk.f32.mxu1 %vm5405_vm0, %v5406_v6 }
 0x3b9   : > { %v5213_v46 = vpop.eup %5212  ;;  %5222 = vtanh.f32 %v2052_v33  ;;  %4374 = vmatprep.mubr.msk.f32.mxu0 %vm5405_vm0, %v5406_v6 }
 0x3ba   : > { %v2056_v59 = vpop.f32.mrb[202].mxu1 }
 0x3bb   : > { %v5215_v48 = vpop.eup %5214  ;;  %v2057_v51 = vadd.f32 %v6653_v11, %v2056_v59  ;;  %v4164_v2 = vpop.f32.mrb[203].mxu1  ;;  %4322 = vmatmul.mubr.f32.gmra.mrb[52].mxu1 %v5213_v46 }
 0x3bc   : > { %4375 = vmatmul.mubr.f32.gmra.mrb[198].mxu0 %v5215_v48  ;;  %4324 = vmatprep.mubr.msk.f32.mxu1 %vm5405_vm0, %v5406_v6 }
 0x3bd   : > { %v5217_v39 = vpop.eup %5216  ;;  %5224 = vtanh.f32 %v2057_v51  ;;  %4377 = vmatprep.mubr.msk.f32.mxu0 %vm5405_vm0, %v5406_v6 }
 0x3be   : > { %v2061_v50 = vpop.f32.mrb[204].mxu1 }
 0x3bf   : > { %v5219_v53 = vpop.eup %5218  ;;  %v2062_v54 = vadd.f32 %v6653_v11, %v2061_v50  ;;  %v4167_v58 = vpop.f32.mrb[205].mxu1  ;;  %4325 = vmatmul.mubr.f32.gmra.mrb[54].mxu1 %v5217_v39 }
 0x3c0   : > { %4378 = vmatmul.mubr.f32.gmra.mrb[200].mxu0 %v5219_v53  ;;  %4327 = vmatprep.mubr.msk.f32.mxu1 %vm5405_vm0, %v5406_v6 }
 0x3c1   : > { %v5221_v60 = vpop.eup %5220  ;;  %5226 = vtanh.f32 %v2062_v54  ;;  %4380 = vmatprep.mubr.msk.f32.mxu0 %vm5405_vm0, %v5406_v6 }
 0x3c2   : > { %v2066_v61 = vpop.f32.mrb[206].mxu1 }
 0x3c3   : > { %v5223_v32 = vpop.eup %5222  ;;  %v2067_v29 = vadd.f32 %v6653_v11, %v2066_v61  ;;  %v4170_v62 = vpop.f32.mrb[207].mxu1  ;;  %4328 = vmatmul.mubr.f32.gmra.mrb[56].mxu1 %v5221_v60 }
 0x3c4   : > { %4381 = vmatmul.mubr.f32.gmra.mrb[202].mxu0 %v5223_v32 }
 0x3c5   : > { %5228 = vtanh.f32 %v2067_v29  ;;  %4383 = vmatprep.mubr.msk.f32.mxu0 %vm5405_vm0, %v5406_v6 }
 0x3c6   : > { %v2071_v36 = vpop.f32.mrb[208].mxu1 }
 0x3c7   : > { %v5225_v0 = vpop.eup %5224  ;;  %v2072_v45 = vadd.f32 %v6653_v11, %v2071_v36  ;;  %v4173_v56 = vpop.f32.mrb[209].mxu1 }
 0x3c8   : > { %4384 = vmatmul.mubr.f32.gmra.mrb[204].mxu0 %v5225_v0 }
 0x3c9   : > { %5230 = vtanh.f32 %v2072_v45  ;;  %4386 = vmatprep.mubr.msk.f32.mxu0 %vm5405_vm0, %v5406_v6 }
 0x3ca   : > { %v2076_v5 = vpop.f32.mrb[210].mxu1 }
 0x3cb   : > { %v5227_v8 = vpop.eup %5226  ;;  %v2077_v9 = vadd.f32 %v6653_v11, %v2076_v5  ;;  %v4176_v1 = vpop.f32.mrb[211].mxu1 }
 0x3cc   : > { %4387 = vmatmul.mubr.f32.gmra.mrb[206].mxu0 %v5227_v8 }
 0x3cd   : > { %5232 = vtanh.f32 %v2077_v9  ;;  %4389 = vmatprep.mubr.msk.f32.mxu0 %vm5405_vm0, %v5406_v6 }
 0x3ce   : > { %v2081_v10 = vpop.f32.mrb[212].mxu1 }
 0x3cf   : > { %v5229_v14 = vpop.eup %5228  ;;  %v2082_v12 = vadd.f32 %v6653_v11, %v2081_v10  ;;  %v4179_v16 = vpop.f32.mrb[213].mxu1 }
 0x3d0   : > { %4390 = vmatmul.mubr.f32.gmra.mrb[208].mxu0 %v5229_v14 }
 0x3d1   : > { %5234 = vtanh.f32 %v2082_v12  ;;  %4392 = vmatprep.mubr.msk.f32.mxu0 %vm5405_vm0, %v5406_v6 }
 0x3d2   : > { %v2086_v17 = vpop.f32.mrb[214].mxu1 }
 0x3d3   : > { %v5231_v19 = vpop.eup %5230  ;;  %v2087_v44 = vadd.f32 %v6653_v11, %v2086_v17  ;;  %v4182_v3 = vpop.f32.mrb[215].mxu1 }
 0x3d4   : > { %4393 = vmatmul.mubr.f32.gmra.mrb[210].mxu0 %v5231_v19 }
 0x3d5   : > { %5236 = vtanh.f32 %v2087_v44  ;;  %4395 = vmatprep.mubr.msk.f32.mxu0 %vm5405_vm0, %v5406_v6 }
 0x3d6   : > { %v2091_v18 = vpop.f32.mrb[216].mxu1 }
 0x3d7   : > { %v5233_v21 = vpop.eup %5232  ;;  %v2092_v49 = vadd.f32 %v6653_v11, %v2091_v18  ;;  %v4185_v47 = vpop.f32.mrb[217].mxu1 }
 0x3d8   : > { %4396 = vmatmul.mubr.f32.gmra.mrb[212].mxu0 %v5233_v21 }
 0x3d9   : > { %5238 = vtanh.f32 %v2092_v49  ;;  %4398 = vmatprep.mubr.msk.f32.mxu0 %vm5405_vm0, %v5406_v6 }
 0x3da   : > { %v2096_v57 = vpop.f32.mrb[218].mxu1 }
 0x3db   : > { %v5235_v20 = vpop.eup %5234  ;;  %v2097_v55 = vadd.f32 %v6653_v11, %v2096_v57  ;;  %v4188_v23 = vpop.f32.mrb[219].mxu1 }
 0x3dc   : > { %4399 = vmatmul.mubr.f32.gmra.mrb[214].mxu0 %v5235_v20 }
 0x3dd   : > { %5240 = vtanh.f32 %v2097_v55  ;;  %4401 = vmatprep.mubr.msk.f32.mxu0 %vm5405_vm0, %v5406_v6 }
 0x3de   : > { %v2101_v25 = vpop.f32.mrb[220].mxu1 }
 0x3df   : > { %v5237_v63 = vpop.eup %5236  ;;  %v2102_v26 = vadd.f32 %v6653_v11, %v2101_v25  ;;  %v4191_v27 = vpop.f32.mrb[221].mxu1 }
 0x3e0   : > { %4402 = vmatmul.mubr.f32.gmra.mrb[216].mxu0 %v5237_v63 }
 0x3e1   : > { %5242 = vtanh.f32 %v2102_v26  ;;  %4404 = vmatprep.mubr.msk.f32.mxu0 %vm5405_vm0, %v5406_v6 }
 0x3e2   : > { %v2106_v4 = vpop.f32.mrb[222].mxu1 }
 0x3e3   : > { %v5239_v7 = vpop.eup %5238  ;;  %v2107_v30 = vadd.f32 %v6653_v11, %v2106_v4  ;;  %v4194_v31 = vpop.f32.mrb[223].mxu1 }
 0x3e4   : > { %4405 = vmatmul.mubr.f32.gmra.mrb[218].mxu0 %v5239_v7 }
 0x3e5   : > { %5244 = vtanh.f32 %v2107_v30  ;;  %4407 = vmatprep.mubr.msk.f32.mxu0 %vm5405_vm0, %v5406_v6 }
 0x3e6   : > { %v2111_v41 = vpop.f32.mrb[224].mxu1 }
 0x3e7   : > { %v5241_v15 = vpop.eup %5240  ;;  %v2112_v13 = vadd.f32 %v6653_v11, %v2111_v41  ;;  %v4197_v35 = vpop.f32.mrb[225].mxu1 }
 0x3e8   : > { %4408 = vmatmul.mubr.f32.gmra.mrb[220].mxu0 %v5241_v15 }
 0x3e9   : > { %5246 = vtanh.f32 %v2112_v13  ;;  %4410 = vmatprep.mubr.msk.f32.mxu0 %vm5405_vm0, %v5406_v6 }
 0x3ea   : > { %v2116_v22 = vpop.f32.mrb[226].mxu1 }
 0x3eb   : > { %v5243_v24 = vpop.eup %5242  ;;  %v2117_v37 = vadd.f32 %v6653_v11, %v2116_v22  ;;  %v4200_v28 = vpop.f32.mrb[227].mxu1 }
 0x3ec   : > { %4411 = vmatmul.mubr.f32.gmra.mrb[222].mxu0 %v5243_v24 }
 0x3ed   : > { %5248 = vtanh.f32 %v2117_v37  ;;  %4413 = vmatprep.mubr.msk.f32.mxu0 %vm5405_vm0, %v5406_v6 }
 0x3ee   : > { %v2121_v38 = vpop.f32.mrb[228].mxu1 }
 0x3ef   : > { %v5245_v34 = vpop.eup %5244  ;;  %v2122_v40 = vadd.f32 %v6653_v11, %v2121_v38  ;;  %v4203_v52 = vpop.f32.mrb[229].mxu1 }
 0x3f0   : > { %4414 = vmatmul.mubr.f32.gmra.mrb[224].mxu0 %v5245_v34 }
 0x3f1   : > { %5250 = vtanh.f32 %v2122_v40  ;;  %4416 = vmatprep.mubr.msk.f32.mxu0 %vm5405_vm0, %v5406_v6 }
 0x3f2   : > { %v2126_v42 = vpop.f32.mrb[230].mxu1 }
 0x3f3   : > { %v5247_v33 = vpop.eup %5246  ;;  %v2127_v43 = vadd.f32 %v6653_v11, %v2126_v42  ;;  %v4206_v46 = vpop.f32.mrb[231].mxu1 }
 0x3f4   : > { %4417 = vmatmul.mubr.f32.gmra.mrb[226].mxu0 %v5247_v33 }
 0x3f5   : > { %5252 = vtanh.f32 %v2127_v43  ;;  %4419 = vmatprep.mubr.msk.f32.mxu0 %vm5405_vm0, %v5406_v6 }
 0x3f6   : > { %v2131_v59 = vpop.f32.mrb[232].mxu1 }
 0x3f7   : > { %v5249_v48 = vpop.eup %5248  ;;  %v2132_v51 = vadd.f32 %v6653_v11, %v2131_v59  ;;  %v4209_v2 = vpop.f32.mrb[233].mxu1 }
 0x3f8   : > { %4420 = vmatmul.mubr.f32.gmra.mrb[228].mxu0 %v5249_v48 }
 0x3f9   : > { %5254 = vtanh.f32 %v2132_v51  ;;  %4422 = vmatprep.mubr.msk.f32.mxu0 %vm5405_vm0, %v5406_v6 }
 0x3fa   : > { %v2136_v39 = vpop.f32.mrb[234].mxu1 }
 0x3fb   : > { %v5251_v50 = vpop.eup %5250  ;;  %v2137_v53 = vadd.f32 %v6653_v11, %v2136_v39  ;;  %v4212_v54 = vpop.f32.mrb[235].mxu1 }
 0x3fc   : > { %4423 = vmatmul.mubr.f32.gmra.mrb[230].mxu0 %v5251_v50 }
 0x3fd   : > { %5256 = vtanh.f32 %v2137_v53  ;;  %4425 = vmatprep.mubr.msk.f32.mxu0 %vm5405_vm0, %v5406_v6 }
 0x3fe   : > { %v2141_v58 = vpop.f32.mrb[236].mxu1 }
 0x3ff   : > { %v5253_v60 = vpop.eup %5252  ;;  %v2142_v61 = vadd.f32 %v6653_v11, %v2141_v58  ;;  %v4215_v32 = vpop.f32.mrb[237].mxu1 }
 0x400   : > { %4426 = vmatmul.mubr.f32.gmra.mrb[232].mxu0 %v5253_v60 }
 0x401   : > { %5258 = vtanh.f32 %v2142_v61  ;;  %4428 = vmatprep.mubr.msk.f32.mxu0 %vm5405_vm0, %v5406_v6 }
 0x402   : > { %v2146_v29 = vpop.f32.mrb[238].mxu1 }
 0x403   : > { %v5255_v62 = vpop.eup %5254  ;;  %v2147_v36 = vadd.f32 %v6653_v11, %v2146_v29  ;;  %v4218_v0 = vpop.f32.mrb[239].mxu1 }
 0x404   : > { %4429 = vmatmul.mubr.f32.gmra.mrb[234].mxu0 %v5255_v62 }
 0x405   : > { %5260 = vtanh.f32 %v2147_v36  ;;  %4431 = vmatprep.mubr.msk.f32.mxu0 %vm5405_vm0, %v5406_v6 }
 0x406   : > { %v2151_v45 = vpop.f32.mrb[240].mxu1 }
 0x407   : > { %v5257_v56 = vpop.eup %5256  ;;  %v2152_v5 = vadd.f32 %v6653_v11, %v2151_v45  ;;  %v4221_v8 = vpop.f32.mrb[241].mxu1 }
 0x408   : > { %4432 = vmatmul.mubr.f32.gmra.mrb[236].mxu0 %v5257_v56 }
 0x409   : > { %5262 = vtanh.f32 %v2152_v5  ;;  %4434 = vmatprep.mubr.msk.f32.mxu0 %vm5405_vm0, %v5406_v6 }
 0x40a   : > { %v2156_v9 = vpop.f32.mrb[242].mxu1 }
 0x40b   : > { %v5259_v1 = vpop.eup %5258  ;;  %v2157_v10 = vadd.f32 %v6653_v11, %v2156_v9  ;;  %v4224_v14 = vpop.f32.mrb[243].mxu1 }
 0x40c   : > { %4435 = vmatmul.mubr.f32.gmra.mrb[238].mxu0 %v5259_v1 }
 0x40d   : > { %5264 = vtanh.f32 %v2157_v10  ;;  %4437 = vmatprep.mubr.msk.f32.mxu0 %vm5405_vm0, %v5406_v6 }
 0x40e   : > { %v2161_v12 = vpop.f32.mrb[244].mxu1 }
 0x40f   : > { %v5261_v16 = vpop.eup %5260  ;;  %v2162_v17 = vadd.f32 %v6653_v11, %v2161_v12  ;;  %v4227_v19 = vpop.f32.mrb[245].mxu1 }
 0x410   : > { %4438 = vmatmul.mubr.f32.gmra.mrb[240].mxu0 %v5261_v16 }
 0x411   : > { %5266 = vtanh.f32 %v2162_v17  ;;  %4440 = vmatprep.mubr.msk.f32.mxu0 %vm5405_vm0, %v5406_v6 }
 0x412   : > { %v2166_v44 = vpop.f32.mrb[246].mxu1 }
 0x413   : > { %v5263_v3 = vpop.eup %5262  ;;  %v2167_v18 = vadd.f32 %v6653_v11, %v2166_v44  ;;  %v4230_v21 = vpop.f32.mrb[247].mxu1 }
 0x414   : > { %4441 = vmatmul.mubr.f32.gmra.mrb[242].mxu0 %v5263_v3 }
 0x415   : > { %5268 = vtanh.f32 %v2167_v18  ;;  %4443 = vmatprep.mubr.msk.f32.mxu0 %vm5405_vm0, %v5406_v6 }
 0x416   : > { %v2171_v49 = vpop.f32.mrb[248].mxu1 }
 0x417   : > { %v5265_v47 = vpop.eup %5264  ;;  %v2172_v57 = vadd.f32 %v6653_v11, %v2171_v49  ;;  %v4233_v20 = vpop.f32.mrb[249].mxu1 }
 0x418   : > { %4444 = vmatmul.mubr.f32.gmra.mrb[244].mxu0 %v5265_v47 }
 0x419   : > { %5270 = vtanh.f32 %v2172_v57  ;;  %4446 = vmatprep.mubr.msk.f32.mxu0 %vm5405_vm0, %v5406_v6 }
 0x41a   : > { %v2176_v55 = vpop.f32.mrb[250].mxu1 }
 0x41b   : > { %v5267_v23 = vpop.eup %5266  ;;  %v2177_v25 = vadd.f32 %v6653_v11, %v2176_v55  ;;  %v4236_v63 = vpop.f32.mrb[251].mxu1 }
 0x41c   : > { %4447 = vmatmul.mubr.f32.gmra.mrb[246].mxu0 %v5267_v23 }
 0x41d   : > { %5272 = vtanh.f32 %v2177_v25  ;;  %4449 = vmatprep.mubr.msk.f32.mxu0 %vm5405_vm0, %v5406_v6 }
 0x41e   : > { %v2181_v26 = vpop.f32.mrb[252].mxu1 }
 0x41f   : > { %v5269_v27 = vpop.eup %5268  ;;  %v2182_v4 = vadd.f32 %v6653_v11, %v2181_v26  ;;  %v4239_v7 = vpop.f32.mrb[253].mxu1 }
 0x420   : > { %4450 = vmatmul.mubr.f32.gmra.mrb[248].mxu0 %v5269_v27 }
 0x421   : > { %5274 = vtanh.f32 %v2182_v4  ;;  %4452 = vmatprep.mubr.msk.f32.mxu0 %vm5405_vm0, %v5406_v6 }
 0x422   : > { %v2186_v30 = vpop.f32.mrb[254].mxu1 }
 0x423   : > { %v5271_v31 = vpop.eup %5270  ;;  %v2187_v41 = vadd.f32 %v6653_v11, %v2186_v30  ;;  %v4242_v15 = vpop.f32.mrb[255].mxu1 }
 0x424   : > { %4453 = vmatmul.mubr.f32.gmra.mrb[250].mxu0 %v5271_v31 }
 0x425   : > { %5276 = vtanh.f32 %v2187_v41  ;;  %4455 = vmatprep.mubr.msk.f32.mxu0 %vm5405_vm0, %v5406_v6 }
 0x426   : > { %v2191_v13 = vpop.f32.mrb[0].mxu1 }
 0x427   : > { %v5273_v35 = vpop.eup %5272  ;;  %v2192_v22 = vadd.f32 %v6653_v11, %v2191_v13  ;;  %v4245_v24 = vpop.f32.mrb[1].mxu1 }
 0x428   : > { %4456 = vmatmul.mubr.f32.gmra.mrb[252].mxu0 %v5273_v35 }
 0x429   : > { %5278 = vtanh.f32 %v2192_v22  ;;  %4458 = vmatprep.mubr.msk.f32.mxu0 %vm5405_vm0, %v5406_v6 }
 0x42a   : > { %v2196_v37 = vpop.f32.mrb[2].mxu1 }
 0x42b   : > { %v5275_v28 = vpop.eup %5274  ;;  %v2197_v38 = vadd.f32 %v6653_v11, %v2196_v37  ;;  %v4248_v34 = vpop.f32.mrb[3].mxu1 }
 0x42c   : > { %4459 = vmatmul.mubr.f32.gmra.mrb[254].mxu0 %v5275_v28 }
 0x42d   : > { %5280 = vtanh.f32 %v2197_v38  ;;  %4461 = vmatprep.mubr.msk.f32.mxu0 %vm5405_vm0, %v5406_v6 }
 0x42e   : > { %v2201_v40 = vpop.f32.mrb[4].mxu1 }
 0x42f   : > { %v5277_v52 = vpop.eup %5276  ;;  %v2202_v42 = vadd.f32 %v6653_v11, %v2201_v40  ;;  %v4251_v33 = vpop.f32.mrb[5].mxu1 }
 0x430   : > { %4462 = vmatmul.mubr.f32.gmra.mrb[0].mxu0 %v5277_v52 }
 0x431   : > { %5282 = vtanh.f32 %v2202_v42  ;;  %4464 = vmatprep.mubr.msk.f32.mxu0 %vm5405_vm0, %v5406_v6 }
 0x432   : > { %v2206_v43 = vpop.f32.mrb[6].mxu1 }
 0x433   : > { %v5279_v46 = vpop.eup %5278  ;;  %v2207_v59 = vadd.f32 %v6653_v11, %v2206_v43  ;;  %v4254_v48 = vpop.f32.mrb[7].mxu1 }
 0x434   : > { %4465 = vmatmul.mubr.f32.gmra.mrb[2].mxu0 %v5279_v46 }
 0x435   : > { %5284 = vtanh.f32 %v2207_v59  ;;  %4467 = vmatprep.mubr.msk.f32.mxu0 %vm5405_vm0, %v5406_v6 }
 0x436   : > { %v2211_v51 = vpop.f32.mrb[8].mxu1 }
 0x437   : > { %v5281_v2 = vpop.eup %5280  ;;  %v2212_v39 = vadd.f32 %v6653_v11, %v2211_v51  ;;  %v4257_v50 = vpop.f32.mrb[9].mxu1 }
 0x438   : > { %4468 = vmatmul.mubr.f32.gmra.mrb[4].mxu0 %v5281_v2 }
 0x439   : > { %5286 = vtanh.f32 %v2212_v39  ;;  %4470 = vmatprep.mubr.msk.f32.mxu0 %vm5405_vm0, %v5406_v6 }
 0x43a   : > { %v2216_v53 = vpop.f32.mrb[10].mxu1 }
 0x43b   : > { %v5283_v54 = vpop.eup %5282  ;;  %v2217_v58 = vadd.f32 %v6653_v11, %v2216_v53  ;;  %v4260_v60 = vpop.f32.mrb[11].mxu1 }
 0x43c   : > { %4471 = vmatmul.mubr.f32.gmra.mrb[6].mxu0 %v5283_v54 }
 0x43d   : > { %5288 = vtanh.f32 %v2217_v58  ;;  %4473 = vmatprep.mubr.msk.f32.mxu0 %vm5405_vm0, %v5406_v6 }
 0x43e   : > { %v2221_v61 = vpop.f32.mrb[12].mxu1 }
 0x43f   : > { %v5285_v32 = vpop.eup %5284  ;;  %v2222_v29 = vadd.f32 %v6653_v11, %v2221_v61  ;;  %v4263_v62 = vpop.f32.mrb[13].mxu1 }
 0x440   : > { %4474 = vmatmul.mubr.f32.gmra.mrb[8].mxu0 %v5285_v32 }
 0x441   : > { %5290 = vtanh.f32 %v2222_v29  ;;  %4476 = vmatprep.mubr.msk.f32.mxu0 %vm5405_vm0, %v5406_v6  ;;  %v6849_v29 = vld [vmem:[%s7074_s3 + $0x4] ss:$0 sm:$0xff] }
 0x442   : > { %v2226_v36 = vpop.f32.mrb[14].mxu1 }
 0x443   : > { %v5287_v0 = vpop.eup %5286  ;;  %v2227_v45 = vadd.f32 %v6653_v11, %v2226_v36  ;;  %v4266_v56 = vpop.f32.mrb[15].mxu1 }
 0x444   : > { %4477 = vmatmul.mubr.f32.gmra.mrb[10].mxu0 %v5287_v0 }
 0x445   : > { %5292 = vtanh.f32 %v2227_v45  ;;  %4479 = vmatprep.mubr.msk.f32.mxu0 %vm5405_vm0, %v5406_v6 }
 0x446   : > { %v2231_v5 = vpop.f32.mrb[16].mxu1 }
 0x447   : > { %v5289_v8 = vpop.eup %5288  ;;  %v2232_v9 = vadd.f32 %v6653_v11, %v2231_v5  ;;  %v4269_v1 = vpop.f32.mrb[17].mxu1 }
 0x448   : > { %4480 = vmatmul.mubr.f32.gmra.mrb[12].mxu0 %v5289_v8 }
 0x449   : > { %5294 = vtanh.f32 %v2232_v9  ;;  %4482 = vmatprep.mubr.msk.f32.mxu0 %vm5405_vm0, %v5406_v6 }
 0x44a   : > { %v2236_v10 = vpop.f32.mrb[18].mxu1 }
 0x44b   : > { %v5291_v14 = vpop.eup %5290  ;;  %v2237_v12 = vadd.f32 %v6653_v11, %v2236_v10  ;;  %v4272_v16 = vpop.f32.mrb[19].mxu1 }
 0x44c   : > { %4483 = vmatmul.mubr.f32.gmra.mrb[14].mxu0 %v5291_v14 }
 0x44d   : > { %5296 = vtanh.f32 %v2237_v12  ;;  %4485 = vmatprep.mubr.msk.f32.mxu0 %vm5405_vm0, %v5406_v6 }
 0x44e   : > { %v2241_v17 = vpop.f32.mrb[20].mxu1 }
 0x44f   : > { %v5293_v19 = vpop.eup %5292  ;;  %v2242_v44 = vadd.f32 %v6653_v11, %v2241_v17  ;;  %v4275_v3 = vpop.f32.mrb[21].mxu1 }
 0x450   : > { %4486 = vmatmul.mubr.f32.gmra.mrb[16].mxu0 %v5293_v19 }
 0x451   : > { %5298 = vtanh.f32 %v2242_v44  ;;  %4488 = vmatprep.mubr.msk.f32.mxu0 %vm5405_vm0, %v5406_v6 }
 0x452   : > { %v2246_v18 = vpop.f32.mrb[22].mxu1 }
 0x453   : > { %v5295_v21 = vpop.eup %5294  ;;  %v2247_v49 = vadd.f32 %v6653_v11, %v2246_v18  ;;  %v4278_v47 = vpop.f32.mrb[23].mxu1 }
 0x454   : > { %4489 = vmatmul.mubr.f32.gmra.mrb[18].mxu0 %v5295_v21 }
 0x455   : > { %5300 = vtanh.f32 %v2247_v49  ;;  %4491 = vmatprep.mubr.msk.f32.mxu0 %vm5405_vm0, %v5406_v6 }
 0x456   : > { %v2251_v57 = vpop.f32.mrb[24].mxu1 }
 0x457   : > { %v5297_v20 = vpop.eup %5296  ;;  %v2252_v55 = vadd.f32 %v6653_v11, %v2251_v57  ;;  %v4281_v23 = vpop.f32.mrb[25].mxu1 }
 0x458   : > { %4492 = vmatmul.mubr.f32.gmra.mrb[20].mxu0 %v5297_v20 }
 0x459   : > { %5302 = vtanh.f32 %v2252_v55  ;;  %4494 = vmatprep.mubr.msk.f32.mxu0 %vm5405_vm0, %v5406_v6 }
 0x45a   : > { %v2256_v25 = vpop.f32.mrb[26].mxu1 }
 0x45b   : > { %v5299_v63 = vpop.eup %5298  ;;  %v2257_v26 = vadd.f32 %v6653_v11, %v2256_v25  ;;  %v4284_v27 = vpop.f32.mrb[27].mxu1 }
 0x45c   : > { %4495 = vmatmul.mubr.f32.gmra.mrb[22].mxu0 %v5299_v63 }
 0x45d   : > { %5304 = vtanh.f32 %v2257_v26  ;;  %4497 = vmatprep.mubr.msk.f32.mxu0 %vm5405_vm0, %v5406_v6 }
 0x45e   : > { %v2261_v4 = vpop.f32.mrb[28].mxu1 }
 0x45f   : > { %v5301_v7 = vpop.eup %5300  ;;  %v2262_v30 = vadd.f32 %v6653_v11, %v2261_v4  ;;  %v4287_v31 = vpop.f32.mrb[29].mxu1 }
 0x460   : > { %4498 = vmatmul.mubr.f32.gmra.mrb[24].mxu0 %v5301_v7 }
 0x461   : > { %5306 = vtanh.f32 %v2262_v30  ;;  %4500 = vmatprep.mubr.msk.f32.mxu0 %vm5405_vm0, %v5406_v6 }
 0x462   : > { %v2266_v41 = vpop.f32.mrb[30].mxu1 }
 0x463   : > { %v5303_v15 = vpop.eup %5302  ;;  %v2267_v13 = vadd.f32 %v6653_v11, %v2266_v41  ;;  %v4290_v35 = vpop.f32.mrb[31].mxu1 }
 0x464   : > { %4501 = vmatmul.mubr.f32.gmra.mrb[26].mxu0 %v5303_v15 }
 0x465   : > { %5308 = vtanh.f32 %v2267_v13  ;;  %4503 = vmatprep.mubr.msk.f32.mxu0 %vm5405_vm0, %v5406_v6 }
 0x466   : > { %v2271_v22 = vpop.f32.mrb[32].mxu1 }
 0x467   : > { %v5305_v24 = vpop.eup %5304  ;;  %v2272_v37 = vadd.f32 %v6653_v11, %v2271_v22  ;;  %v4293_v28 = vpop.f32.mrb[33].mxu1 }
 0x468   : > { %4504 = vmatmul.mubr.f32.gmra.mrb[28].mxu0 %v5305_v24 }
 0x469   : > { %5310 = vtanh.f32 %v2272_v37  ;;  %4506 = vmatprep.mubr.msk.f32.mxu0 %vm5405_vm0, %v5406_v6 }
 0x46a   : > { %v2276_v38 = vpop.f32.mrb[34].mxu1 }
 0x46b   : > { %v5307_v34 = vpop.eup %5306  ;;  %v2277_v40 = vadd.f32 %v6653_v11, %v2276_v38  ;;  %v4296_v52 = vpop.f32.mrb[35].mxu1 }
 0x46c   : > { %4507 = vmatmul.mubr.f32.gmra.mrb[30].mxu0 %v5307_v34  ;;  %v5339_v52 = vld [vmem:[%s7074_s3 + $0x3] ss:$0 sm:$0xff] }
 0x46d   : > { %5312 = vtanh.f32 %v2277_v40  ;;  %4509 = vmatprep.mubr.msk.f32.mxu0 %vm5405_vm0, %v5406_v6 }
 0x46e   : > { %v2281_v42 = vpop.f32.mrb[36].mxu1 }
 0x46f   : > { %v5309_v33 = vpop.eup %5308  ;;  %v2282_v43 = vadd.f32 %v6653_v11, %v2281_v42  ;;  %v4299_v46 = vpop.f32.mrb[37].mxu1 }
 0x470   : > { %4510 = vmatmul.mubr.f32.gmra.mrb[32].mxu0 %v5309_v33 }
 0x471   : > { %5314 = vtanh.f32 %v2282_v43  ;;  %4512 = vmatprep.mubr.msk.f32.mxu0 %vm5405_vm0, %v5406_v6 }
 0x472   : > { %v2286_v59 = vpop.f32.mrb[38].mxu1 }
 0x473   : > { %v5311_v48 = vpop.eup %5310  ;;  %v2287_v51 = vadd.f32 %v6653_v11, %v2286_v59  ;;  %v4302_v2 = vpop.f32.mrb[39].mxu1 }
 0x474   : > { %4513 = vmatmul.mubr.f32.gmra.mrb[34].mxu0 %v5311_v48 }
 0x475   : > { %5316 = vtanh.f32 %v2287_v51  ;;  %4515 = vmatprep.mubr.msk.f32.mxu0 %vm5405_vm0, %v5406_v6 }
 0x476   : > { %v2291_v39 = vpop.f32.mrb[40].mxu1 }
 0x477   : > { %v5313_v50 = vpop.eup %5312  ;;  %v2292_v53 = vadd.f32 %v6653_v11, %v2291_v39  ;;  %v4305_v54 = vpop.f32.mrb[41].mxu1 }
 0x478   : > { %4516 = vmatmul.mubr.f32.gmra.mrb[36].mxu0 %v5313_v50 }
 0x479   : > { %5318 = vtanh.f32 %v2292_v53  ;;  %4518 = vmatprep.mubr.msk.f32.mxu0 %vm5405_vm0, %v5406_v6 }
 0x47a   : > { %v2296_v58 = vpop.f32.mrb[42].mxu1 }
 0x47b   : > { %v5315_v60 = vpop.eup %5314  ;;  %v2297_v61 = vadd.f32 %v6653_v11, %v2296_v58  ;;  %v4308_v32 = vpop.f32.mrb[43].mxu1 }
 0x47c   : > { %4519 = vmatmul.mubr.f32.gmra.mrb[38].mxu0 %v5315_v60 }
 0x47d   : > { %5320 = vtanh.f32 %v2297_v61  ;;  %4521 = vmatprep.mubr.msk.f32.mxu0 %vm5405_vm0, %v5406_v6 }
 0x47e   : > { %v2301_v62 = vpop.f32.mrb[44].mxu1 }
 0x47f   : > { %v5317_v36 = vpop.eup %5316  ;;  %v2302_v0 = vadd.f32 %v6653_v11, %v2301_v62  ;;  %v4311_v45 = vpop.f32.mrb[45].mxu1 }
 0x480   : > { %v2489_v56 = vpop.f32.mrb[190].mxu0  ;;  %4522 = vmatmul.mubr.f32.gmra.mrb[40].mxu0 %v5317_v36 }
 0x481   : > { %v2490_v5 = vadd.f32 %v6849_v29, %v2489_v56  ;;  %v4364_v8 = vpop.f32.mrb[191].mxu0  ;;  %5322 = vtanh.f32 %v2302_v0  ;;  %4524 = vmatprep.mubr.msk.f32.mxu0 %vm5405_vm0, %v5406_v6 }
 0x482   : > { %v2306_v9 = vpop.f32.mrb[46].mxu1 }
 0x483   : > { %2803 = vst [vmem:[%s6857_s6] sm:$0xff] %v2490_v5  ;;  %v5319_v1 = vpop.eup %5318  ;;  %v2307_v10 = vadd.f32 %v6653_v11, %v2306_v9  ;;  %v4314_v14 = vpop.f32.mrb[47].mxu1 }
 0x484   : > { %v2494_v12 = vpop.f32.mrb[192].mxu0  ;;  %4525 = vmatmul.mubr.f32.gmra.mrb[42].mxu0 %v5319_v1 }
 0x485   : > { %v2495_v16 = vadd.f32 %v6849_v29, %v2494_v12  ;;  %v4367_v17 = vpop.f32.mrb[193].mxu0  ;;  %5324 = vtanh.f32 %v2307_v10  ;;  %4527 = vmatprep.mubr.msk.f32.mxu0 %vm5405_vm0, %v5406_v6 }
 0x486   : > { %v2311_v19 = vpop.f32.mrb[48].mxu1 }
 0x487   : > { %2804 = vst [vmem:[%s6857_s6 + $0x8] sm:$0xff] %v2495_v16  ;;  %v5321_v44 = vpop.eup %5320  ;;  %v2312_v3 = vadd.f32 %v6653_v11, %v2311_v19  ;;  %v4317_v18 = vpop.f32.mrb[49].mxu1 }
 0x488   : > { %v2499_v21 = vpop.f32.mrb[194].mxu0  ;;  %4528 = vmatmul.mubr.f32.gmra.mrb[44].mxu0 %v5321_v44 }
 0x489   : > { %v2500_v49 = vadd.f32 %v6849_v29, %v2499_v21  ;;  %v4370_v47 = vpop.f32.mrb[195].mxu0  ;;  %5326 = vtanh.f32 %v2312_v3  ;;  %4530 = vmatprep.mubr.msk.f32.mxu0 %vm5405_vm0, %v5406_v6 }
 0x48a   : > { %v2316_v57 = vpop.f32.mrb[50].mxu1 }
 0x48b   : > { %2805 = vst [vmem:[%s6857_s6 + $0x10] sm:$0xff] %v2500_v49  ;;  %v5323_v20 = vpop.eup %5322  ;;  %v2317_v55 = vadd.f32 %v6653_v11, %v2316_v57  ;;  %v4320_v23 = vpop.f32.mrb[51].mxu1 }
 0x48c   : > { %v2504_v25 = vpop.f32.mrb[196].mxu0  ;;  %4531 = vmatmul.mubr.f32.gmra.mrb[46].mxu0 %v5323_v20 }
 0x48d   : > { %v2505_v63 = vadd.f32 %v6849_v29, %v2504_v25  ;;  %v4373_v26 = vpop.f32.mrb[197].mxu0  ;;  %5328 = vtanh.f32 %v2317_v55  ;;  %4533 = vmatprep.mubr.msk.f32.mxu0 %vm5405_vm0, %v5406_v6 }
 0x48e   : > { %v2321_v27 = vpop.f32.mrb[52].mxu1 }
 0x48f   : > { %2806 = vst [vmem:[%s6857_s6 + $0x18] sm:$0xff] %v2505_v63  ;;  %v5325_v4 = vpop.eup %5324  ;;  %v2322_v7 = vadd.f32 %v6653_v11, %v2321_v27  ;;  %v4323_v30 = vpop.f32.mrb[53].mxu1 }
 0x490   : > { %v2509_v31 = vpop.f32.mrb[198].mxu0  ;;  %4534 = vmatmul.mubr.f32.gmra.mrb[48].mxu0 %v5325_v4 }
 0x491   : > { %v2510_v41 = vadd.f32 %v6849_v29, %v2509_v31  ;;  %v4376_v15 = vpop.f32.mrb[199].mxu0  ;;  %5330 = vtanh.f32 %v2322_v7  ;;  %4536 = vmatprep.mubr.msk.f32.mxu0 %vm5405_vm0, %v5406_v6 }
 0x492   : > { %v2326_v13 = vpop.f32.mrb[54].mxu1 }
 0x493   : > { %2807 = vst [vmem:[%s6857_s6 + $0x20] sm:$0xff] %v2510_v41  ;;  %v5327_v35 = vpop.eup %5326  ;;  %v2327_v22 = vadd.f32 %v6653_v11, %v2326_v13  ;;  %v4326_v24 = vpop.f32.mrb[55].mxu1 }
 0x494   : > { %v2514_v37 = vpop.f32.mrb[200].mxu0  ;;  %4537 = vmatmul.mubr.f32.gmra.mrb[50].mxu0 %v5327_v35 }
 0x495   : > { %v2515_v28 = vadd.f32 %v6849_v29, %v2514_v37  ;;  %v4379_v38 = vpop.f32.mrb[201].mxu0  ;;  %5332 = vtanh.f32 %v2327_v22  ;;  %4539 = vmatprep.mubr.msk.f32.mxu0 %vm5405_vm0, %v5406_v6 }
 0x496   : > { %v2331_v34 = vpop.f32.mrb[56].mxu1 }
 0x497   : > { %2808 = vst [vmem:[%s6857_s6 + $0x28] sm:$0xff] %v2515_v28  ;;  %v5329_v40 = vpop.eup %5328  ;;  %v2332_v11 = vadd.f32 %v5339_v52, %v2331_v34  ;;  %v4329_v42 = vpop.f32.mrb[57].mxu1 }
 0x498   : > { %v2519_v33 = vpop.f32.mrb[202].mxu0  ;;  %4540 = vmatmul.mubr.f32.gmra.mrb[52].mxu0 %v5329_v40 }
 0x499   : > { %v2520_v43 = vadd.f32 %v6849_v29, %v2519_v33  ;;  %v4382_v46 = vpop.f32.mrb[203].mxu0  ;;  %5334 = vtanh.f32 %v2332_v11  ;;  %4542 = vmatprep.mubr.msk.f32.mxu0 %vm5405_vm0, %v5406_v6 }
 0x49b   : > { %2809 = vst [vmem:[%s6857_s6 + $0x30] sm:$0xff] %v2520_v43  ;;  %v5331_v59 = vpop.eup %5330  ;;  %v2524_v48 = vpop.f32.mrb[204].mxu0 }
 0x49c   : > { %v2525_v51 = vadd.f32 %v6849_v29, %v2524_v48  ;;  %v4385_v2 = vpop.f32.mrb[205].mxu0  ;;  %4543 = vmatmul.mubr.f32.gmra.mrb[54].mxu0 %v5331_v59 }
 0x49d   : > { %4545 = vmatprep.mubr.msk.f32.mxu0 %vm5405_vm0, %v5406_v6 }
 0x49e   : > { %2810 = vst [vmem:[%s6857_s6 + $0x38] sm:$0xff] %v2525_v51 }
 0x49f   : > { %v5333_v39 = vpop.eup %5332  ;;  %v2529_v50 = vpop.f32.mrb[206].mxu0 }
 0x4a0   : > { %v2530_v53 = vadd.f32 %v6849_v29, %v2529_v50  ;;  %v4388_v54 = vpop.f32.mrb[207].mxu0  ;;  %4546 = vmatmul.mubr.f32.gmra.mrb[56].mxu0 %v5333_v39 }
 0x4a1   : > { %4548 = vmatprep.mubr.msk.f32.mxu0 %vm5405_vm0, %v5406_v6 }
 0x4a2   : > { %2811 = vst [vmem:[%s6857_s6 + $0x40] sm:$0xff] %v2530_v53 }
 0x4a3   : > { %v5335_v58 = vpop.eup %5334  ;;  %v2534_v60 = vpop.f32.mrb[208].mxu0 }
 0x4a4   : > { %v2535_v61 = vadd.f32 %v6849_v29, %v2534_v60  ;;  %v4391_v32 = vpop.f32.mrb[209].mxu0  ;;  %4549 = vmatmul.mubr.f32.gmra.mrb[58].mxu0 %v5335_v58 }
 0x4a6   : > { %2812 = vst [vmem:[%s6857_s6 + $0x48] sm:$0xff] %v2535_v61 }
 0x4a7   : > { %v2539_v62 = vpop.f32.mrb[210].mxu0 }
 0x4a8   : > { %v2540_v36 = vadd.f32 %v6849_v29, %v2539_v62  ;;  %v4394_v0 = vpop.f32.mrb[211].mxu0 }
 0x4aa   : > { %2813 = vst [vmem:[%s6857_s6 + $0x50] sm:$0xff] %v2540_v36 }
 0x4ab   : > { %v2544_v45 = vpop.f32.mrb[212].mxu0 }
 0x4ac   : > { %v2545_v56 = vadd.f32 %v6849_v29, %v2544_v45  ;;  %v4397_v6 = vpop.f32.mrb[213].mxu0 }
 0x4ae   : > { %2814 = vst [vmem:[%s6857_s6 + $0x58] sm:$0xff] %v2545_v56 }
 0x4af   : > { %v2549_v5 = vpop.f32.mrb[214].mxu0 }
 0x4b0   : > { %v2550_v8 = vadd.f32 %v6849_v29, %v2549_v5  ;;  %v4400_v9 = vpop.f32.mrb[215].mxu0 }
 0x4b2   : > { %2815 = vst [vmem:[%s6857_s6 + $0x60] sm:$0xff] %v2550_v8 }
 0x4b3   : > { %v2554_v1 = vpop.f32.mrb[216].mxu0 }
 0x4b4   : > { %v2555_v10 = vadd.f32 %v6849_v29, %v2554_v1  ;;  %v4403_v14 = vpop.f32.mrb[217].mxu0 }
 0x4b6   : > { %2816 = vst [vmem:[%s6857_s6 + $0x68] sm:$0xff] %v2555_v10 }
 0x4b7   : > { %v2559_v12 = vpop.f32.mrb[218].mxu0 }
 0x4b8   : > { %v2560_v16 = vadd.f32 %v6849_v29, %v2559_v12  ;;  %v4406_v17 = vpop.f32.mrb[219].mxu0 }
 0x4ba   : > { %2817 = vst [vmem:[%s6857_s6 + $0x70] sm:$0xff] %v2560_v16 }
 0x4bb   : > { %v2564_v19 = vpop.f32.mrb[220].mxu0 }
 0x4bc   : > { %v2565_v44 = vadd.f32 %v6849_v29, %v2564_v19  ;;  %v4409_v3 = vpop.f32.mrb[221].mxu0 }
 0x4be   : > { %2818 = vst [vmem:[%s6857_s6 + $0x78] sm:$0xff] %v2565_v44 }
 0x4bf   : > { %v2569_v18 = vpop.f32.mrb[222].mxu0 }
 0x4c0   : > { %v2570_v21 = vadd.f32 %v6849_v29, %v2569_v18  ;;  %v4412_v49 = vpop.f32.mrb[223].mxu0 }
 0x4c2   : > { %2819 = vst [vmem:[%s6857_s6 + $0x80] sm:$0xff] %v2570_v21 }
 0x4c3   : > { %v2574_v47 = vpop.f32.mrb[224].mxu0 }
 0x4c4   : > { %v2575_v57 = vadd.f32 %v6849_v29, %v2574_v47  ;;  %v4415_v20 = vpop.f32.mrb[225].mxu0 }
 0x4c6   : > { %2820 = vst [vmem:[%s6857_s6 + $0x88] sm:$0xff] %v2575_v57 }
 0x4c7   : > { %v2579_v55 = vpop.f32.mrb[226].mxu0 }
 0x4c8   : > { %v2580_v23 = vadd.f32 %v6849_v29, %v2579_v55  ;;  %v4418_v25 = vpop.f32.mrb[227].mxu0 }
 0x4ca   : > { %2821 = vst [vmem:[%s6857_s6 + $0x90] sm:$0xff] %v2580_v23 }
 0x4cb   : > { %v2584_v63 = vpop.f32.mrb[228].mxu0 }
 0x4cc   : > { %v2585_v26 = vadd.f32 %v6849_v29, %v2584_v63  ;;  %v4421_v27 = vpop.f32.mrb[229].mxu0 }
 0x4ce   : > { %2822 = vst [vmem:[%s6857_s6 + $0x98] sm:$0xff] %v2585_v26 }
 0x4cf   : > { %v2589_v4 = vpop.f32.mrb[230].mxu0 }
 0x4d0   : > { %v2590_v7 = vadd.f32 %v6849_v29, %v2589_v4  ;;  %v4424_v30 = vpop.f32.mrb[231].mxu0 }
 0x4d2   : > { %2823 = vst [vmem:[%s6857_s6 + $0xa0] sm:$0xff] %v2590_v7 }
 0x4d3   : > { %v2594_v31 = vpop.f32.mrb[232].mxu0 }
 0x4d4   : > { %v2595_v41 = vadd.f32 %v6849_v29, %v2594_v31  ;;  %v4427_v15 = vpop.f32.mrb[233].mxu0 }
 0x4d6   : > { %2824 = vst [vmem:[%s6857_s6 + $0xa8] sm:$0xff] %v2595_v41 }
 0x4d7   : > { %v2599_v13 = vpop.f32.mrb[234].mxu0 }
 0x4d8   : > { %v2600_v35 = vadd.f32 %v6849_v29, %v2599_v13  ;;  %v4430_v22 = vpop.f32.mrb[235].mxu0 }
 0x4da   : > { %2825 = vst [vmem:[%s6857_s6 + $0xb0] sm:$0xff] %v2600_v35 }
 0x4db   : > { %v2604_v24 = vpop.f32.mrb[236].mxu0 }
 0x4dc   : > { %v2605_v37 = vadd.f32 %v6849_v29, %v2604_v24  ;;  %v4433_v28 = vpop.f32.mrb[237].mxu0 }
 0x4de   : > { %2826 = vst [vmem:[%s6857_s6 + $0xb8] sm:$0xff] %v2605_v37 }
 0x4df   : > { %v2609_v38 = vpop.f32.mrb[238].mxu0 }
 0x4e0   : > { %v2610_v34 = vadd.f32 %v6849_v29, %v2609_v38  ;;  %v4436_v40 = vpop.f32.mrb[239].mxu0 }
 0x4e2   : > { %2827 = vst [vmem:[%s6857_s6 + $0xc0] sm:$0xff] %v2610_v34 }
 0x4e3   : > { %v2614_v52 = vpop.f32.mrb[240].mxu0 }
 0x4e4   : > { %v2615_v11 = vadd.f32 %v6849_v29, %v2614_v52  ;;  %v4439_v42 = vpop.f32.mrb[241].mxu0 }
 0x4e6   : > { %2828 = vst [vmem:[%s6857_s6 + $0xc8] sm:$0xff] %v2615_v11 }
 0x4e7   : > { %v2619_v33 = vpop.f32.mrb[242].mxu0 }
 0x4e8   : > { %v2620_v43 = vadd.f32 %v6849_v29, %v2619_v33  ;;  %v4442_v46 = vpop.f32.mrb[243].mxu0 }
 0x4ea   : > { %2829 = vst [vmem:[%s6857_s6 + $0xd0] sm:$0xff] %v2620_v43 }
 0x4eb   : > { %v2624_v59 = vpop.f32.mrb[244].mxu0 }
 0x4ec   : > { %v2625_v48 = vadd.f32 %v6849_v29, %v2624_v59  ;;  %v4445_v51 = vpop.f32.mrb[245].mxu0 }
 0x4ee   : > { %2830 = vst [vmem:[%s6857_s6 + $0xd8] sm:$0xff] %v2625_v48 }
 0x4ef   : > { %v2629_v2 = vpop.f32.mrb[246].mxu0 }
 0x4f0   : > { %v2630_v39 = vadd.f32 %v6849_v29, %v2629_v2  ;;  %v4448_v50 = vpop.f32.mrb[247].mxu0 }
 0x4f2   : > { %2831 = vst [vmem:[%s6857_s6 + $0xe0] sm:$0xff] %v2630_v39 }
 0x4f3   : > { %v2634_v53 = vpop.f32.mrb[248].mxu0 }
 0x4f4   : > { %v2635_v54 = vadd.f32 %v6849_v29, %v2634_v53  ;;  %v4451_v58 = vpop.f32.mrb[249].mxu0 }
 0x4f6   : > { %2832 = vst [vmem:[%s6857_s6 + $0xe8] sm:$0xff] %v2635_v54 }
 0x4f7   : > { %v2639_v60 = vpop.f32.mrb[250].mxu0 }
 0x4f8   : > { %v2640_v61 = vadd.f32 %v6849_v29, %v2639_v60  ;;  %v4454_v32 = vpop.f32.mrb[251].mxu0 }
 0x4fa   : > { %2833 = vst [vmem:[%s6857_s6 + $0xf0] sm:$0xff] %v2640_v61 }
 0x4fb   : > { %v2644_v62 = vpop.f32.mrb[252].mxu0 }
 0x4fc   : > { %v2645_v36 = vadd.f32 %v6849_v29, %v2644_v62  ;;  %v4457_v0 = vpop.f32.mrb[253].mxu0 }
 0x4fe   : > { %2834 = vst [vmem:[%s6857_s6 + $0xf8] sm:$0xff] %v2645_v36 }
 0x4ff   : > { %v2649_v45 = vpop.f32.mrb[254].mxu0 }
 0x500   : > { %v2650_v56 = vadd.f32 %v6849_v29, %v2649_v45  ;;  %v4460_v6 = vpop.f32.mrb[255].mxu0 }
 0x502   : > { %2835 = vst [vmem:[%s6857_s6 + $0x100] sm:$0xff] %v2650_v56 }
 0x503   : > { %v2654_v5 = vpop.f32.mrb[0].mxu0 }
 0x504   : > { %v2655_v8 = vadd.f32 %v6849_v29, %v2654_v5  ;;  %v4463_v9 = vpop.f32.mrb[1].mxu0 }
 0x506   : > { %2836 = vst [vmem:[%s6857_s6 + $0x108] sm:$0xff] %v2655_v8 }
 0x507   : > { %v2659_v1 = vpop.f32.mrb[2].mxu0 }
 0x508   : > { %v2660_v10 = vadd.f32 %v6849_v29, %v2659_v1  ;;  %v4466_v14 = vpop.f32.mrb[3].mxu0 }
 0x50a   : > { %2837 = vst [vmem:[%s6857_s6 + $0x110] sm:$0xff] %v2660_v10 }
 0x50b   : > { %v2664_v12 = vpop.f32.mrb[4].mxu0 }
 0x50c   : > { %v2665_v16 = vadd.f32 %v6849_v29, %v2664_v12  ;;  %v4469_v17 = vpop.f32.mrb[5].mxu0 }
 0x50e   : > { %2838 = vst [vmem:[%s6857_s6 + $0x118] sm:$0xff] %v2665_v16 }
 0x50f   : > { %v2669_v19 = vpop.f32.mrb[6].mxu0 }
 0x510   : > { %v2670_v44 = vadd.f32 %v6849_v29, %v2669_v19  ;;  %v4472_v3 = vpop.f32.mrb[7].mxu0 }
 0x512   : > { %2839 = vst [vmem:[%s6857_s6 + $0x120] sm:$0xff] %v2670_v44 }
 0x513   : > { %v2674_v18 = vpop.f32.mrb[8].mxu0 }
 0x514   : > { %v2675_v21 = vadd.f32 %v6849_v29, %v2674_v18  ;;  %v4475_v49 = vpop.f32.mrb[9].mxu0 }
 0x516   : > { %2840 = vst [vmem:[%s6857_s6 + $0x128] sm:$0xff] %v2675_v21 }
 0x517   : > { %v2679_v47 = vpop.f32.mrb[10].mxu0 }
 0x518   : > { %v2680_v57 = vadd.f32 %v6849_v29, %v2679_v47  ;;  %v4478_v20 = vpop.f32.mrb[11].mxu0 }
 0x51a   : > { %2841 = vst [vmem:[%s6857_s6 + $0x130] sm:$0xff] %v2680_v57 }
 0x51b   : > { %v2684_v55 = vpop.f32.mrb[12].mxu0 }
 0x51c   : > { %v2685_v23 = vadd.f32 %v6849_v29, %v2684_v55  ;;  %v4481_v25 = vpop.f32.mrb[13].mxu0 }
 0x51e   : > { %2842 = vst [vmem:[%s6857_s6 + $0x138] sm:$0xff] %v2685_v23 }
 0x51f   : > { %v2689_v63 = vpop.f32.mrb[14].mxu0 }
 0x520   : > { %v2690_v26 = vadd.f32 %v6849_v29, %v2689_v63  ;;  %v4484_v27 = vpop.f32.mrb[15].mxu0 }
 0x522   : > { %2843 = vst [vmem:[%s6857_s6 + $0x140] sm:$0xff] %v2690_v26 }
 0x523   : > { %v2694_v4 = vpop.f32.mrb[16].mxu0 }
 0x524   : > { %v2695_v7 = vadd.f32 %v6849_v29, %v2694_v4  ;;  %v4487_v30 = vpop.f32.mrb[17].mxu0 }
 0x526   : > { %2844 = vst [vmem:[%s6857_s6 + $0x148] sm:$0xff] %v2695_v7 }
 0x527   : > { %v2699_v31 = vpop.f32.mrb[18].mxu0 }
 0x528   : > { %v2700_v41 = vadd.f32 %v6849_v29, %v2699_v31  ;;  %v4490_v15 = vpop.f32.mrb[19].mxu0 }
 0x52a   : > { %2845 = vst [vmem:[%s6857_s6 + $0x150] sm:$0xff] %v2700_v41 }
 0x52b   : > { %v2704_v13 = vpop.f32.mrb[20].mxu0 }
 0x52c   : > { %v2705_v35 = vadd.f32 %v6849_v29, %v2704_v13  ;;  %v4493_v22 = vpop.f32.mrb[21].mxu0 }
 0x52e   : > { %2846 = vst [vmem:[%s6857_s6 + $0x158] sm:$0xff] %v2705_v35 }
 0x52f   : > { %v2709_v24 = vpop.f32.mrb[22].mxu0 }
 0x530   : > { %v2710_v37 = vadd.f32 %v6849_v29, %v2709_v24  ;;  %v4496_v28 = vpop.f32.mrb[23].mxu0 }
 0x532   : > { %2847 = vst [vmem:[%s6857_s6 + $0x160] sm:$0xff] %v2710_v37 }
 0x533   : > { %v2714_v38 = vpop.f32.mrb[24].mxu0 }
 0x534   : > { %v2715_v34 = vadd.f32 %v6849_v29, %v2714_v38  ;;  %v4499_v40 = vpop.f32.mrb[25].mxu0 }
 0x536   : > { %2848 = vst [vmem:[%s6857_s6 + $0x168] sm:$0xff] %v2715_v34 }
 0x537   : > { %v2719_v52 = vpop.f32.mrb[26].mxu0 }
 0x538   : > { %v2720_v11 = vadd.f32 %v6849_v29, %v2719_v52  ;;  %v4502_v42 = vpop.f32.mrb[27].mxu0 }
 0x53a   : > { %2849 = vst [vmem:[%s6857_s6 + $0x170] sm:$0xff] %v2720_v11 }
 0x53b   : > { %v2724_v33 = vpop.f32.mrb[28].mxu0 }
 0x53c   : > { %v2725_v43 = vadd.f32 %v6849_v29, %v2724_v33  ;;  %v4505_v46 = vpop.f32.mrb[29].mxu0 }
 0x53e   : > { %2850 = vst [vmem:[%s6857_s6 + $0x178] sm:$0xff] %v2725_v43 }
 0x53f   : > { %v2729_v59 = vpop.f32.mrb[30].mxu0 }
 0x540   : > { %v2730_v48 = vadd.f32 %v6849_v29, %v2729_v59  ;;  %v4508_v51 = vpop.f32.mrb[31].mxu0 }
 0x542   : > { %2851 = vst [vmem:[%s6857_s6 + $0x180] sm:$0xff] %v2730_v48 }
 0x543   : > { %v2734_v2 = vpop.f32.mrb[32].mxu0 }
 0x544   : > { %v2735_v39 = vadd.f32 %v6849_v29, %v2734_v2  ;;  %v4511_v50 = vpop.f32.mrb[33].mxu0 }
 0x546   : > { %2852 = vst [vmem:[%s6857_s6 + $0x188] sm:$0xff] %v2735_v39 }
 0x547   : > { %v2739_v53 = vpop.f32.mrb[34].mxu0 }
 0x548   : > { %v2740_v54 = vadd.f32 %v6849_v29, %v2739_v53  ;;  %v4514_v58 = vpop.f32.mrb[35].mxu0 }
 0x54a   : > { %2853 = vst [vmem:[%s6857_s6 + $0x190] sm:$0xff] %v2740_v54 }
 0x54b   : > { %v2744_v60 = vpop.f32.mrb[36].mxu0 }
 0x54c   : > { %v2745_v61 = vadd.f32 %v6849_v29, %v2744_v60  ;;  %v4517_v32 = vpop.f32.mrb[37].mxu0 }
 0x54e   : > { %2854 = vst [vmem:[%s6857_s6 + $0x198] sm:$0xff] %v2745_v61 }
 0x54f   : > { %v2749_v62 = vpop.f32.mrb[38].mxu0 }
 0x550   : > { %v2750_v36 = vadd.f32 %v6849_v29, %v2749_v62  ;;  %v4520_v0 = vpop.f32.mrb[39].mxu0 }
 0x552   : > { %2855 = vst [vmem:[%s6857_s6 + $0x1a0] sm:$0xff] %v2750_v36 }
 0x553   : > { %v2754_v45 = vpop.f32.mrb[40].mxu0 }
 0x554   : > { %v2755_v56 = vadd.f32 %v6849_v29, %v2754_v45  ;;  %v4523_v6 = vpop.f32.mrb[41].mxu0 }
 0x556   : > { %2856 = vst [vmem:[%s6857_s6 + $0x1a8] sm:$0xff] %v2755_v56 }
 0x557   : > { %v2759_v5 = vpop.f32.mrb[42].mxu0 }
 0x558   : > { %v2760_v8 = vadd.f32 %v6849_v29, %v2759_v5  ;;  %v4526_v9 = vpop.f32.mrb[43].mxu0 }
 0x55a   : > { %2857 = vst [vmem:[%s6857_s6 + $0x1b0] sm:$0xff] %v2760_v8 }
 0x55b   : > { %v2764_v1 = vpop.f32.mrb[44].mxu0 }
 0x55c   : > { %v2765_v10 = vadd.f32 %v6849_v29, %v2764_v1  ;;  %v4529_v14 = vpop.f32.mrb[45].mxu0 }
 0x55e   : > { %2858 = vst [vmem:[%s6857_s6 + $0x1b8] sm:$0xff] %v2765_v10 }
 0x55f   : > { %v2769_v12 = vpop.f32.mrb[46].mxu0 }
 0x560   : > { %v2770_v16 = vadd.f32 %v6849_v29, %v2769_v12  ;;  %v4532_v17 = vpop.f32.mrb[47].mxu0 }
 0x562   : > { %2859 = vst [vmem:[%s6857_s6 + $0x1c0] sm:$0xff] %v2770_v16 }
 0x563   : > { %v2774_v19 = vpop.f32.mrb[48].mxu0 }
 0x564   : > { %v2775_v44 = vadd.f32 %v6849_v29, %v2774_v19  ;;  %v4535_v3 = vpop.f32.mrb[49].mxu0 }
 0x566   : > { %2860 = vst [vmem:[%s6857_s6 + $0x1c8] sm:$0xff] %v2775_v44 }
 0x567   : > { %v2779_v18 = vpop.f32.mrb[50].mxu0 }
 0x568   : > { %v2780_v21 = vadd.f32 %v6849_v29, %v2779_v18  ;;  %v4538_v49 = vpop.f32.mrb[51].mxu0 }
 0x56a   : > { %2861 = vst [vmem:[%s6857_s6 + $0x1d0] sm:$0xff] %v2780_v21 }
 0x56b   : > { %v2784_v47 = vpop.f32.mrb[52].mxu0 }
 0x56c   : > { %v2785_v57 = vadd.f32 %v6849_v29, %v2784_v47  ;;  %v4541_v20 = vpop.f32.mrb[53].mxu0 }
 0x56e   : > { %2862 = vst [vmem:[%s6857_s6 + $0x1d8] sm:$0xff] %v2785_v57 }
 0x56f   : > { %v2789_v55 = vpop.f32.mrb[54].mxu0 }
 0x570   : > { %v2790_v23 = vadd.f32 %v6849_v29, %v2789_v55  ;;  %v4544_v25 = vpop.f32.mrb[55].mxu0 }
 0x572   : > { %2863 = vst [vmem:[%s6857_s6 + $0x1e0] sm:$0xff] %v2790_v23 }
 0x573   : > { %v2794_v63 = vpop.f32.mrb[56].mxu0 }
 0x574   : > { %v2795_v26 = vadd.f32 %v6849_v29, %v2794_v63  ;;  %v4547_v27 = vpop.f32.mrb[57].mxu0  ;;  %2873 = sbr.rel (!%p5473_p5) target bundleno = 1431 (0x597), region = 40 }
 0x576   : > { %2864 = vst [vmem:[%s6857_s6 + $0x1e8] sm:$0xff] %v2795_v26 }
 0x577   : > { %v2799_v4 = vpop.f32.mrb[58].mxu0 }
 0x578   : > { %v2800_v7 = vadd.f32 %v6849_v29, %v2799_v4  ;;  %v4550_v30 = vpop.f32.mrb[59].mxu0 }
 0x57a   : > { %2865 = vst [vmem:[%s6857_s6 + $0x1f0] sm:$0xff] %v2800_v7 }
 0x57b   : > { %s7083_s10 = smov (!%p2876_p11, %s2875_s10), 63 }
 0x57c   : > { %s7015_s11 = sshll.u32 %s7083_s10, 7 }
 0x57d   : > { %s2880_s12 = ssub.s32 8064, %s7015_s11 }
 0x57e   : > { %2881 = vsyncadd %s7010_s8, %s2880_s12  ;;  %p3074_p12 = scmp.ne.s32.totalorder %s7015_s11, 0  ;;  %s3080_s13 = smul.u32 8064, %s5456_s19 }
 0x57f   : > { %s2886_s14 = sshll.u32 %s6857_s6, 4  ;;  %s5407_s23 = smov [#allocation2]   ;;  %s7027_s14 = int_to_ptr.vmem [resolvable:$true] %s2886_s14 }
 0x580   : > { %s7025_s22 = scalar_lea.hbm %s7075_s4, %s3080_s13  ;;  %s5340_s9 = scalar_lea.vmem %s7027_s14, %s7015_s11 }
 0x581   : > { %p5341_p13 = scmp.ne.s32.totalorder %s7027_s14, %s5340_s9  ;;  %s5344_s28 = sshll.u32 %s5407_s23, 4  ;;  %s5345_s28 = int_to_ptr.vmem [resolvable:$false] %s5344_s28 }
 0x582   : > { %s5346_s19 = scalar_lea.vmem %s5345_s28, 16128  ;;  %p5347_p2 = scmp.lt.s32.totalorder %s7027_s14, %s5345_s28 }
 0x583   : > { %p5342_p0 = pnand %p5341_p13, %p3074_p12  ;;  %p5348_p3 = scmp.lt.s32.totalorder %s5346_s19, %s5340_s9 }
 0x585   : > { %p5343_p1 = pneg %p5342_p0  ;;  %p5349_p4 = por %p5348_p3, %p5347_p2 }
 0x587   : > { %p5350_p5 = pnand %p5349_p4, %p5343_p1 }
 0x589   : > { %5353 = shalt.err (!%p5350_p5)
}
 0x58a   : > { %s5354_s29 = scalar_lea.hbm %s7025_s22, %s7015_s11  ;;  %s5358_s6 = scalar_lea.hbm %s7075_s4, 16000 }
 0x58b   : > { %p5355_p7 = scmp.ne.s32.totalorder %s7025_s22, %s5354_s29  ;;  %p5359_p10 = scmp.lt.u32.totalorder %s7025_s22, %s7075_s4 }
 0x58c   : > { %p5360_p11 = scmp.lt.u32.totalorder %s5358_s6, %s5354_s29  ;;  %p5362_p0 = scmp.lt.u32.totalorder %s5354_s29, %s7025_s22 }
 0x58d   : > { %p5356_p8 = pnand %p5355_p7, %p3074_p12 }
 0x58e   : > { %p5361_p13 = por %p5360_p11, %p5359_p10 }
 0x58f   : > { %p5357_p9 = pneg %p5356_p8 }
 0x590   : > { %p5363_p1 = por %p5362_p0, %p5361_p13 }
 0x592   : > { %p5364_p2 = pnand %p5363_p1, %p5357_p9 }
 0x594   : > { %5367 = shalt.err (!%p5364_p2)
}
 0x595   : > { %s5408_s10 = smov 128   ;;  %s5409_s12 = smov 8  }
 0x596   : > { %2892 = dma.vmem_to_hbm [thread:$0]  (%p3074_p12), %s7027_s14, %s7015_s11, %s7025_s22, %s7010_s8, %s5408_s10, %s5408_s10, %s5409_s12  }
 0x597 PF: > { %p4668_p3 = scmp.ge.s32.totalorder %s5402_s18, 2  ;;  %s2901_s13 = sand.u32 1, %s5390_s15  }
 0x598   : > { %s2902_s25 = scalar_lea.sflag [#allocation3], %s2901_s13 }
 0x599   : > { %p4665_p4 = pnand %p4668_p3, %p5477_p6 }
 0x59b   : > { %5385 = dma.done.wait (!%p4665_p4), %s2902_s25, 8064  }
 0x59c   : > { %5387 = vsyncadd (!%p4665_p4), %s2902_s25, 4294959232  ;;  %p14_p5 = scmp.ge.s32.totalorder %s5460_s21, 4   ;;  %s7078_s15 = smov %s5394_s16 }
 0x59d   : > { %s7079_s16 = smov %s5398_s17  ;;  %s7080_s17 = smov %s5471_s24 }
 0x59e   : > { %s7081_s18 = smov %s5460_s21  ;;  %16 = sbr.rel (!%p14_p5) target bundleno = 3 (0x3), region = 78 }
 0x5a5   :  { %2907 = vsyncpa [#allocation3], 1 }
 0x5a6   :  { %2909 = vsyncpa [#allocation3 + $0x1], 1 }

</bundles_post_ra>
